<compile_context>
chip_gen: v7x
topology: tpu7x:2x2x1
jax: 0.10.0
libtpu: 0.0.40
codegen_flags: <defaults>
</compile_context>

<pallas_src>
import jax
import jax.numpy as jnp
import numpy as np
from jax.experimental import pallas as pl
from jax.experimental.pallas import tpu as pltpu

N_HALF = 3          # x.chunk(2, dim=1) half width; matches the hardcoded st[:, :3]
N_FULL = 2 * N_HALF
N_HIDDEN = 256      # LinearModel hidden width (torch default 2048; small demo size)
MAX_BB = 1024       # largest batch tile (multiple of 256; fits easily in VMEM)
BB_ALIGN = 256      # tile alignment: MXU M on v6e/v7x (also a multiple of v5e's 128)


def affine_coupling_kernel(x_ref,
                           w1_ref, b1_ref, w2_ref, b2_ref, w3_ref, b3_ref,
                           w4_ref, b4_ref, w5t_ref, b5_ref,
                           out_ref):
    x = x_ref[...]                          # (BB, 6) f32
    x_change = x[:, :N_HALF]                # (BB, 3)
    x_id = x[:, N_HALF:]                    # (BB, 3)

    def mm(a, w_ref):
        # bf16 MXU operands, f32 accumulation.
        return jnp.dot(a.astype(jnp.bfloat16), w_ref[...],
                       preferred_element_type=jnp.float32)

    # --- lin1 (K=3): 3 VPU broadcast-FMAs instead of a near-empty MXU pass ---
    w1 = w1_ref[...]                        # (3, 256) f32
    h = (x_id[:, 0:1] * w1[0:1, :] +
         x_id[:, 1:2] * w1[1:2, :] +
         x_id[:, 2:3] * w1[2:3, :] + b1_ref[...])
    h = jnp.maximum(h, 0.0)                 # (BB, 256) f32

    # --- residual blocks lin2..lin4 on the MXU ---
    h = h + jnp.maximum(mm(h, w2_ref) + b2_ref[...], 0.0)
    h = h + jnp.maximum(mm(h, w3_ref) + b3_ref[...], 0.0)
    h = h + jnp.maximum(mm(h, w4_ref) + b4_ref[...], 0.0)

    # --- lin5: only 6 real output lanes -> 6 VPU multiplies + lane reductions ---
    w5t = w5t_ref[...]                      # (6, 256) f32 (transposed lin5 weight)

    def proj(j):                            # (BB, 1) f32; static j, unrolled
        return jnp.sum(h * w5t[j:j + 1, :], axis=-1, keepdims=True)

    st = jnp.concatenate([proj(j) for j in range(N_FULL)], axis=1) + b5_ref[...]

    # --- affine coupling (forward direction, reverse=False), f32 VPU/EUP math ---
    s = jnp.tanh(st[:, :N_HALF])            # (BB, 3)
    t = st[:, N_HALF:]                      # (BB, 3)
    xc = x_change * jnp.exp(s) + t          # (BB, 3)
    sum_s = jnp.sum(s, axis=-1, keepdims=True)  # (BB, 1)

    out_ref[...] = jnp.concatenate([xc, sum_s], axis=1)  # (BB, 4)


def init_params(key, n_in=N_HALF, n_out=N_FULL, n_hidden=N_HIDDEN):
    """Deterministic init mimicking torch.nn.Linear's U(-1/sqrt(fan_in), ...)."""
    dims = [(n_in, n_hidden), (n_hidden, n_hidden), (n_hidden, n_hidden),
            (n_hidden, n_hidden), (n_hidden, n_out)]
    params = []
    for (fan_in, fan_out) in dims:
        key, kw, kb = jax.random.split(key, 3)
        bound = 1.0 / np.sqrt(fan_in)
        w = jax.random.uniform(kw, (fan_in, fan_out), jnp.float32, -bound, bound)
        b = jax.random.uniform(kb, (1, fan_out), jnp.float32, -bound, bound)
        params += [w, b]
    return tuple(params)


def prepare_params(params):
    """Kernel-ready params.

    lin1 stays f32 (used as VPU broadcast-FMAs), residual lin2..lin4 weights are
    bf16 (MXU operands), lin5 weight is transposed to (6, 256) f32 for the VPU
    lane-reduction projection.  Biases stay f32.
    """
    w1, b1, w2, b2, w3, b3, w4, b4, w5, b5 = params
    return (w1, b1,
            w2.astype(jnp.bfloat16), b2,
            w3.astype(jnp.bfloat16), b3,
            w4.astype(jnp.bfloat16), b4,
            w5.T, b5)


def _pick_bb(batch, max_bb=MAX_BB, align=BB_ALIGN):
    """256-aligned batch tile, capped at max_bb, aiming for >=2 grid steps."""
    bp_min = -(-batch // align) * align
    if bp_min <= align:                     # tiny batch: single aligned step
        return align
    target = -(-bp_min // 2)                # prefer >=2 steps (v7x TC sharding)
    return min(max_bb, -(-target // align) * align)


def affine_coupling_forward(x, ldj, kparams, bb=None):
    B, n_full = x.shape
    assert n_full == N_FULL
    if bb is None:
        bb = _pick_bb(B)
    Bp = -(-B // bb) * bb                   # pad batch to a multiple of the tile
    xp = x if Bp == B else jnp.pad(x, ((0, Bp - B), (0, 0)))

    def batch_spec(shape):
        return pl.BlockSpec(shape, lambda i: (i, 0))

    def const_spec(arr):
        # Constant index map: whole array fetched once, not re-DMA'd per step.
        return pl.BlockSpec(arr.shape, lambda i: (0, 0))

    in_specs = [batch_spec((bb, N_FULL))] + [const_spec(p) for p in kparams]
    out_specs = batch_spec((bb, N_HALF + 1))
    out_shape = jax.ShapeDtypeStruct((Bp, N_HALF + 1), jnp.float32)

    out = pl.pallas_call(
        affine_coupling_kernel,
        grid=(Bp // bb,),
        in_specs=in_specs,
        out_specs=out_specs,
        out_shape=out_shape,
        compiler_params=pltpu.CompilerParams(
            dimension_semantics=("parallel",),
            vmem_limit_bytes=32 * 1024 * 1024),
    )(xp, *kparams)

    xc_new = out[:B, :N_HALF]
    sum_s = out[:B, N_HALF]
    # The identity half never changes: concatenate it outside the kernel.
    x_out = jnp.concatenate([xc_new, x[:, N_HALF:]], axis=1)
    return x_out, ldj + sum_s


def affine_coupling_ref(x, ldj, params):
    """Pure-JAX reference mirroring the PyTorch forward (reverse=False, cond=None).

    Matmul precision matches the kernel: lin1/lin5 in f32 (VPU path), residual
    lin2..lin4 with bf16 operands and f32 accumulation (MXU path).
    """
    w1, b1, w2, b2, w3, b3, w4, b4, w5, b5 = params

    def mm_bf16(a, w):
        return jnp.dot(a.astype(jnp.bfloat16), w.astype(jnp.bfloat16),
                       preferred_element_type=jnp.float32)

    x_change, x_id = x[:, :N_HALF], x[:, N_HALF:]
    h = jax.nn.relu(x_id @ w1 + b1)
    h = h + jax.nn.relu(mm_bf16(h, w2) + b2)
    h = h + jax.nn.relu(mm_bf16(h, w3) + b3)
    h = h + jax.nn.relu(mm_bf16(h, w4) + b4)
    st = h @ w5 + b5
    s = jnp.tanh(st[:, :N_HALF])
    t = st[:, N_HALF:]
    x_change = x_change * jnp.exp(s) + t
    return jnp.concatenate([x_change, x_id], axis=1), ldj + jnp.sum(s, axis=-1)


if __name__ == "__main__":
    key = jax.random.PRNGKey(0)
    kp, kx, kl = jax.random.split(key, 3)

    params = init_params(kp)
    kparams = prepare_params(params)

    # B=500 -> tile 256, 2 grid steps (exercises both padding and multi-step grid).
    B = 500
    x = jax.random.normal(kx, (B, N_FULL), jnp.float32)
    ldj = jax.random.normal(kl, (B,), jnp.float32)

    fwd = jax.jit(affine_coupling_forward, static_argnames=("bb",))
    x_out, ldj_out = fwd(x, ldj, kparams)
    jax.block_until_ready((x_out, ldj_out))

    x_ref, ldj_ref = affine_coupling_ref(x, ldj, params)
    np.testing.assert_allclose(np.asarray(x_out), np.asarray(x_ref),
                               rtol=2e-3, atol=2e-3)
    np.testing.assert_allclose(np.asarray(ldj_out), np.asarray(ldj_ref),
                               rtol=2e-3, atol=2e-3)

    print("KERNEL_OK")
</pallas_src>

<mosaic_0001>
module attributes {stable_mosaic.version = 11 : i64} {
  func.func @affine_coupling_kernel(%arg0: i32, %arg1: memref<256x6xf32, #tpu.memory_space<vmem>>, %arg2: memref<3x256xf32, #tpu.memory_space<vmem>>, %arg3: memref<1x256xf32, #tpu.memory_space<vmem>>, %arg4: memref<256x256xbf16, #tpu.memory_space<vmem>>, %arg5: memref<1x256xf32, #tpu.memory_space<vmem>>, %arg6: memref<256x256xbf16, #tpu.memory_space<vmem>>, %arg7: memref<1x256xf32, #tpu.memory_space<vmem>>, %arg8: memref<256x256xbf16, #tpu.memory_space<vmem>>, %arg9: memref<1x256xf32, #tpu.memory_space<vmem>>, %arg10: memref<6x256xf32, #tpu.memory_space<vmem>>, %arg11: memref<1x6xf32, #tpu.memory_space<vmem>>, %arg12: memref<256x4xf32, #tpu.memory_space<vmem>>) attributes {dimension_semantics = [#tpu.dimension_semantics<parallel>], iteration_bounds = array<i64: 2>, scalar_prefetch = 0 : i64, scratch_operands = 0 : i64, tpu.core_type = #tpu.core_type<tc>, window_params = [{transform_indices = @transform_0, window_bounds = array<i64: 256, 6>}, {pipeline_mode = #tpu.pipeline_mode<synchronous>, transform_indices = @transform_1, window_bounds = array<i64: 3, 256>}, {pipeline_mode = #tpu.pipeline_mode<synchronous>, transform_indices = @transform_2, window_bounds = array<i64: 1, 256>}, {pipeline_mode = #tpu.pipeline_mode<synchronous>, transform_indices = @transform_3, window_bounds = array<i64: 256, 256>}, {pipeline_mode = #tpu.pipeline_mode<synchronous>, transform_indices = @transform_4, window_bounds = array<i64: 1, 256>}, {pipeline_mode = #tpu.pipeline_mode<synchronous>, transform_indices = @transform_5, window_bounds = array<i64: 256, 256>}, {pipeline_mode = #tpu.pipeline_mode<synchronous>, transform_indices = @transform_6, window_bounds = array<i64: 1, 256>}, {pipeline_mode = #tpu.pipeline_mode<synchronous>, transform_indices = @transform_7, window_bounds = array<i64: 256, 256>}, {pipeline_mode = #tpu.pipeline_mode<synchronous>, transform_indices = @transform_8, window_bounds = array<i64: 1, 256>}, {pipeline_mode = #tpu.pipeline_mode<synchronous>, transform_indices = @transform_9, window_bounds = array<i64: 6, 256>}, {pipeline_mode = #tpu.pipeline_mode<synchronous>, transform_indices = @transform_10, window_bounds = array<i64: 1, 6>}, {transform_indices = @transform_11, window_bounds = array<i64: 256, 4>}]} {
    %c0 = arith.constant 0 : index
    %c0_0 = arith.constant 0 : index
    %0 = vector.load %arg1[%c0, %c0_0] : memref<256x6xf32, #tpu.memory_space<vmem>>, vector<256x6xf32>
    %1 = vector.extract_strided_slice %0 {offsets = [0, 0], sizes = [256, 3], strides = [1, 1]} : vector<256x6xf32> to vector<256x3xf32>
    %2 = vector.extract_strided_slice %0 {offsets = [0, 3], sizes = [256, 3], strides = [1, 1]} : vector<256x6xf32> to vector<256x3xf32>
    %c0_1 = arith.constant 0 : index
    %c0_2 = arith.constant 0 : index
    %3 = vector.load %arg2[%c0_1, %c0_2] : memref<3x256xf32, #tpu.memory_space<vmem>>, vector<3x256xf32>
    %4 = vector.extract_strided_slice %2 {offsets = [0, 0], sizes = [256, 1], strides = [1, 1]} : vector<256x3xf32> to vector<256x1xf32>
    %5 = vector.extract_strided_slice %3 {offsets = [0, 0], sizes = [1, 256], strides = [1, 1]} : vector<3x256xf32> to vector<1x256xf32>
    %6 = vector.broadcast %4 : vector<256x1xf32> to vector<256x256xf32>
    %7 = vector.broadcast %5 : vector<1x256xf32> to vector<256x256xf32>
    %8 = arith.mulf %6, %7 : vector<256x256xf32>
    %9 = vector.extract_strided_slice %2 {offsets = [0, 1], sizes = [256, 1], strides = [1, 1]} : vector<256x3xf32> to vector<256x1xf32>
    %10 = vector.extract_strided_slice %3 {offsets = [1, 0], sizes = [1, 256], strides = [1, 1]} : vector<3x256xf32> to vector<1x256xf32>
    %11 = vector.broadcast %9 : vector<256x1xf32> to vector<256x256xf32>
    %12 = vector.broadcast %10 : vector<1x256xf32> to vector<256x256xf32>
    %13 = arith.mulf %11, %12 : vector<256x256xf32>
    %14 = arith.addf %8, %13 : vector<256x256xf32>
    %15 = vector.extract_strided_slice %2 {offsets = [0, 2], sizes = [256, 1], strides = [1, 1]} : vector<256x3xf32> to vector<256x1xf32>
    %16 = vector.extract_strided_slice %3 {offsets = [2, 0], sizes = [1, 256], strides = [1, 1]} : vector<3x256xf32> to vector<1x256xf32>
    %17 = vector.broadcast %15 : vector<256x1xf32> to vector<256x256xf32>
    %18 = vector.broadcast %16 : vector<1x256xf32> to vector<256x256xf32>
    %19 = arith.mulf %17, %18 : vector<256x256xf32>
    %20 = arith.addf %14, %19 : vector<256x256xf32>
    %c0_3 = arith.constant 0 : index
    %c0_4 = arith.constant 0 : index
    %21 = vector.load %arg3[%c0_3, %c0_4] : memref<1x256xf32, #tpu.memory_space<vmem>>, vector<1x256xf32>
    %22 = vector.broadcast %21 : vector<1x256xf32> to vector<256x256xf32>
    %23 = arith.addf %20, %22 : vector<256x256xf32>
    %cst = arith.constant 0.000000e+00 : f32
    %24 = vector.broadcast %cst : f32 to vector<256x256xf32>
    %25 = arith.maximumf %23, %24 : vector<256x256xf32>
    %26 = arith.truncf %25 : vector<256x256xf32> to vector<256x256xbf16>
    %c0_5 = arith.constant 0 : index
    %c0_6 = arith.constant 0 : index
    %27 = vector.load %arg4[%c0_5, %c0_6] : memref<256x256xbf16, #tpu.memory_space<vmem>>, vector<256x256xbf16>
    %cst_7 = arith.constant dense<0.000000e+00> : vector<256x256xf32>
    %28 = tpu.matmul %26, %27, %cst_7 {dimension_numbers = #tpu.dot_dimension_numbers<[1], [0], [0], [1], [0, 0, 1, 1], [], []>} : vector<256x256xbf16>, vector<256x256xbf16>, vector<256x256xf32> -> vector<256x256xf32>
    %c0_8 = arith.constant 0 : index
    %c0_9 = arith.constant 0 : index
    %29 = vector.load %arg5[%c0_8, %c0_9] : memref<1x256xf32, #tpu.memory_space<vmem>>, vector<1x256xf32>
    %30 = vector.broadcast %29 : vector<1x256xf32> to vector<256x256xf32>
    %31 = arith.addf %28, %30 : vector<256x256xf32>
    %cst_10 = arith.constant 0.000000e+00 : f32
    %32 = vector.broadcast %cst_10 : f32 to vector<256x256xf32>
    %33 = arith.maximumf %31, %32 : vector<256x256xf32>
    %34 = arith.addf %25, %33 : vector<256x256xf32>
    %35 = arith.truncf %34 : vector<256x256xf32> to vector<256x256xbf16>
    %c0_11 = arith.constant 0 : index
    %c0_12 = arith.constant 0 : index
    %36 = vector.load %arg6[%c0_11, %c0_12] : memref<256x256xbf16, #tpu.memory_space<vmem>>, vector<256x256xbf16>
    %cst_13 = arith.constant dense<0.000000e+00> : vector<256x256xf32>
    %37 = tpu.matmul %35, %36, %cst_13 {dimension_numbers = #tpu.dot_dimension_numbers<[1], [0], [0], [1], [0, 0, 1, 1], [], []>} : vector<256x256xbf16>, vector<256x256xbf16>, vector<256x256xf32> -> vector<256x256xf32>
    %c0_14 = arith.constant 0 : index
    %c0_15 = arith.constant 0 : index
    %38 = vector.load %arg7[%c0_14, %c0_15] : memref<1x256xf32, #tpu.memory_space<vmem>>, vector<1x256xf32>
    %39 = vector.broadcast %38 : vector<1x256xf32> to vector<256x256xf32>
    %40 = arith.addf %37, %39 : vector<256x256xf32>
    %cst_16 = arith.constant 0.000000e+00 : f32
    %41 = vector.broadcast %cst_16 : f32 to vector<256x256xf32>
    %42 = arith.maximumf %40, %41 : vector<256x256xf32>
    %43 = arith.addf %34, %42 : vector<256x256xf32>
    %44 = arith.truncf %43 : vector<256x256xf32> to vector<256x256xbf16>
    %c0_17 = arith.constant 0 : index
    %c0_18 = arith.constant 0 : index
    %45 = vector.load %arg8[%c0_17, %c0_18] : memref<256x256xbf16, #tpu.memory_space<vmem>>, vector<256x256xbf16>
    %cst_19 = arith.constant dense<0.000000e+00> : vector<256x256xf32>
    %46 = tpu.matmul %44, %45, %cst_19 {dimension_numbers = #tpu.dot_dimension_numbers<[1], [0], [0], [1], [0, 0, 1, 1], [], []>} : vector<256x256xbf16>, vector<256x256xbf16>, vector<256x256xf32> -> vector<256x256xf32>
    %c0_20 = arith.constant 0 : index
    %c0_21 = arith.constant 0 : index
    %47 = vector.load %arg9[%c0_20, %c0_21] : memref<1x256xf32, #tpu.memory_space<vmem>>, vector<1x256xf32>
    %48 = vector.broadcast %47 : vector<1x256xf32> to vector<256x256xf32>
    %49 = arith.addf %46, %48 : vector<256x256xf32>
    %cst_22 = arith.constant 0.000000e+00 : f32
    %50 = vector.broadcast %cst_22 : f32 to vector<256x256xf32>
    %51 = arith.maximumf %49, %50 : vector<256x256xf32>
    %52 = arith.addf %43, %51 : vector<256x256xf32>
    %c0_23 = arith.constant 0 : index
    %c0_24 = arith.constant 0 : index
    %53 = vector.load %arg10[%c0_23, %c0_24] : memref<6x256xf32, #tpu.memory_space<vmem>>, vector<6x256xf32>
    %54 = vector.extract_strided_slice %53 {offsets = [0, 0], sizes = [1, 256], strides = [1, 1]} : vector<6x256xf32> to vector<1x256xf32>
    %55 = vector.broadcast %54 : vector<1x256xf32> to vector<256x256xf32>
    %56 = arith.mulf %52, %55 : vector<256x256xf32>
    %cst_25 = arith.constant dense<0.000000e+00> : vector<256xf32>
    %57 = vector.multi_reduction <add>, %56, %cst_25 [1] : vector<256x256xf32> to vector<256xf32>
    %58 = vector.shape_cast %57 : vector<256xf32> to vector<256x1xf32>
    %59 = vector.extract_strided_slice %53 {offsets = [1, 0], sizes = [1, 256], strides = [1, 1]} : vector<6x256xf32> to vector<1x256xf32>
    %60 = vector.broadcast %59 : vector<1x256xf32> to vector<256x256xf32>
    %61 = arith.mulf %52, %60 : vector<256x256xf32>
    %cst_26 = arith.constant dense<0.000000e+00> : vector<256xf32>
    %62 = vector.multi_reduction <add>, %61, %cst_26 [1] : vector<256x256xf32> to vector<256xf32>
    %63 = vector.shape_cast %62 : vector<256xf32> to vector<256x1xf32>
    %64 = vector.extract_strided_slice %53 {offsets = [2, 0], sizes = [1, 256], strides = [1, 1]} : vector<6x256xf32> to vector<1x256xf32>
    %65 = vector.broadcast %64 : vector<1x256xf32> to vector<256x256xf32>
    %66 = arith.mulf %52, %65 : vector<256x256xf32>
    %cst_27 = arith.constant dense<0.000000e+00> : vector<256xf32>
    %67 = vector.multi_reduction <add>, %66, %cst_27 [1] : vector<256x256xf32> to vector<256xf32>
    %68 = vector.shape_cast %67 : vector<256xf32> to vector<256x1xf32>
    %69 = vector.extract_strided_slice %53 {offsets = [3, 0], sizes = [1, 256], strides = [1, 1]} : vector<6x256xf32> to vector<1x256xf32>
    %70 = vector.broadcast %69 : vector<1x256xf32> to vector<256x256xf32>
    %71 = arith.mulf %52, %70 : vector<256x256xf32>
    %cst_28 = arith.constant dense<0.000000e+00> : vector<256xf32>
    %72 = vector.multi_reduction <add>, %71, %cst_28 [1] : vector<256x256xf32> to vector<256xf32>
    %73 = vector.shape_cast %72 : vector<256xf32> to vector<256x1xf32>
    %74 = vector.extract_strided_slice %53 {offsets = [4, 0], sizes = [1, 256], strides = [1, 1]} : vector<6x256xf32> to vector<1x256xf32>
    %75 = vector.broadcast %74 : vector<1x256xf32> to vector<256x256xf32>
    %76 = arith.mulf %52, %75 : vector<256x256xf32>
    %cst_29 = arith.constant dense<0.000000e+00> : vector<256xf32>
    %77 = vector.multi_reduction <add>, %76, %cst_29 [1] : vector<256x256xf32> to vector<256xf32>
    %78 = vector.shape_cast %77 : vector<256xf32> to vector<256x1xf32>
    %79 = vector.extract_strided_slice %53 {offsets = [5, 0], sizes = [1, 256], strides = [1, 1]} : vector<6x256xf32> to vector<1x256xf32>
    %80 = vector.broadcast %79 : vector<1x256xf32> to vector<256x256xf32>
    %81 = arith.mulf %52, %80 : vector<256x256xf32>
    %cst_30 = arith.constant dense<0.000000e+00> : vector<256xf32>
    %82 = vector.multi_reduction <add>, %81, %cst_30 [1] : vector<256x256xf32> to vector<256xf32>
    %83 = vector.shape_cast %82 : vector<256xf32> to vector<256x1xf32>
    %84 = tpu.concatenate %58, %63, %68, %73, %78, %83 in 1 : vector<256x1xf32>, vector<256x1xf32>, vector<256x1xf32>, vector<256x1xf32>, vector<256x1xf32>, vector<256x1xf32> -> vector<256x6xf32>
    %c0_31 = arith.constant 0 : index
    %c0_32 = arith.constant 0 : index
    %85 = vector.load %arg11[%c0_31, %c0_32] : memref<1x6xf32, #tpu.memory_space<vmem>>, vector<1x6xf32>
    %86 = vector.broadcast %85 : vector<1x6xf32> to vector<256x6xf32>
    %87 = arith.addf %84, %86 : vector<256x6xf32>
    %88 = vector.extract_strided_slice %87 {offsets = [0, 0], sizes = [256, 3], strides = [1, 1]} : vector<256x6xf32> to vector<256x3xf32>
    %89 = math.tanh %88 : vector<256x3xf32>
    %90 = vector.extract_strided_slice %87 {offsets = [0, 3], sizes = [256, 3], strides = [1, 1]} : vector<256x6xf32> to vector<256x3xf32>
    %91 = math.exp %89 : vector<256x3xf32>
    %92 = arith.mulf %1, %91 : vector<256x3xf32>
    %93 = arith.addf %92, %90 : vector<256x3xf32>
    %cst_33 = arith.constant dense<0.000000e+00> : vector<256xf32>
    %94 = vector.multi_reduction <add>, %89, %cst_33 [1] : vector<256x3xf32> to vector<256xf32>
    %95 = vector.shape_cast %94 : vector<256xf32> to vector<256x1xf32>
    %96 = tpu.concatenate %93, %95 in 1 : vector<256x3xf32>, vector<256x1xf32> -> vector<256x4xf32>
    %c0_34 = arith.constant 0 : index
    %c0_35 = arith.constant 0 : index
    %97 = vector.load %arg12[%c0_34, %c0_35] : memref<256x4xf32, #tpu.memory_space<vmem>>, vector<256x4xf32>
    tpu.vector_store %arg12[%c0_34, %c0_35], %96 {strides = array<i32>} : memref<256x4xf32, #tpu.memory_space<vmem>>, vector<256x4xf32>,
    return
  }
  func.func @transform_0(%arg0: i32) -> (i32, i32) {
    %c0_i32 = arith.constant 0 : i32
    %c0_i32_0 = arith.constant 0 : i32
    return %arg0, %c0_i32 : i32, i32
  }
  func.func @transform_1(%arg0: i32) -> (i32, i32) {
    %c0_i32 = arith.constant 0 : i32
    %c0_i32_0 = arith.constant 0 : i32
    %c0_i32_1 = arith.constant 0 : i32
    return %c0_i32, %c0_i32_0 : i32, i32
  }
  func.func @transform_2(%arg0: i32) -> (i32, i32) {
    %c0_i32 = arith.constant 0 : i32
    %c0_i32_0 = arith.constant 0 : i32
    %c0_i32_1 = arith.constant 0 : i32
    return %c0_i32, %c0_i32_0 : i32, i32
  }
  func.func @transform_3(%arg0: i32) -> (i32, i32) {
    %c0_i32 = arith.constant 0 : i32
    %c0_i32_0 = arith.constant 0 : i32
    %c0_i32_1 = arith.constant 0 : i32
    return %c0_i32, %c0_i32_0 : i32, i32
  }
  func.func @transform_4(%arg0: i32) -> (i32, i32) {
    %c0_i32 = arith.constant 0 : i32
    %c0_i32_0 = arith.constant 0 : i32
    %c0_i32_1 = arith.constant 0 : i32
    return %c0_i32, %c0_i32_0 : i32, i32
  }
  func.func @transform_5(%arg0: i32) -> (i32, i32) {
    %c0_i32 = arith.constant 0 : i32
    %c0_i32_0 = arith.constant 0 : i32
    %c0_i32_1 = arith.constant 0 : i32
    return %c0_i32, %c0_i32_0 : i32, i32
  }
  func.func @transform_6(%arg0: i32) -> (i32, i32) {
    %c0_i32 = arith.constant 0 : i32
    %c0_i32_0 = arith.constant 0 : i32
    %c0_i32_1 = arith.constant 0 : i32
    return %c0_i32, %c0_i32_0 : i32, i32
  }
  func.func @transform_7(%arg0: i32) -> (i32, i32) {
    %c0_i32 = arith.constant 0 : i32
    %c0_i32_0 = arith.constant 0 : i32
    %c0_i32_1 = arith.constant 0 : i32
    return %c0_i32, %c0_i32_0 : i32, i32
  }
  func.func @transform_8(%arg0: i32) -> (i32, i32) {
    %c0_i32 = arith.constant 0 : i32
    %c0_i32_0 = arith.constant 0 : i32
    %c0_i32_1 = arith.constant 0 : i32
    return %c0_i32, %c0_i32_0 : i32, i32
  }
  func.func @transform_9(%arg0: i32) -> (i32, i32) {
    %c0_i32 = arith.constant 0 : i32
    %c0_i32_0 = arith.constant 0 : i32
    %c0_i32_1 = arith.constant 0 : i32
    return %c0_i32, %c0_i32_0 : i32, i32
  }
  func.func @transform_10(%arg0: i32) -> (i32, i32) {
    %c0_i32 = arith.constant 0 : i32
    %c0_i32_0 = arith.constant 0 : i32
    %c0_i32_1 = arith.constant 0 : i32
    return %c0_i32, %c0_i32_0 : i32, i32
  }
  func.func @transform_11(%arg0: i32) -> (i32, i32) {
    %c0_i32 = arith.constant 0 : i32
    %c0_i32_0 = arith.constant 0 : i32
    return %arg0, %c0_i32 : i32, i32
  }
}

</mosaic_0001>

<bundles_post_ra>
// kernel: affine_coupling_forward.1
= control target key start
LH: loop header
LB: loop body
LE: loop exit
PB: predicated region body
PF: predicated region fallthrough
CT: control target
= control target key end

     0   :  { %s5321_s17 = smov 0   ;;  %s9516_s0 = inlined_call_operand.vmem [shape: f32[512,6], index: 0, kind: input, shape index: {}]   ;;  %s9517_s1 = inlined_call_operand.vmem [shape: f32[3,256], index: 1, kind: input, shape index: {}]   ;;  %s9518_s2 = inlined_call_operand.vmem [shape: f32[1,256], index: 2, kind: input, shape index: {}]   ;;  %s9519_s3 = inlined_call_operand.vmem [shape: bf16[256,256], index: 3, kind: input, shape index: {}]   ;;  %s9520_s4 = inlined_call_operand.vmem [shape: f32[1,256], index: 4, kind: input, shape index: {}]   ;;  %s9521_s5 = inlined_call_operand.vmem [shape: bf16[256,256], index: 5, kind: input, shape index: {}]   ;;  %s9522_s6 = inlined_call_operand.vmem [shape: f32[1,256], index: 6, kind: input, shape index: {}]   ;;  %s9523_s7 = inlined_call_operand.vmem [shape: bf16[256,256], index: 7, kind: input, shape index: {}]   ;;  %s9524_s8 = inlined_call_operand.vmem [shape: f32[1,256], index: 8, kind: input, shape index: {}]   ;;  %s9525_s9 = inlined_call_operand.vmem [shape: f32[6,256], index: 9, kind: input, shape index: {}]   ;;  %s9526_s10 = inlined_call_operand.vmem [shape: f32[1,6], index: 10, kind: input, shape index: {}]   ;;  %s9527_s11 = inlined_call_operand.vmem [shape: f32[512,4], index: 11, kind: output, shape index: {}]  }
   0x1 LB: > { %s4743_s18 = sadd.s32 4294967295, %s5255_s17   ;;  %p4747_p0 = scmp.ge.s32.totalorder %s5255_s17, 1  ;;  %s5255_s17 = sphi %s5321_s17, %s21_s17  }
   0x2   : > { %p338_p1 = scmp.lt.s32.totalorder %s5255_s17, 3 }
   0x4   : > { %p339_p2 = pnand %p4747_p0, %p338_p1 }
   0x6   : > { %342 = sbr.rel (%p339_p2) target bundleno = 2236 (0x8bc), region = 64 }
   0xd   : > { %s4748_s19 = sshll.u32 %s4743_s18, 5  ;;  %v9536_v0 = vmov 4   ;;  %v9528_v1 = vmov 3   ;;  %v9530_v5 = vmov 5   ;;  %v4944_v9 = vld [vmem:[%s9519_s3 + $0x4] ss:$8 sps:$4 sm:$0xff]  }
   0xe   : > { %4896 = vset.pattern.permute.xlu1 %v9536_v0  ;;  %4895 = vset.pattern.permute.xlu0 %v9528_v1  ;;  %p379_p3 = scmp.lt.s32.totalorder %s4748_s19, 63  ;;  %v4946_v11 = vld [vmem:[%s9519_s3] ss:$8 sps:$4 sm:$0xff]   ;;  %v4947_v12 = vld [vmem:[%s9519_s3 + $0x14] ss:$8 sps:$4 sm:$0xff]   ;;  %vm4035_vm0 = vcmask 7168  }
   0xf   : > { %1590 = vmatprep.subr.bf16.mxu0 %v4944_v9  ;;  %4851 = vmatprep.subr.bf16.mxu1 %v4944_v9  ;;  %v4949_v14 = vld [vmem:[%s9519_s3 + $0x10] ss:$8 sps:$4 sm:$0xff]   ;;  %v4950_v15 = vld [vmem:[%s9519_s3 + $0x24] ss:$8 sps:$4 sm:$0xff]   ;;  %v4952_v17 = vld [vmem:[%s9519_s3 + $0x20] ss:$8 sps:$4 sm:$0xff]  }
  0x10   : > { %s10183_s19 = smov (!%p379_p3, %s4748_s19), 63  ;;  %1591 = vmatpush1.bf16.msra.mxu0 %v4946_v11  ;;  %4867 = vmatpush1.bf16.msra.mxu1 %v4946_v11  ;;  %v4953_v18 = vld [vmem:[%s9519_s3 + $0x34] ss:$8 sps:$4 sm:$0xff]   ;;  %v4955_v20 = vld [vmem:[%s9519_s3 + $0x30] ss:$8 sps:$4 sm:$0xff]   ;;  %vm4068_vm1 = vcmask 15360  }
  0x11   : > { %s4749_s20 = sshll.u32 %s10183_s19, 3  ;;  %1592 = vmatprep.subr.bf16.mxu0 %v4947_v12  ;;  %4852 = vmatprep.subr.bf16.mxu1 %v4947_v12  ;;  %v4956_v22 = vld [vmem:[%s9519_s3 + $0x44] ss:$8 sps:$4 sm:$0xff]   ;;  %v4958_v24 = vld [vmem:[%s9519_s3 + $0x40] ss:$8 sps:$4 sm:$0xff]   ;;  %vm4101_vm2 = vcmask 23552  }
  0x12   : > { %s5339_s23 = scalar_lea.vmem %s9516_s0, %s4749_s20  ;;  %v4959_v25 = vld [vmem:[%s9519_s3 + $0x54] ss:$8 sps:$4 sm:$0xff]   ;;  %v4961_v27 = vld [vmem:[%s9519_s3 + $0x50] ss:$8 sps:$4 sm:$0xff]   ;;  %v4962_v28 = vld [vmem:[%s9519_s3 + $0x64] ss:$8 sps:$4 sm:$0xff]   ;;  %s9076_s25 = scalar_lea.vmem %s9527_s11, %s4749_s20 }
  0x13   : > { %v5342_v2 = vld [vmem:[%s5339_s23] sm:$0xff]  ;;  %v391_v3 = vld [vmem:[%s5339_s23 + $0x8] sm:$0xff]  ;;  %v393_v4 = vld [vmem:[%s5339_s23 + $0x18] sm:$0xff]  ;;  %vm4134_vm3 = vcmask 31744   ;;  %vm4167_vm4 = vcmask 39936   ;;  %s5260_s21 = smov 125  }
  0x14   : > { %667 = vperm.xlu1 %4896, %v5342_v2   ;;  %425 = vperm.xlu0 %4895, %v5342_v2   ;;  %v5350_v6 = vld [vmem:[%s5339_s23 + $0x28] sm:$0xff]  ;;  %v5353_v7 = vld [vmem:[%s5339_s23 + $0x10] sm:$0xff]  ;;  %v5356_v8 = vld [vmem:[%s5339_s23 + $0x38] sm:$0xff] }
  0x15   : > { %v5365_v10 = vld [vmem:[%s5339_s23 + $0x48] sm:$0xff]  ;;  %v5377_v13 = vld [vmem:[%s5339_s23 + $0x58] sm:$0xff]  ;;  %1593 = vmatpush1.bf16.msra.mxu0 %v4949_v14  ;;  %4868 = vmatpush1.bf16.msra.mxu1 %v4949_v14  ;;  %v5405_v21 = vld [vmem:[%s5339_s23 + $0x20] sm:$0xff] }
  0x16   : > { %v5387_v16 = vld [vmem:[%s5339_s23 + $0x68] sm:$0xff]  ;;  %1594 = vmatprep.subr.bf16.mxu0 %v4950_v15  ;;  %4853 = vmatprep.subr.bf16.mxu1 %v4950_v15  ;;  %v5398_v19 = vld [vmem:[%s5339_s23 + $0x78] sm:$0xff]  ;;  %v5462_v36 = vld [vmem:[%s5339_s23 + $0x30] sm:$0xff] }
  0x17   : > { %v5411_v23 = vld [vmem:[%s5339_s23 + $0x88] sm:$0xff]  ;;  %v5423_v26 = vld [vmem:[%s5339_s23 + $0x98] sm:$0xff]  ;;  %v398_v51 = vld [vmem:[%s5339_s23 + $0x40] sm:$0xff] }
  0x18   : > { %671 = vperm.xlu1 %4896, %v391_v3   ;;  %430 = vperm.xlu0 %4895, %v391_v3   ;;  %v4964_v29 = vld [vmem:[%s9519_s3 + $0x60] ss:$8 sps:$4 sm:$0xff]   ;;  %v4965_v31 = vld [vmem:[%s9519_s3 + $0x74] ss:$8 sps:$4 sm:$0xff]   ;;  %v4967_v32 = vld [vmem:[%s9519_s3 + $0x70] ss:$8 sps:$4 sm:$0xff]  }
  0x19   : > { %1595 = vmatpush1.bf16.msra.mxu0 %v4952_v17  ;;  %4869 = vmatpush1.bf16.msra.mxu1 %v4952_v17  ;;  %v5439_v30 = vld [vmem:[%s5339_s23 + $0xa8] sm:$0xff]  ;;  %v5450_v33 = vld [vmem:[%s5339_s23 + $0xb8] sm:$0xff]  ;;  %v400_v56 = vld [vmem:[%s5339_s23 + $0x50] sm:$0xff] }
  0x1a   : > { %1596 = vmatprep.subr.bf16.mxu0 %v4953_v18  ;;  %4854 = vmatprep.subr.bf16.mxu1 %v4953_v18  ;;  %v4968_v34 = vld [vmem:[%s9519_s3 + $0x84] ss:$8 sps:$4 sm:$0xff]   ;;  %v4970_v35 = vld [vmem:[%s9519_s3 + $0x80] ss:$8 sps:$4 sm:$0xff]   ;;  %v4971_v38 = vld [vmem:[%s9519_s3 + $0x94] ss:$8 sps:$4 sm:$0xff]  }
  0x1b   : > { %v5465_v37 = vld [vmem:[%s5339_s23 + $0xc8] sm:$0xff]  ;;  %v4973_v39 = vld [vmem:[%s9519_s3 + $0x90] ss:$8 sps:$4 sm:$0xff]   ;;  %v4977_v44 = vld [vmem:[%s9519_s3 + $0xb4] ss:$8 sps:$4 sm:$0xff]  }
  0x1c   : > { %4897 = vset.pattern.permute.xlu1 %v9530_v5  ;;  %440 = vperm.xlu0 %4895, %v393_v4   ;;  %v5477_v40 = vld [vmem:[%s5339_s23 + $0xd8] sm:$0xff]  ;;  %v4974_v41 = vld [vmem:[%s9519_s3 + $0xa4] ss:$8 sps:$4 sm:$0xff]   ;;  %v4976_v42 = vld [vmem:[%s9519_s3 + $0xa0] ss:$8 sps:$4 sm:$0xff]  }
  0x1d   : > { %945 = vperm.xlu1 %4897, %v391_v3   ;;  %1597 = vmatpush1.bf16.msra.mxu0 %v4955_v20  ;;  %v5489_v43 = vld [vmem:[%s5339_s23 + $0xe8] sm:$0xff]  ;;  %v4979_v45 = vld [vmem:[%s9519_s3 + $0xb0] ss:$8 sps:$4 sm:$0xff]   ;;  %v4983_v49 = vld [vmem:[%s9519_s3 + $0xd4] ss:$8 sps:$4 sm:$0xff]  }
  0x1e   : > { %4870 = vmatpush1.bf16.msra.mxu1 %v4955_v20  ;;  %1598 = vmatprep.subr.bf16.mxu0 %v4956_v22  ;;  %v5500_v46 = vld [vmem:[%s5339_s23 + $0xf8] sm:$0xff]  ;;  %v4980_v47 = vld [vmem:[%s9519_s3 + $0xc4] ss:$8 sps:$4 sm:$0xff]   ;;  %v4982_v48 = vld [vmem:[%s9519_s3 + $0xc0] ss:$8 sps:$4 sm:$0xff]  }
  0x1f   : > { %4855 = vmatprep.subr.bf16.mxu1 %v4956_v22  ;;  %v4985_v50 = vld [vmem:[%s9519_s3 + $0xd0] ss:$8 sps:$4 sm:$0xff]   ;;  %v4986_v52 = vld [vmem:[%s9519_s3 + $0xe4] ss:$8 sps:$4 sm:$0xff]   ;;  %v4988_v53 = vld [vmem:[%s9519_s3 + $0xe0] ss:$8 sps:$4 sm:$0xff]  }
  0x20   : > { %450 = vperm.xlu0 %4895, %v5350_v6   ;;  %v4989_v54 = vld [vmem:[%s9519_s3 + $0xf4] ss:$8 sps:$4 sm:$0xff]   ;;  %v4991_v55 = vld [vmem:[%s9519_s3 + $0xf0] ss:$8 sps:$4 sm:$0xff]   ;;  %v402_v57 = vld [vmem:[%s5339_s23 + $0x60] sm:$0xff] }
  0x21   : > { %4898 = vset.pattern.permute.xlu1 %v9528_v1  ;;  %1599 = vmatpush1.bf16.msra.mxu0 %v4958_v24  ;;  %v404_v58 = vld [vmem:[%s5339_s23 + $0x70] sm:$0xff]  ;;  %v406_v59 = vld [vmem:[%s5339_s23 + $0x80] sm:$0xff] }
  0x22   : > { %435 = vperm.xlu1 %4898, %v5353_v7   ;;  %4871 = vmatpush1.bf16.msra.mxu1 %v4958_v24  ;;  %v408_v60 = vld [vmem:[%s5339_s23 + $0x90] sm:$0xff]  ;;  %v5551_v61 = vld [vmem:[%s5339_s23 + $0xa0] sm:$0xff] }
  0x23   : > { %1600 = vmatprep.subr.bf16.mxu0 %v4959_v25  ;;  %4856 = vmatprep.subr.bf16.mxu1 %v4959_v25  ;;  %v5556_v62 = vld [vmem:[%s5339_s23 + $0xb0] sm:$0xff]  ;;  %v5561_v63 = vld [vmem:[%s5339_s23 + $0xc0] sm:$0xff]  ;;  %v584_v25 = vlaneseq }
  0x24   : > { %460 = vperm.xlu0 %4895, %v5356_v8   ;;  %v5571_v3 = vld [vmem:[%s5339_s23 + $0xe0] sm:$0xff] }
  0x25   : > { %1601 = vmatpush1.bf16.msra.mxu0 %v4961_v27 }
  0x26   : > { %4899 = vset.pattern.permute.xlu1 %v9536_v0  ;;  %4872 = vmatpush1.bf16.msra.mxu1 %v4961_v27 }
  0x27   : > { %675 = vperm.xlu1 %4899, %v5353_v7   ;;  %1602 = vmatprep.subr.bf16.mxu0 %v4962_v28 }
  0x28   : > { %470 = vperm.xlu0 %4895, %v5365_v10   ;;  %4857 = vmatprep.subr.bf16.mxu1 %v4962_v28 }
  0x29   : > { %1603 = vmatpush1.bf16.msra.mxu0 %v4964_v29 }
  0x2a   : > { %4873 = vmatpush1.bf16.msra.mxu1 %v4964_v29  ;;  %1604 = vmatprep.subr.bf16.mxu0 %v4965_v31  ;;  %v5630_v29 = vshrl.u32 %v584_v25, 7 }
  0x2b   : > { %679 = vperm.xlu1 %4899, %v393_v4   ;;  %4858 = vmatprep.subr.bf16.mxu1 %v4965_v31 }
  0x2c   : > { %480 = vperm.xlu0 %4895, %v5377_v13   ;;  %9698 = vst [vmem:[#allocation2_spill] sm:$0xff] %v5630_v29 }
  0x2d   : > { %1605 = vmatpush1.bf16.msra.mxu0 %v4967_v32 }
  0x2e   : > { %4874 = vmatpush1.bf16.msra.mxu1 %v4967_v32  ;;  %1606 = vmatprep.subr.bf16.mxu0 %v4968_v34 }
  0x2f   : > { %4900 = vset.pattern.permute.xlu1 %v9530_v5  ;;  %4859 = vmatprep.subr.bf16.mxu1 %v4968_v34  ;;  %v5641_v34 = vsub.s32 4, %v5630_v29 }
  0x30   : > { %953 = vperm.xlu1 %4900, %v393_v4   ;;  %490 = vperm.xlu0 %4895, %v5387_v16   ;;  %v5576_v4 = vld [vmem:[%s5339_s23 + $0xf0] sm:$0xff] }
  0x31   : > { %1607 = vmatpush1.bf16.msra.mxu0 %v4970_v35  ;;  %9701 = vst [vmem:[#allocation5_spill] sm:$0xff] %v5641_v34 }
  0x32   : > { %4875 = vmatpush1.bf16.msra.mxu1 %v4970_v35  ;;  %1608 = vmatprep.subr.bf16.mxu0 %v4971_v38  ;;  %v1074_v35 = vsub.s32 6, %v5630_v29 }
  0x33   : > { %4860 = vmatprep.subr.bf16.mxu1 %v4971_v38  ;;  %v5648_v38 = vsub.s32 1, %v5630_v29 }
  0x34   : > { %4901 = vset.pattern.permute.xlu1 %v9528_v1  ;;  %500 = vperm.xlu0 %4895, %v5398_v19  }
  0x35   : > { %445 = vperm.xlu1 %4901, %v5405_v21   ;;  %1609 = vmatpush1.bf16.msra.mxu0 %v4973_v39  ;;  %9702 = vst [vmem:[#allocation6_spill] sm:$0xff] %v5648_v38 }
  0x36   : > { %4876 = vmatpush1.bf16.msra.mxu1 %v4973_v39  ;;  %1610 = vmatprep.subr.bf16.mxu0 %v4974_v41  ;;  %v5651_v39 = vsub.s32 0, %v5630_v29 }
  0x37   : > { %4861 = vmatprep.subr.bf16.mxu1 %v4974_v41  ;;  %v5654_v41 = vsub.s32 2, %v5630_v29 }
  0x38   : > { %510 = vperm.xlu0 %4895, %v5411_v23   ;;  %9703 = vst [vmem:[#allocation7_spill] sm:$0xff] %v5651_v39 }
  0x39   : > { %4902 = vset.pattern.permute.xlu1 %v9536_v0  ;;  %1611 = vmatpush1.bf16.msra.mxu0 %v4976_v42  ;;  %9704 = vst [vmem:[#allocation8_spill] sm:$0xff] %v5654_v41 }
  0x3a   : > { %683 = vperm.xlu1 %4902, %v5405_v21   ;;  %4877 = vmatpush1.bf16.msra.mxu1 %v4976_v42 }
  0x3b   : > { %1612 = vmatprep.subr.bf16.mxu0 %v4977_v44  ;;  %4862 = vmatprep.subr.bf16.mxu1 %v4977_v44 }
  0x3c   : > { %520 = vperm.xlu0 %4895, %v5423_v26  }
  0x3d   : > { %1613 = vmatpush1.bf16.msra.mxu0 %v4979_v45 }
  0x3e   : > { %687 = vperm.xlu1 %4902, %v5350_v6   ;;  %4878 = vmatpush1.bf16.msra.mxu1 %v4979_v45 }
  0x3f   : > { %1614 = vmatprep.subr.bf16.mxu0 %v4980_v47  ;;  %4863 = vmatprep.subr.bf16.mxu1 %v4980_v47 }
  0x40   : > { %530 = vperm.xlu0 %4895, %v5439_v30  }
  0x41   : > { %1615 = vmatpush1.bf16.msra.mxu0 %v4982_v48 }
  0x42   : > { %4903 = vset.pattern.permute.xlu1 %v9530_v5  ;;  %4879 = vmatpush1.bf16.msra.mxu1 %v4982_v48 }
  0x43   : > { %961 = vperm.xlu1 %4903, %v5350_v6   ;;  %1616 = vmatprep.subr.bf16.mxu0 %v4983_v49 }
  0x44   : > { %540 = vperm.xlu0 %4895, %v5450_v33   ;;  %4864 = vmatprep.subr.bf16.mxu1 %v4983_v49 }
  0x45   : > { %1617 = vmatpush1.bf16.msra.mxu0 %v4985_v50 }
  0x46   : > { %4880 = vmatpush1.bf16.msra.mxu1 %v4985_v50  ;;  %1618 = vmatprep.subr.bf16.mxu0 %v4986_v52 }
  0x47   : > { %4904 = vset.pattern.permute.xlu1 %v9528_v1  ;;  %4865 = vmatprep.subr.bf16.mxu1 %v4986_v52 }
  0x48   : > { %455 = vperm.xlu1 %4904, %v5462_v36   ;;  %550 = vperm.xlu0 %4895, %v5465_v37  }
  0x49   : > { %1619 = vmatpush1.bf16.msra.mxu0 %v4988_v53 }
  0x4a   : > { %4881 = vmatpush1.bf16.msra.mxu1 %v4988_v53  ;;  %1620 = vmatprep.subr.bf16.mxu0 %v4989_v54 }
  0x4b   : > { %4866 = vmatprep.subr.bf16.mxu1 %v4989_v54 }
  0x4c   : > { %4905 = vset.pattern.permute.xlu1 %v9536_v0  ;;  %560 = vperm.xlu0 %4895, %v5477_v40  }
  0x4d   : > { %691 = vperm.xlu1 %4905, %v5462_v36   ;;  %1621 = vmatpush1.bf16.msra.mxu0 %v4991_v55 }
  0x4e   : > { %4882 = vmatpush1.bf16.msra.mxu1 %v4991_v55 }
  0x50   : > { %570 = vperm.xlu0 %4895, %v5489_v43  }
  0x51   : > { %695 = vperm.xlu1 %4905, %v5356_v8  }
  0x54   : > { %580 = vperm.xlu0 %4895, %v5500_v46  }
  0x55   : > { %4906 = vset.pattern.permute.xlu1 %v9530_v5 }
  0x56   : > { %969 = vperm.xlu1 %4906, %v5356_v8  }
  0x58   : > { %4941 = vset.pattern.permute.xlu0 %v9530_v5 }
  0x59   : > { %941 = vperm.xlu0 %4941, %v5342_v2   ;;  %v5566_v2 = vld [vmem:[%s5339_s23 + $0xd0] sm:$0xff] }
  0x5a   : > { %4907 = vset.pattern.permute.xlu1 %v9528_v1 }
  0x5b   : > { %465 = vperm.xlu1 %4907, %v398_v51  }
  0x5d   : > { %949 = vperm.xlu0 %4941, %v5353_v7  }
  0x5f   : > { %4908 = vset.pattern.permute.xlu1 %v9536_v0 }
  0x60   : > { %699 = vperm.xlu1 %4908, %v398_v51  }
  0x61   : > { %957 = vperm.xlu0 %4941, %v5405_v21  }
  0x64   : > { %703 = vperm.xlu1 %4908, %v5365_v10  }
  0x65   : > { %965 = vperm.xlu0 %4941, %v5462_v36   ;;  %v422_v36 = vld [vmem:[%s9517_s1] sm:$0x77] }
  0x66   : > { %v591_v47 = vrot.slane %v422_v36, %v5641_v34  ;;  %v1075_v48 = vrot.slane %v422_v36, %v1074_v35  ;;  %v797_v49 = vrot.slane %v422_v36, %v5648_v38  ;;  %v587_v50 = vrot.slane %v422_v36, %v5651_v39 }
  0x68   : > { %4909 = vset.pattern.permute.xlu1 %v9530_v5  ;;  %v5676_v55 = vrot.slane %v591_v47, %v5651_v39 }
  0x69   : > { %977 = vperm.xlu1 %4909, %v5365_v10   ;;  %973 = vperm.xlu0 %4941, %v398_v51   ;;  %v1071_v51 = vrot.slane %v422_v36, %v5654_v41 }
  0x6d   : > { %4910 = vset.pattern.permute.xlu1 %v9528_v1  ;;  %981 = vperm.xlu0 %4941, %v400_v56  }
  0x6e   : > { %475 = vperm.xlu1 %4910, %v400_v56  }
  0x71   : > { %989 = vperm.xlu0 %4941, %v402_v57  }
  0x72   : > { %4911 = vset.pattern.permute.xlu1 %v9536_v0 }
  0x73   : > { %707 = vperm.xlu1 %4911, %v400_v56   ;;  %v5679_v56 = vrot.slane %v1075_v48, %v5654_v41 }
  0x75   : > { %997 = vperm.xlu0 %4941, %v404_v58  }
  0x77   : > { %711 = vperm.xlu1 %4911, %v5377_v13  }
  0x79   : > { %1005 = vperm.xlu0 %4941, %v406_v59  }
  0x7b   : > { %4912 = vset.pattern.permute.xlu1 %v9530_v5 }
  0x7c   : > { %985 = vperm.xlu1 %4912, %v5377_v13  }
  0x7d   : > { %1013 = vperm.xlu0 %4941, %v408_v60  }
  0x80   : > { %4913 = vset.pattern.permute.xlu1 %v9528_v1 }
  0x81   : > { %485 = vperm.xlu1 %4913, %v402_v57   ;;  %1021 = vperm.xlu0 %4941, %v5551_v61  }
  0x85   : > { %4914 = vset.pattern.permute.xlu1 %v9536_v0  ;;  %1029 = vperm.xlu0 %4941, %v5556_v62  }
  0x86   : > { %715 = vperm.xlu1 %4914, %v402_v57   ;;  %v5682_v57 = vrot.slane %v797_v49, %v5648_v38  ;;  %v1214_v49 = vld [vmem:[%s9518_s2] sm:$0x3] }
  0x89   : > { %1037 = vperm.xlu0 %4941, %v5561_v63  }
  0x8a   : > { %719 = vperm.xlu1 %4914, %v5387_v16  }
  0x8d   : > { %1045 = vperm.xlu0 %4941, %v5566_v2  }
  0x8e   : > { %4915 = vset.pattern.permute.xlu1 %v9530_v5 }
  0x8f   : > { %993 = vperm.xlu1 %4915, %v5387_v16  }
  0x91   : > { %1053 = vperm.xlu0 %4941, %v5571_v3  }
  0x93   : > { %4916 = vset.pattern.permute.xlu1 %v9528_v1  ;;  %v5579_v6 = vpop.permute.xlu1 %667  ;;  %v5581_v7 = vpop.permute.xlu0 %425 }
  0x94   : > { %495 = vperm.xlu1 %4916, %v404_v58  }
  0x95   : > { %1061 = vperm.xlu0 %4941, %v5576_v4  }
  0x97   : > { %v5584_v8 = vpop.permute.xlu1 %671  ;;  %v5586_v9 = vpop.permute.xlu0 %430 }
  0x98   : > { %4917 = vset.pattern.permute.xlu1 %v9536_v0  ;;  %v814_v35 = vmul.f32 %v5682_v57, %v5584_v8 }
  0x99   : > { %723 = vperm.xlu1 %4917, %v404_v58   ;;  %v5685_v58 = vrot.slane %v587_v50, %v5651_v39 }
  0x9b   : > { %v5589_v10 = vpop.permute.xlu0 %440 }
  0x9c   : > { %v5591_v11 = vpop.permute.xlu1 %945 }
  0x9d   : > { %727 = vperm.xlu1 %4917, %v5398_v19   ;;  %v1089_v47 = vmul.f32 %v5679_v56, %v5591_v11 }
  0x9f   : > { %v5594_v12 = vpop.permute.xlu0 %450 }
  0xa1   : > { %4918 = vset.pattern.permute.xlu1 %v9530_v5  ;;  %v5597_v13 = vpop.permute.xlu1 %435 }
  0xa2   : > { %1001 = vperm.xlu1 %4918, %v5398_v19  }
  0xa3   : > { %v5600_v14 = vpop.permute.xlu0 %460 }
  0xa6   : > { %4919 = vset.pattern.permute.xlu1 %v9528_v1  ;;  %v5603_v15 = vpop.permute.xlu1 %675 }
  0xa7   : > { %505 = vperm.xlu1 %4919, %v406_v59   ;;  %v5605_v16 = vpop.permute.xlu0 %470 }
  0xaa   : > { %v5607_v17 = vpop.permute.xlu1 %679 }
  0xab   : > { %4920 = vset.pattern.permute.xlu1 %v9536_v0  ;;  %v5610_v18 = vpop.permute.xlu0 %480 }
  0xac   : > { %731 = vperm.xlu1 %4920, %v406_v59   ;;  %v5688_v59 = vrot.slane %v1071_v51, %v5654_v41  ;;  %v816_v41 = vmul.f32 %v5682_v57, %v5603_v15 }
  0xae   : > { %v1088_v48 = vmul.f32 %v5688_v59, %v5591_v11  ;;  %v5721_v11 = vrot.slane %v1214_v49, %v5648_v38 }
  0xaf   : > { %v5612_v20 = vpop.permute.xlu1 %953  ;;  %v5614_v21 = vpop.permute.xlu0 %490 }
  0xb0   : > { %735 = vperm.xlu1 %4920, %v5411_v23  }
  0xb3   : > { %v5617_v19 = vpop.permute.xlu0 %500 }
  0xb4   : > { %4921 = vset.pattern.permute.xlu1 %v9530_v5  ;;  %v5620_v22 = vpop.permute.xlu1 %445 }
  0xb5   : > { %1009 = vperm.xlu1 %4921, %v5411_v23   ;;  %v5638_v23 = vsub.s32 5, %v5630_v29 }
  0xb7   : > { %v5623_v24 = vpop.permute.xlu0 %510  ;;  %9700 = vst [vmem:[#allocation4_spill] sm:$0xff] %v5638_v23  ;;  %v801_v45 = vrot.slane %v422_v36, %v5638_v23  ;;  %v604_v36 = vmul.f32 %v5685_v58, %v5586_v9 }
  0xb9   : > { %4922 = vset.pattern.permute.xlu1 %v9528_v1  ;;  %v5626_v27 = vpop.permute.xlu1 %683  ;;  %v5673_v54 = vrot.slane %v801_v45, %v5648_v38 }
  0xba   : > { %515 = vperm.xlu1 %4922, %v408_v60  }
  0xbb   : > { %v5628_v28 = vpop.permute.xlu0 %520 }
  0xbd   : > { %v5632_v31 = vpop.permute.xlu1 %687 }
  0xbe   : > { %4923 = vset.pattern.permute.xlu1 %v9536_v0 }
  0xbf   : > { %739 = vperm.xlu1 %4923, %v408_v60   ;;  %v5635_v32 = vpop.permute.xlu0 %530  ;;  %v605_v60 = vmul.f32 %v5676_v55, %v5586_v9  ;;  %v878_v9 = vadd.f32 %v814_v35, %v604_v36  ;;  %v603_v35 = vmul.f32 %v5676_v55, %v5581_v7 }
  0xc0   : > { %9699 = vst [vmem:[#allocation3_spill] sm:$0xff] %v5635_v32 }
  0xc1   : > { %v1152_v34 = vadd.f32 %v1088_v48, %v878_v9 }
  0xc2   : > { %v5656_v42 = vpop.permute.xlu1 %961 }
  0xc3   : > { %743 = vperm.xlu1 %4923, %v5423_v26   ;;  %v5659_v44 = vpop.permute.xlu0 %540 }
  0xc4   : > { %9705 = vst [vmem:[#allocation9_spill] sm:$0xff] %v5659_v44 }
  0xc7   : > { %4924 = vset.pattern.permute.xlu1 %v9530_v5  ;;  %v5667_v52 = vpop.permute.xlu1 %455  ;;  %v5669_v53 = vpop.permute.xlu0 %550  ;;  %v602_v5 = vmul.f32 %v5685_v58, %v5581_v7  ;;  %v1092_v7 = vmul.f32 %v5688_v59, %v5612_v20 }
  0xc8   : > { %9706 = vst [vmem:[#allocation10_spill] sm:$0xff] %v5669_v53  ;;  %1017 = vperm.xlu1 %4924, %v5423_v26   ;;  %v815_v26 = vmul.f32 %v5673_v54, %v5584_v8  ;;  %v9712_v53 = vmov 5  }
  0xca   : > { %v879_v8 = vadd.f32 %v815_v26, %v605_v60  ;;  %v5725_v26 = vrot.slane %v1214_v49, %v5651_v39  ;;  %v813_v60 = vmul.f32 %v5673_v54, %v5579_v6 }
  0xcb   : > { %v5694_v25 = vpop.permute.xlu0 %560 }
  0xcc   : > { %9707 = vst [vmem:[#allocation11_spill] sm:$0xff] %v5694_v25  ;;  %4925 = vset.pattern.permute.xlu1 %v9528_v1  ;;  %v5701_v45 = vpop.permute.xlu1 %691  ;;  %v812_v1 = vmul.f32 %v5682_v57, %v5579_v6  ;;  %v1153_v23 = vadd.f32 %v1089_v47, %v879_v8  ;;  %v818_v47 = vmul.f32 %v5682_v57, %v5607_v17 }
  0xcd   : > { %525 = vperm.xlu1 %4925, %v5551_v61   ;;  %v819_v8 = vmul.f32 %v5673_v54, %v5607_v17  ;;  %v609_v6 = vmul.f32 %v5676_v55, %v5589_v10  ;;  %v5756_v17 = vmul.f32 %v5685_v58, %v5594_v12  ;;  %v823_v25 = vmul.f32 %v5673_v54, %v5632_v31 }
  0xce   : > { %v876_v48 = vadd.f32 %v812_v1, %v602_v5  ;;  %v5742_v9 = vadd.f32 %v5721_v11, %v1153_v23  ;;  %v5752_v1 = vadd.f32 %v5725_v26, %v1152_v34  ;;  %v877_v5 = vadd.f32 %v813_v60, %v603_v35 }
  0xcf   : > { %v5711_v50 = vpop.permute.xlu0 %570  ;;  %v613_v23 = vmul.f32 %v5676_v55, %v5594_v12  ;;  %v883_v34 = vadd.f32 %v819_v8, %v609_v6  ;;  %v607_v60 = vmul.f32 %v5676_v55, %v5597_v13  ;;  %v5781_v8 = vmul.f32 %v5676_v55, %v5605_v16 }
  0xd0   : > { %9708 = vst [vmem:[#allocation12_spill] sm:$0xff] %v5711_v50  ;;  %v5713_v51 = vpop.permute.xlu1 %695  ;;  %9710 = vst [vmem:[#allocation14_spill] sm:$0xff] %v5742_v9  ;;  %v821_v6 = vmul.f32 %v5673_v54, %v5626_v27 }
  0xd1   : > { %4926 = vset.pattern.permute.xlu1 %v9536_v0  ;;  %v1093_v0 = vmul.f32 %v5679_v56, %v5612_v20  ;;  %9711 = vst [vmem:[#allocation15_spill] sm:$0xff] %v5752_v1  ;;  %v817_v20 = vmul.f32 %v5673_v54, %v5603_v15 }
  0xd2   : > { %747 = vperm.xlu1 %4926, %v5551_v61   ;;  %v608_v61 = vmul.f32 %v5685_v58, %v5589_v10  ;;  %v606_v10 = vmul.f32 %v5685_v58, %v5597_v13  ;;  %v617_v13 = vmul.f32 %v5676_v55, %v5600_v14 }
  0xd3   : > { %v5731_v36 = vpop.permute.xlu0 %580  ;;  %v1157_v50 = vadd.f32 %v1093_v0, %v883_v34 }
  0xd4   : > { %9709 = vst [vmem:[#allocation13_spill] sm:$0xff] %v5731_v36  ;;  %v882_v29 = vadd.f32 %v818_v47, %v608_v61  ;;  %v881_v61 = vadd.f32 %v817_v20, %v607_v60  ;;  %v9715_v60 = vmov 3  }
  0xd5   : > { %v5739_v49 = vpop.permute.xlu1 %969 }
  0xd6   : > { %751 = vperm.xlu1 %4926, %v5439_v30   ;;  %v1156_v38 = vadd.f32 %v1092_v7, %v882_v29  ;;  %v880_v29 = vadd.f32 %v816_v41, %v606_v10  ;;  %v1097_v7 = vmul.f32 %v5679_v56, %v5656_v42  ;;  %v887_v41 = vadd.f32 %v823_v25, %v613_v23 }
  0xd7   : > { %v820_v25 = vmul.f32 %v5682_v57, %v5626_v27 }
  0xd8   : > { %v942_v39 = vpop.permute.xlu0 %941  ;;  %v1161_v23 = vadd.f32 %v1097_v7, %v887_v41 }
  0xd9   : > { %v1086_v35 = vmul.f32 %v5688_v59, %v942_v39  ;;  %v1087_v36 = vmul.f32 %v5679_v56, %v942_v39 }
  0xda   : > { %4927 = vset.pattern.permute.xlu1 %v9712_v53  ;;  %v5774_v15 = vpop.permute.xlu1 %465 }
  0xdb   : > { %v1150_v39 = vadd.f32 %v1086_v35, %v876_v48  ;;  %1025 = vperm.xlu1 %4927, %v5439_v30   ;;  %v1151_v0 = vadd.f32 %v1087_v36, %v877_v5  ;;  %v611_v30 = vmul.f32 %v5676_v55, %v5620_v22  ;;  %v5799_v36 = vadd.f32 %v5721_v11, %v1157_v50 }
  0xdc   : > { %v950_v34 = vpop.permute.xlu0 %949  ;;  %v5802_v5 = vadd.f32 %v5725_v26, %v1156_v38 }
  0xdd   : > { %v1090_v47 = vmul.f32 %v5688_v59, %v950_v34  ;;  %v1091_v12 = vmul.f32 %v5679_v56, %v950_v34  ;;  %v5791_v44 = vadd.f32 %v5721_v11, %v1151_v0  ;;  %v5794_v48 = vadd.f32 %v5725_v26, %v1150_v39 }
  0xde   : > { %v610_v34 = vmul.f32 %v5685_v58, %v5620_v22  ;;  %v885_v50 = vadd.f32 %v821_v6, %v611_v30  ;;  %v9717_v22 = vmax.f32 %v5752_v1, 0.0  ;;  %v822_v6 = vmul.f32 %v5682_v57, %v5632_v31 }
  0xdf   : > { %9713 = vst [vmem:[#allocation16_spill] sm:$0xff] %v5791_v44  ;;  %9714 = vst [vmem:[#allocation17_spill] sm:$0xff] %v5794_v48  ;;  %v1154_v10 = vadd.f32 %v1090_v47, %v880_v29  ;;  %v1155_v20 = vadd.f32 %v1091_v12, %v881_v61  ;;  %4928 = vset.pattern.permute.xlu1 %v9715_v60  ;;  %v5805_v35 = vpop.permute.xlu1 %699  ;;  %v9551_v0 = vmax.f32 %v5791_v44, 0.0  ;;  %v9553_v39 = vmax.f32 %v5794_v48, 0.0 }
  0xe0   : > { %535 = vperm.xlu1 %4928, %v5556_v62   ;;  %v958_v38 = vpop.permute.xlu0 %957  ;;  %v825_v12 = vmul.f32 %v5673_v54, %v5701_v45  ;;  %v9716_v29 = vmax.f32 %v5742_v9, 0.0  ;;  %v615_v44 = vmul.f32 %v5676_v55, %v5667_v52  ;;  %v9560_v31 = vmax.f32 %v5799_v36, 0.0 }
  0xe1   : > { %v1095_v47 = vmul.f32 %v5679_v56, %v958_v38  ;;  %v1354_v27 = vpack.c.bf16 %v9717_v22, %v9553_v39  ;;  %v1094_v7 = vmul.f32 %v5688_v59, %v958_v38  ;;  %v5829_v30 = vadd.f32 %v5721_v11, %v1155_v20 }
  0xe2   : > { %v1355_v61 = vpack.c.bf16 %v9716_v29, %v9551_v0  ;;  %v5832_v41 = vadd.f32 %v5725_v26, %v1154_v10  ;;  %v827_v29 = vmul.f32 %v5673_v54, %v5713_v51  ;;  %v884_v22 = vadd.f32 %v820_v25, %v610_v34 }
  0xe3   : > { %v1159_v0 = vadd.f32 %v1095_v47, %v885_v50  ;;  %v5838_v48 = vpop.permute.xlu1 %703  ;;  %v1096_v20 = vmul.f32 %v5688_v59, %v5656_v42  ;;  %v9718_v38 = vmov 4   ;;  %v9557_v39 = vmax.f32 %v5829_v30, 0.0 }
  0xe4   : > { %1622 = vmatprep.mubr.bf16.mxu0 %v1355_v61  ;;  %4929 = vset.pattern.permute.xlu1 %v9718_v38  ;;  %v966_v10 = vpop.permute.xlu0 %965  ;;  %v5846_v1 = vadd.f32 %v5721_v11, %v1161_v23  ;;  %v889_v9 = vadd.f32 %v825_v12, %v615_v44  ;;  %v1101_v50 = vmul.f32 %v5679_v56, %v5739_v49  ;;  %v9558_v44 = vmax.f32 %v5832_v41, 0.0 }
  0xe5   : > { %1623 = vmatmul.mubr.bf16.vlgmr.msra.gmra.mrb[0].mxu0 %v1354_v27  ;;  %v1099_v47 = vmul.f32 %v5679_v56, %v966_v10  ;;  %755 = vperm.xlu1 %4929, %v5556_v62   ;;  %v5853_v34 = vadd.f32 %v5721_v11, %v1159_v0  ;;  %v886_v42 = vadd.f32 %v822_v6, %v5756_v17  ;;  %v9559_v27 = vmax.f32 %v5802_v5, 0.0 }
  0xe6   : > { %v1158_v25 = vadd.f32 %v1094_v7, %v884_v22  ;;  %v1357_v23 = vpack.c.bf16 %v9560_v31, %v9557_v39  ;;  %v891_v12 = vadd.f32 %v827_v29, %v617_v13  ;;  %v614_v0 = vmul.f32 %v5685_v58, %v5667_v52 }
  0xe7   : > { %v1163_v61 = vadd.f32 %v1099_v47, %v889_v9  ;;  %v9561_v32 = vmax.f32 %v5853_v34, 0.0  ;;  %v1160_v62 = vadd.f32 %v1096_v20, %v886_v42  ;;  %v824_v17 = vmul.f32 %v5682_v57, %v5701_v45 }
  0xe8   : > { %1632 = vmatprep.mubr.bf16.mxu0 %v1357_v23  ;;  %v978_v6 = vpop.permute.xlu1 %977  ;;  %v974_v7 = vpop.permute.xlu0 %973  ;;  %v9562_v22 = vmax.f32 %v5846_v1, 0.0  ;;  %v826_v13 = vmul.f32 %v5682_v57, %v5713_v51  ;;  %v1165_v9 = vadd.f32 %v1101_v50, %v891_v12  ;;  %v829_v29 = vmul.f32 %v5673_v54, %v5805_v35 }
  0xe9   : > { %v831_v20 = vmul.f32 %v5673_v54, %v5838_v48  ;;  %759 = vperm.xlu1 %4929, %v5450_v33   ;;  %v619_v52 = vmul.f32 %v5676_v55, %v5774_v15  ;;  %v1098_v45 = vmul.f32 %v5688_v59, %v966_v10  ;;  %v1356_v47 = vpack.c.bf16 %v9559_v27, %v9558_v44 }
  0xea   : > { %v5883_v51 = vadd.f32 %v5725_v26, %v1158_v25  ;;  %v1105_v50 = vmul.f32 %v5679_v56, %v978_v6  ;;  %v1103_v42 = vmul.f32 %v5679_v56, %v974_v7  ;;  %v1359_v23 = vpack.c.bf16 %v9562_v22, %v9561_v32 }
  0xeb   : > { %v5892_v12 = vadd.f32 %v5721_v11, %v1163_v61  ;;  %v616_v10 = vmul.f32 %v5685_v58, %v5600_v14  ;;  %v888_v39 = vadd.f32 %v824_v17, %v614_v0  ;;  %v1100_v25 = vmul.f32 %v5688_v59, %v5739_v49 }
  0xec   : > { %v5899_v44 = vadd.f32 %v5725_v26, %v1160_v62  ;;  %v893_v27 = vadd.f32 %v829_v29, %v619_v52  ;;  %v895_v31 = vadd.f32 %v831_v20, %v5781_v8  ;;  %v5904_v61 = vadd.f32 %v5721_v11, %v1165_v9 }
  0xed   : > { %1633 = vmatmul.mubr.bf16.gmra.mrb[4].mxu0 %v1356_v47  ;;  %4930 = vset.pattern.permute.xlu1 %v9712_v53  ;;  %v476_v32 = vpop.permute.xlu1 %475  ;;  %v890_v22 = vadd.f32 %v826_v13, %v616_v10  ;;  %v828_v14 = vmul.f32 %v5682_v57, %v5805_v35  ;;  %v1162_v0 = vadd.f32 %v1098_v45, %v888_v39  ;;  %v9590_v49 = vmax.f32 %v5883_v51, 0.0 }
  0xee   : > { %1642 = vmatprep.mubr.bf16.mxu0 %v1359_v23  ;;  %1033 = vperm.xlu1 %4930, %v5450_v33   ;;  %v1169_v62 = vadd.f32 %v1105_v50, %v895_v31  ;;  %v1167_v17 = vadd.f32 %v1103_v42, %v893_v27  ;;  %v9589_v8 = vmax.f32 %v5892_v12, 0.0  ;;  %v618_v20 = vmul.f32 %v5685_v58, %v5774_v15  ;;  %v982_v23 = vpop.permute.xlu0 %981 }
  0xef   : > { %v1164_v29 = vadd.f32 %v1100_v25, %v890_v22  ;;  %v830_v9 = vmul.f32 %v5682_v57, %v5838_v48  ;;  %v9592_v13 = vmax.f32 %v5899_v44, 0.0  ;;  %v620_v35 = vmul.f32 %v5685_v58, %v5605_v16 }
  0xf0   : > { %v1102_v33 = vmul.f32 %v5688_v59, %v974_v7  ;;  %v9591_v39 = vmax.f32 %v5904_v61, 0.0  ;;  %v892_v31 = vadd.f32 %v828_v14, %v618_v20  ;;  %v1104_v27 = vmul.f32 %v5688_v59, %v978_v6 }
  0xf1   : > { %v1358_v15 = vpack.c.bf16 %v9592_v13, %v9590_v49  ;;  %v5927_v48 = vadd.f32 %v5725_v26, %v1162_v0  ;;  %v5936_v7 = vadd.f32 %v5721_v11, %v1167_v17  ;;  %v5939_v52 = vadd.f32 %v5721_v11, %v1169_v62 }
  0xf2   : > { %4931 = vset.pattern.permute.xlu1 %v9715_v60  ;;  %v708_v22 = vpop.permute.xlu1 %707  ;;  %v1361_v6 = vpack.c.bf16 %v9591_v39, %v9589_v8  ;;  %v894_v45 = vadd.f32 %v830_v9, %v620_v35  ;;  %v623_v47 = vmul.f32 %v5676_v55, %v476_v32  ;;  %v5943_v50 = vadd.f32 %v5725_v26, %v1164_v29 }
  0xf3   : > { %v833_v16 = vmul.f32 %v5673_v54, %v708_v22  ;;  %545 = vperm.xlu1 %4931, %v5561_v63   ;;  %v1166_v42 = vadd.f32 %v1102_v33, %v892_v31  ;;  %v9570_v0 = vmax.f32 %v5927_v48, 0.0  ;;  %v832_v17 = vmul.f32 %v5682_v57, %v708_v22 }
  0xf4   : > { %v1168_v10 = vadd.f32 %v1104_v27, %v894_v45  ;;  %v9569_v20 = vmax.f32 %v5936_v7, 0.0  ;;  %v9575_v9 = vmax.f32 %v5939_v52, 0.0  ;;  %v1107_v29 = vmul.f32 %v5679_v56, %v982_v23 }
  0xf5   : > { %1643 = vmatmul.mubr.bf16.gmra.mrb[8].mxu0 %v1358_v15  ;;  %v897_v25 = vadd.f32 %v833_v16, %v623_v47  ;;  %v9576_v33 = vmax.f32 %v5943_v50, 0.0  ;;  %v624_v31 = vmul.f32 %v5685_v58, %v5610_v18  ;;  %v622_v27 = vmul.f32 %v5685_v58, %v476_v32 }
  0xf6   : > { %1652 = vmatprep.mubr.bf16.mxu0 %v1361_v6  ;;  %v712_v14 = vpop.permute.xlu1 %711  ;;  %v5959_v22 = vadd.f32 %v5725_v26, %v1166_v42  ;;  %v625_v15 = vmul.f32 %v5676_v55, %v5610_v18  ;;  %v1363_v32 = vpack.c.bf16 %v9575_v9, %v9569_v20 }
  0xf7   : > { %v834_v62 = vmul.f32 %v5682_v57, %v712_v14  ;;  %4932 = vset.pattern.permute.xlu1 %v9718_v38  ;;  %v835_v35 = vmul.f32 %v5673_v54, %v712_v14  ;;  %v1171_v16 = vadd.f32 %v1107_v29, %v897_v25  ;;  %v1360_v6 = vpack.c.bf16 %v9576_v33, %v9570_v0 }
  0xf8   : > { %763 = vperm.xlu1 %4932, %v5561_v63   ;;  %v5968_v63 = vadd.f32 %v5725_v26, %v1168_v10  ;;  %v896_v45 = vadd.f32 %v832_v17, %v622_v27  ;;  %v1106_v29 = vmul.f32 %v5688_v59, %v982_v23  ;;  %v9564_v10 = vmax.f32 %v5959_v22, 0.0 }
  0xf9   : > { %v898_v47 = vadd.f32 %v834_v62, %v624_v31  ;;  %v899_v42 = vadd.f32 %v835_v35, %v625_v15  ;;  %v5981_v27 = vadd.f32 %v5721_v11, %v1171_v16 }
  0xfa   : > { %v9566_v31 = vmax.f32 %v5968_v63, 0.0  ;;  %v1170_v35 = vadd.f32 %v1106_v29, %v896_v45 }
  0xfb   : > { %v986_v14 = vpop.permute.xlu1 %985 }
  0xfc   : > { %v1108_v18 = vmul.f32 %v5688_v59, %v986_v14  ;;  %v1109_v25 = vmul.f32 %v5679_v56, %v986_v14  ;;  %767 = vperm.xlu1 %4932, %v5465_v37   ;;  %v1362_v23 = vpack.c.bf16 %v9566_v31, %v9564_v10 }
  0xfd   : > { %1653 = vmatmul.mubr.bf16.gmra.mrb[12].mxu0 %v1360_v6  ;;  %v9563_v6 = vmax.f32 %v5981_v27, 0.0 }
  0xfe   : > { %1662 = vmatprep.mubr.bf16.mxu0 %v1363_v32  ;;  %v1172_v17 = vadd.f32 %v1108_v18, %v898_v47  ;;  %v1173_v62 = vadd.f32 %v1109_v25, %v899_v42 }
 0x100   : > { %4933 = vset.pattern.permute.xlu1 %v9712_v53  ;;  %v486_v15 = vpop.permute.xlu1 %485  ;;  %v5985_v14 = vadd.f32 %v5721_v11, %v1173_v62  ;;  %v5995_v16 = vadd.f32 %v5725_v26, %v1172_v17  ;;  %v990_v62 = vpop.permute.xlu0 %989 }
 0x101   : > { %1041 = vperm.xlu1 %4933, %v5465_v37   ;;  %v6002_v37 = vadd.f32 %v5725_v26, %v1170_v35  ;;  %v626_v29 = vmul.f32 %v5685_v58, %v486_v15  ;;  %v627_v17 = vmul.f32 %v5676_v55, %v486_v15 }
 0x102   : > { %v9565_v47 = vmax.f32 %v5985_v14, 0.0  ;;  %v9568_v25 = vmax.f32 %v5995_v16, 0.0 }
 0x103   : > { %v9567_v35 = vmax.f32 %v6002_v37, 0.0 }
 0x104   : > { %v1365_v45 = vpack.c.bf16 %v9565_v47, %v9563_v6  ;;  %v1111_v47 = vmul.f32 %v5679_v56, %v990_v62 }
 0x105   : > { %1663 = vmatmul.mubr.bf16.gmra.mrb[16].mxu0 %v1362_v23  ;;  %4934 = vset.pattern.permute.xlu1 %v9715_v60  ;;  %v716_v32 = vpop.permute.xlu1 %715 }
 0x106   : > { %v836_v42 = vmul.f32 %v5682_v57, %v716_v32  ;;  %v837_v18 = vmul.f32 %v5673_v54, %v716_v32  ;;  %555 = vperm.xlu1 %4934, %v5566_v2   ;;  %1672 = vmatprep.mubr.bf16.mxu0 %v1365_v45  ;;  %v1364_v32 = vpack.c.bf16 %v9568_v25, %v9567_v35 }
 0x107   : > { %v1110_v45 = vmul.f32 %v5688_v59, %v990_v62  ;;  %v4994_v62 = vld [vmem:[%s9521_s5 + $0x4] ss:$8 sps:$4 sm:$0xff]  }
 0x108   : > { %v900_v23 = vadd.f32 %v836_v42, %v626_v29  ;;  %v901_v6 = vadd.f32 %v837_v18, %v627_v17  ;;  %v628_v42 = vmul.f32 %v5685_v58, %v5614_v21  ;;  %v629_v18 = vmul.f32 %v5676_v55, %v5614_v21  ;;  %2147 = vmatprep.subr.bf16.mxu1 %v4994_v62  ;;  %v998_v62 = vpop.permute.xlu0 %997 }
 0x109   : > { %v720_v10 = vpop.permute.xlu1 %719 }
 0x10a   : > { %4935 = vset.pattern.permute.xlu1 %v9718_v38  ;;  %v838_v31 = vmul.f32 %v5682_v57, %v720_v10  ;;  %v839_v15 = vmul.f32 %v5673_v54, %v720_v10  ;;  %v1174_v29 = vadd.f32 %v1110_v45, %v900_v23  ;;  %v1175_v17 = vadd.f32 %v1111_v47, %v901_v6 }
 0x10b   : > { %771 = vperm.xlu1 %4935, %v5566_v2  }
 0x10c   : > { %v902_v25 = vadd.f32 %v838_v31, %v628_v42  ;;  %v903_v20 = vadd.f32 %v839_v15, %v629_v18  ;;  %v6033_v21 = vadd.f32 %v5721_v11, %v1175_v17  ;;  %v6036_v6 = vadd.f32 %v5725_v26, %v1174_v29 }
 0x10d   : > { %1673 = vmatmul.mubr.bf16.gmra.mrb[20].mxu0 %v1364_v32 }
 0x10e   : > { %v994_v35 = vpop.permute.xlu1 %993 }
 0x10f   : > { %v1112_v10 = vmul.f32 %v5688_v59, %v994_v35  ;;  %v1113_v2 = vmul.f32 %v5679_v56, %v994_v35  ;;  %775 = vperm.xlu1 %4935, %v5477_v40   ;;  %v9571_v35 = vmax.f32 %v6036_v6, 0.0 }
 0x111   : > { %v1176_v32 = vadd.f32 %v1112_v10, %v902_v25  ;;  %v1177_v0 = vadd.f32 %v1113_v2, %v903_v20  ;;  %v9574_v25 = vmax.f32 %v6033_v21, 0.0 }
 0x113   : > { %4936 = vset.pattern.permute.xlu1 %v9712_v53  ;;  %v496_v47 = vpop.permute.xlu1 %495  ;;  %v6040_v31 = vadd.f32 %v5721_v11, %v1177_v0  ;;  %v6043_v23 = vadd.f32 %v5725_v26, %v1176_v32 }
 0x114   : > { %1049 = vperm.xlu1 %4936, %v5477_v40   ;;  %v630_v29 = vmul.f32 %v5685_v58, %v496_v47  ;;  %v631_v17 = vmul.f32 %v5676_v55, %v496_v47  ;;  %v632_v47 = vmul.f32 %v5685_v58, %v5617_v19 }
 0x115   : > { %v9573_v20 = vmax.f32 %v6040_v31, 0.0  ;;  %v9572_v45 = vmax.f32 %v6043_v23, 0.0 }
 0x117   : > { %v1367_v15 = vpack.c.bf16 %v9573_v20, %v9574_v25  ;;  %v1366_v0 = vpack.c.bf16 %v9572_v45, %v9571_v35  ;;  %v1114_v35 = vmul.f32 %v5688_v59, %v998_v62  ;;  %v1115_v45 = vmul.f32 %v5679_v56, %v998_v62 }
 0x118   : > { %4937 = vset.pattern.permute.xlu1 %v9715_v60  ;;  %v724_v40 = vpop.permute.xlu1 %723 }
 0x119   : > { %v840_v42 = vmul.f32 %v5682_v57, %v724_v40  ;;  %v841_v18 = vmul.f32 %v5673_v54, %v724_v40  ;;  %565 = vperm.xlu1 %4937, %v5571_v3   ;;  %1682 = vmatprep.mubr.bf16.mxu0 %v1367_v15  ;;  %v633_v15 = vmul.f32 %v5676_v55, %v5617_v19 }
 0x11a   : > { %1683 = vmatmul.mubr.bf16.gmra.mrb[24].mxu0 %v1366_v0 }
 0x11b   : > { %v904_v10 = vadd.f32 %v840_v42, %v630_v29  ;;  %v905_v2 = vadd.f32 %v841_v18, %v631_v17 }
 0x11c   : > { %v728_v32 = vpop.permute.xlu1 %727 }
 0x11d   : > { %4938 = vset.pattern.permute.xlu1 %v9718_v38  ;;  %v842_v40 = vmul.f32 %v5682_v57, %v728_v32  ;;  %v843_v20 = vmul.f32 %v5673_v54, %v728_v32  ;;  %v1178_v0 = vadd.f32 %v1114_v35, %v904_v10  ;;  %v1179_v42 = vadd.f32 %v1115_v45, %v905_v2 }
 0x11e   : > { %779 = vperm.xlu1 %4938, %v5571_v3  }
 0x11f   : > { %v906_v29 = vadd.f32 %v842_v40, %v632_v47  ;;  %v907_v17 = vadd.f32 %v843_v20, %v633_v15  ;;  %v6078_v3 = vadd.f32 %v5721_v11, %v1179_v42  ;;  %v6081_v33 = vadd.f32 %v5725_v26, %v1178_v0 }
 0x121   : > { %v1002_v18 = vpop.permute.xlu1 %1001  ;;  %v9577_v10 = vmax.f32 %v6081_v33, 0.0 }
 0x122   : > { %v1116_v25 = vmul.f32 %v5688_v59, %v1002_v18  ;;  %v1117_v62 = vmul.f32 %v5679_v56, %v1002_v18  ;;  %783 = vperm.xlu1 %4938, %v5489_v43   ;;  %v1006_v18 = vpop.permute.xlu0 %1005 }
 0x124   : > { %v1180_v32 = vadd.f32 %v1116_v25, %v906_v29  ;;  %v1181_v9 = vadd.f32 %v1117_v62, %v907_v17  ;;  %v9579_v25 = vmax.f32 %v6078_v3, 0.0 }
 0x126   : > { %4939 = vset.pattern.permute.xlu1 %v9712_v53  ;;  %v506_v19 = vpop.permute.xlu1 %505  ;;  %v6085_v35 = vadd.f32 %v5721_v11, %v1181_v9  ;;  %v6088_v20 = vadd.f32 %v5725_v26, %v1180_v32  ;;  %v1119_v32 = vmul.f32 %v5679_v56, %v1006_v18 }
 0x127   : > { %1057 = vperm.xlu1 %4939, %v5489_v43   ;;  %v634_v0 = vmul.f32 %v5685_v58, %v506_v19  ;;  %v635_v42 = vmul.f32 %v5676_v55, %v506_v19  ;;  %v636_v19 = vmul.f32 %v5685_v58, %v5623_v24 }
 0x128   : > { %v9578_v45 = vmax.f32 %v6085_v35, 0.0  ;;  %v9584_v2 = vmax.f32 %v6088_v20, 0.0 }
 0x12a   : > { %v1369_v40 = vpack.c.bf16 %v9578_v45, %v9579_v25  ;;  %v1368_v9 = vpack.c.bf16 %v9584_v2, %v9577_v10  ;;  %v5001_v2 = vld [vmem:[%s9521_s5 + $0x30] ss:$8 sps:$4 sm:$0xff]  }
 0x12b   : > { %4940 = vset.pattern.permute.xlu1 %v9715_v60  ;;  %v732_v43 = vpop.permute.xlu1 %731  ;;  %v1118_v60 = vmul.f32 %v5688_v59, %v1006_v18 }
 0x12c   : > { %v844_v47 = vmul.f32 %v5682_v57, %v732_v43  ;;  %v845_v15 = vmul.f32 %v5673_v54, %v732_v43  ;;  %575 = vperm.xlu1 %4940, %v5576_v4   ;;  %1692 = vmatprep.mubr.bf16.mxu0 %v1369_v40  ;;  %v637_v40 = vmul.f32 %v5676_v55, %v5623_v24 }
 0x12d   : > { %1693 = vmatmul.mubr.bf16.gmra.mrb[28].mxu0 %v1368_v9 }
 0x12e   : > { %v908_v29 = vadd.f32 %v844_v47, %v634_v0  ;;  %v909_v17 = vadd.f32 %v845_v15, %v635_v42 }
 0x12f   : > { %v736_v62 = vpop.permute.xlu1 %735 }
 0x130   : > { %4942 = vset.pattern.permute.xlu1 %v9718_v38  ;;  %v846_v43 = vmul.f32 %v5682_v57, %v736_v62  ;;  %v847_v10 = vmul.f32 %v5673_v54, %v736_v62  ;;  %v1182_v9 = vadd.f32 %v1118_v60, %v908_v29  ;;  %v1183_v47 = vadd.f32 %v1119_v32, %v909_v17 }
 0x131   : > { %787 = vperm.xlu1 %4942, %v5576_v4  }
 0x132   : > { %v910_v38 = vadd.f32 %v846_v43, %v636_v19  ;;  %v911_v0 = vadd.f32 %v847_v10, %v637_v40  ;;  %v6123_v4 = vadd.f32 %v5721_v11, %v1183_v47  ;;  %v6126_v25 = vadd.f32 %v5725_v26, %v1182_v9  ;;  %v4997_v40 = vld [vmem:[%s9521_s5 + $0x14] ss:$8 sps:$4 sm:$0xff]  }
 0x134   : > { %v1010_v15 = vpop.permute.xlu1 %1009  ;;  %v9582_v17 = vmax.f32 %v6123_v4, 0.0  ;;  %v9580_v32 = vmax.f32 %v6126_v25, 0.0 }
 0x135   : > { %v1120_v42 = vmul.f32 %v5688_v59, %v1010_v15  ;;  %v1121_v18 = vmul.f32 %v5679_v56, %v1010_v15  ;;  %791 = vperm.xlu1 %4942, %v5500_v46  }
 0x137   : > { %v1184_v62 = vadd.f32 %v1120_v42, %v910_v38  ;;  %v1185_v45 = vadd.f32 %v1121_v18, %v911_v0  ;;  %v1014_v0 = vpop.permute.xlu0 %1013  ;;  %v4995_v42 = vld [vmem:[%s9521_s5 + $0x10] ss:$8 sps:$4 sm:$0xff]  }
 0x139   : > { %4943 = vset.pattern.permute.xlu1 %v9712_v53  ;;  %v516_v24 = vpop.permute.xlu1 %515  ;;  %v6130_v29 = vadd.f32 %v5721_v11, %v1185_v45  ;;  %v6133_v10 = vadd.f32 %v5725_v26, %v1184_v62 }
 0x13a   : > { %1065 = vperm.xlu1 %4943, %v5500_v46   ;;  %v4992_v46 = vld [vmem:[%s9521_s5] ss:$8 sps:$4 sm:$0xff]   ;;  %v638_v15 = vmul.f32 %v5685_v58, %v516_v24  ;;  %v639_v38 = vmul.f32 %v5676_v55, %v516_v24 }
 0x13b   : > { %v9581_v60 = vmax.f32 %v6130_v29, 0.0  ;;  %v9583_v43 = vmax.f32 %v6133_v10, 0.0 }
 0x13d   : > { %v1371_v53 = vpack.c.bf16 %v9581_v60, %v9582_v17  ;;  %v1370_v45 = vpack.c.bf16 %v9583_v43, %v9580_v32  ;;  %v1123_v60 = vmul.f32 %v5679_v56, %v1014_v0 }
 0x13e   : > { %v740_v19 = vpop.permute.xlu1 %739 }
 0x13f   : > { %v848_v9 = vmul.f32 %v5682_v57, %v740_v19  ;;  %v849_v47 = vmul.f32 %v5673_v54, %v740_v19  ;;  %1702 = vmatprep.mubr.bf16.mxu1 %v1371_v53  ;;  %v5000_v19 = vld [vmem:[%s9521_s5 + $0x24] ss:$8 sps:$4 sm:$0xff]   ;;  %v1122_v53 = vmul.f32 %v5688_v59, %v1014_v0 }
 0x140   : > { %1703 = vmatmul.mubr.bf16.vlgmr.msra.gmra.mrb[0].mxu1 %v1370_v45 }
 0x141   : > { %2148 = vmatpush1.bf16.msra.mxu1 %v4992_v46  ;;  %v912_v18 = vadd.f32 %v848_v9, %v638_v15  ;;  %v913_v62 = vadd.f32 %v849_v47, %v639_v38  ;;  %v4998_v46 = vld [vmem:[%s9521_s5 + $0x20] ss:$8 sps:$4 sm:$0xff]   ;;  %v641_v9 = vmul.f32 %v5676_v55, %v5628_v28  ;;  %v5003_v38 = vld [vmem:[%s9521_s5 + $0x34] ss:$8 sps:$4 sm:$0xff]  }
 0x142   : > { %v744_v32 = vpop.permute.xlu1 %743  ;;  %2149 = vmatprep.subr.bf16.mxu1 %v4997_v40  ;;  %v640_v40 = vmul.f32 %v5685_v58, %v5628_v28 }
 0x143   : > { %v850_v24 = vmul.f32 %v5682_v57, %v744_v32  ;;  %v851_v45 = vmul.f32 %v5673_v54, %v744_v32  ;;  %v1186_v47 = vadd.f32 %v1122_v53, %v912_v18  ;;  %v1187_v15 = vadd.f32 %v1123_v60, %v913_v62 }
 0x145   : > { %2150 = vmatpush1.bf16.msra.mxu1 %v4995_v42  ;;  %v914_v32 = vadd.f32 %v850_v24, %v640_v40  ;;  %v915_v42 = vadd.f32 %v851_v45, %v641_v9  ;;  %v6184_v60 = vadd.f32 %v5721_v11, %v1187_v15  ;;  %v6187_v62 = vadd.f32 %v5725_v26, %v1186_v47  ;;  %v5009_v47 = vld [vmem:[%s9521_s5 + $0x54] ss:$8 sps:$4 sm:$0xff]  }
 0x146   : > { %2151 = vmatprep.subr.bf16.mxu1 %v5000_v19  ;;  %v5006_v19 = vld [vmem:[%s9521_s5 + $0x44] ss:$8 sps:$4 sm:$0xff]  }
 0x147   : > { %v1018_v0 = vpop.permute.xlu1 %1017  ;;  %9719 = vst [vmem:[#allocation18_spill] sm:$0xff] %v6187_v62  ;;  %v9585_v40 = vmax.f32 %v6187_v62, 0.0 }
 0x148   : > { %v1124_v17 = vmul.f32 %v5688_v59, %v1018_v0  ;;  %v1125_v43 = vmul.f32 %v5679_v56, %v1018_v0  ;;  %v5007_v0 = vld [vmem:[%s9521_s5 + $0x50] ss:$8 sps:$4 sm:$0xff]  }
 0x149   : > { %2152 = vmatpush1.bf16.msra.mxu1 %v4998_v46 }
 0x14a   : > { %v1188_v28 = vadd.f32 %v1124_v17, %v914_v32  ;;  %v1189_v18 = vadd.f32 %v1125_v43, %v915_v42  ;;  %2153 = vmatprep.subr.bf16.mxu1 %v5003_v38  ;;  %v5004_v17 = vld [vmem:[%s9521_s5 + $0x40] ss:$8 sps:$4 sm:$0xff]   ;;  %v9587_v43 = vmax.f32 %v6184_v60, 0.0 }
 0x14c   : > { %v526_v53 = vpop.permute.xlu1 %525  ;;  %v6193_v24 = vadd.f32 %v5721_v11, %v1189_v18  ;;  %v6196_v45 = vadd.f32 %v5725_v26, %v1188_v28  ;;  %v5012_v28 = vld [vmem:[%s9521_s5 + $0x64] ss:$8 sps:$4 sm:$0xff]  }
 0x14d   : > { %2154 = vmatpush1.bf16.msra.mxu1 %v5001_v2  ;;  %v642_v18 = vmul.f32 %v5685_v58, %v526_v53 }
 0x14e   : > { %v9586_v46 = vmax.f32 %v6193_v24, 0.0  ;;  %v9588_v9 = vmax.f32 %v6196_v45, 0.0  ;;  %2155 = vmatprep.subr.bf16.mxu1 %v5006_v19  ;;  %v643_v19 = vmul.f32 %v5676_v55, %v526_v53 }
 0x150   : > { %v1373_v2 = vpack.c.bf16 %v9586_v46, %v9587_v43  ;;  %v1372_v15 = vpack.c.bf16 %v9588_v9, %v9585_v40 }
 0x151   : > { %v748_v38 = vpop.permute.xlu1 %747  ;;  %2156 = vmatpush1.bf16.msra.mxu1 %v5004_v17  ;;  %v1022_v17 = vpop.permute.xlu0 %1021 }
 0x152   : > { %v852_v32 = vmul.f32 %v5682_v57, %v748_v38  ;;  %v853_v42 = vmul.f32 %v5673_v54, %v748_v38  ;;  %1712 = vmatprep.mubr.bf16.mxu1 %v1373_v2  ;;  %2157 = vmatprep.subr.bf16.mxu1 %v5009_v47  ;;  %v5010_v38 = vld [vmem:[%s9521_s5 + $0x60] ss:$8 sps:$4 sm:$0xff]   ;;  %v5015_v47 = vld [vmem:[%s9521_s5 + $0x74] ss:$8 sps:$4 sm:$0xff]   ;;  %v1126_v2 = vmul.f32 %v5688_v59, %v1022_v17 }
 0x153   : > { %1713 = vmatmul.mubr.bf16.gmra.mrb[4].mxu1 %v1372_v15  ;;  %v1127_v9 = vmul.f32 %v5679_v56, %v1022_v17  ;;  %v5018_v17 = vld [vmem:[%s9521_s5 + $0x84] ss:$8 sps:$4 sm:$0xff]  }
 0x154   : > { %v916_v40 = vadd.f32 %v852_v32, %v642_v18  ;;  %v917_v46 = vadd.f32 %v853_v42, %v643_v19  ;;  %v9720_v32 = vld [vmem:[#allocation3_spill] sm:$0xff]  ;;  %v5013_v19 = vld [vmem:[%s9521_s5 + $0x70] ss:$8 sps:$4 sm:$0xff]  }
 0x155   : > { %v752_v43 = vpop.permute.xlu1 %751  ;;  %2158 = vmatpush1.bf16.msra.mxu1 %v5007_v0  ;;  %v644_v0 = vmul.f32 %v5685_v58, %v9720_v32  ;;  %v645_v42 = vmul.f32 %v5676_v55, %v9720_v32 }
 0x156   : > { %2159 = vmatprep.subr.bf16.mxu1 %v5012_v28  ;;  %v854_v53 = vmul.f32 %v5682_v57, %v752_v43  ;;  %v855_v15 = vmul.f32 %v5673_v54, %v752_v43  ;;  %v1190_v18 = vadd.f32 %v1126_v2, %v916_v40  ;;  %v1191_v28 = vadd.f32 %v1127_v9, %v917_v46 }
 0x158   : > { %v918_v43 = vadd.f32 %v854_v53, %v644_v0  ;;  %v919_v49 = vadd.f32 %v855_v15, %v645_v42  ;;  %v6249_v46 = vadd.f32 %v5721_v11, %v1191_v28  ;;  %v6252_v9 = vadd.f32 %v5725_v26, %v1190_v18  ;;  %v5019_v0 = vld [vmem:[%s9521_s5 + $0x90] ss:$8 sps:$4 sm:$0xff]   ;;  %v5024_v42 = vld [vmem:[%s9521_s5 + $0xa4] ss:$8 sps:$4 sm:$0xff]  }
 0x159   : > { %2160 = vmatpush1.bf16.msra.mxu1 %v5010_v38  ;;  %v5016_v38 = vld [vmem:[%s9521_s5 + $0x80] ss:$8 sps:$4 sm:$0xff]  }
 0x15a   : > { %v1026_v8 = vpop.permute.xlu1 %1025  ;;  %2161 = vmatprep.subr.bf16.mxu1 %v5015_v47  ;;  %9721 = vst [vmem:[#allocation3_spill] sm:$0xff] %v6249_v46  ;;  %9722 = vst [vmem:[#allocation19_spill] sm:$0xff] %v6252_v9  ;;  %v5021_v47 = vld [vmem:[%s9521_s5 + $0x94] ss:$8 sps:$4 sm:$0xff]   ;;  %v9593_v53 = vmax.f32 %v6252_v9, 0.0 }
 0x15b   : > { %v1128_v39 = vmul.f32 %v5688_v59, %v1026_v8  ;;  %v1129_v13 = vmul.f32 %v5679_v56, %v1026_v8 }
 0x15d   : > { %v1192_v32 = vadd.f32 %v1128_v39, %v918_v43  ;;  %v1193_v40 = vadd.f32 %v1129_v13, %v919_v49  ;;  %2162 = vmatpush1.bf16.msra.mxu1 %v5013_v19  ;;  %v9595_v13 = vmax.f32 %v6249_v46, 0.0 }
 0x15e   : > { %2163 = vmatprep.subr.bf16.mxu1 %v5018_v17 }
 0x15f   : > { %v536_v2 = vpop.permute.xlu1 %535  ;;  %v6261_v8 = vadd.f32 %v5721_v11, %v1193_v40  ;;  %v6264_v49 = vadd.f32 %v5725_v26, %v1192_v32  ;;  %v5022_v32 = vld [vmem:[%s9521_s5 + $0xa0] ss:$8 sps:$4 sm:$0xff]  }
 0x160   : > { %v646_v40 = vmul.f32 %v5685_v58, %v536_v2 }
 0x161   : > { %9723 = vst [vmem:[#allocation20_spill] sm:$0xff] %v6261_v8  ;;  %9724 = vst [vmem:[#allocation21_spill] sm:$0xff] %v6264_v49  ;;  %v9594_v39 = vmax.f32 %v6261_v8, 0.0  ;;  %v9596_v15 = vmax.f32 %v6264_v49, 0.0  ;;  %2164 = vmatpush1.bf16.msra.mxu1 %v5016_v38  ;;  %v647_v38 = vmul.f32 %v5676_v55, %v536_v2  ;;  %v5033_v49 = vld [vmem:[%s9521_s5 + $0xd4] ss:$8 sps:$4 sm:$0xff]  }
 0x162   : > { %2165 = vmatprep.subr.bf16.mxu1 %v5021_v47  ;;  %v5027_v47 = vld [vmem:[%s9521_s5 + $0xb4] ss:$8 sps:$4 sm:$0xff]  }
 0x163   : > { %v1375_v18 = vpack.c.bf16 %v9594_v39, %v9595_v13  ;;  %v1374_v28 = vpack.c.bf16 %v9596_v15, %v9593_v53  ;;  %v1030_v53 = vpop.permute.xlu0 %1029 }
 0x164   : > { %v756_v19 = vpop.permute.xlu1 %755  ;;  %v1131_v15 = vmul.f32 %v5679_v56, %v1030_v53 }
 0x165   : > { %v856_v17 = vmul.f32 %v5682_v57, %v756_v19  ;;  %v857_v43 = vmul.f32 %v5673_v54, %v756_v19  ;;  %1722 = vmatprep.mubr.bf16.mxu1 %v1375_v18  ;;  %2166 = vmatpush1.bf16.msra.mxu1 %v5019_v0  ;;  %v5025_v0 = vld [vmem:[%s9521_s5 + $0xb0] ss:$8 sps:$4 sm:$0xff]   ;;  %v1130_v18 = vmul.f32 %v5688_v59, %v1030_v53  ;;  %v5028_v53 = vld [vmem:[%s9521_s5 + $0xc0] ss:$8 sps:$4 sm:$0xff]  }
 0x166   : > { %1723 = vmatmul.mubr.bf16.gmra.mrb[8].mxu1 %v1374_v28  ;;  %2167 = vmatprep.subr.bf16.mxu1 %v5024_v42  ;;  %v5030_v28 = vld [vmem:[%s9521_s5 + $0xc4] ss:$8 sps:$4 sm:$0xff]  }
 0x167   : > { %v920_v39 = vadd.f32 %v856_v17, %v646_v40  ;;  %v921_v13 = vadd.f32 %v857_v43, %v647_v38  ;;  %v9725_v17 = vld [vmem:[#allocation9_spill] sm:$0xff] }
 0x168   : > { %v760_v19 = vpop.permute.xlu1 %759  ;;  %v648_v43 = vmul.f32 %v5685_v58, %v9725_v17 }
 0x169   : > { %2168 = vmatpush1.bf16.msra.mxu1 %v5022_v32  ;;  %v858_v2 = vmul.f32 %v5682_v57, %v760_v19  ;;  %v859_v42 = vmul.f32 %v5673_v54, %v760_v19  ;;  %v649_v32 = vmul.f32 %v5676_v55, %v9725_v17  ;;  %v1194_v40 = vadd.f32 %v1130_v18, %v920_v39 }
 0x16a   : > { %2169 = vmatprep.subr.bf16.mxu1 %v5027_v47  ;;  %v1195_v38 = vadd.f32 %v1131_v15, %v921_v13 }
 0x16b   : > { %v922_v19 = vadd.f32 %v858_v2, %v648_v43  ;;  %v923_v47 = vadd.f32 %v859_v42, %v649_v32  ;;  %v6320_v15 = vadd.f32 %v5725_v26, %v1194_v40  ;;  %v5034_v40 = vld [vmem:[%s9521_s5 + $0xe0] ss:$8 sps:$4 sm:$0xff]  }
 0x16c   : > { %v6317_v13 = vadd.f32 %v5721_v11, %v1195_v38 }
 0x16d   : > { %v1034_v9 = vpop.permute.xlu1 %1033  ;;  %2170 = vmatpush1.bf16.msra.mxu1 %v5025_v0  ;;  %9727 = vst [vmem:[#allocation22_spill] sm:$0xff] %v6320_v15  ;;  %v5031_v0 = vld [vmem:[%s9521_s5 + $0xd0] ss:$8 sps:$4 sm:$0xff]  }
 0x16e   : > { %v1132_v8 = vmul.f32 %v5688_v59, %v1034_v9  ;;  %v1133_v46 = vmul.f32 %v5679_v56, %v1034_v9  ;;  %2171 = vmatprep.subr.bf16.mxu1 %v5030_v28  ;;  %9726 = vst [vmem:[#allocation9_spill] sm:$0xff] %v6317_v13  ;;  %v9601_v28 = vmax.f32 %v6320_v15, 0.0 }
 0x170   : > { %v1196_v17 = vadd.f32 %v1132_v8, %v922_v19  ;;  %v1197_v39 = vadd.f32 %v1133_v46, %v923_v47  ;;  %v5036_v46 = vld [vmem:[%s9521_s5 + $0xe4] ss:$8 sps:$4 sm:$0xff]   ;;  %v9603_v8 = vmax.f32 %v6317_v13, 0.0 }
 0x171   : > { %2172 = vmatpush1.bf16.msra.mxu1 %v5028_v53  ;;  %v5039_v53 = vld [vmem:[%s9521_s5 + $0xf4] ss:$8 sps:$4 sm:$0xff]  }
 0x172   : > { %v546_v18 = vpop.permute.xlu1 %545  ;;  %v6326_v9 = vadd.f32 %v5721_v11, %v1197_v39  ;;  %v6329_v2 = vadd.f32 %v5725_v26, %v1196_v17  ;;  %2173 = vmatprep.subr.bf16.mxu1 %v5033_v49 }
 0x173   : > { %v650_v17 = vmul.f32 %v5685_v58, %v546_v18  ;;  %v651_v39 = vmul.f32 %v5676_v55, %v546_v18  ;;  %v9730_v18 = vld [vmem:[#allocation10_spill] sm:$0xff] }
 0x174   : > { %9728 = vst [vmem:[#allocation23_spill] sm:$0xff] %v6326_v9  ;;  %9729 = vst [vmem:[#allocation24_spill] sm:$0xff] %v6329_v2  ;;  %v9602_v42 = vmax.f32 %v6326_v9, 0.0  ;;  %v9604_v43 = vmax.f32 %v6329_v2, 0.0 }
 0x175   : > { %2174 = vmatpush1.bf16.msra.mxu1 %v5031_v0  ;;  %v1038_v0 = vpop.permute.xlu0 %1037 }
 0x176   : > { %v1377_v32 = vpack.c.bf16 %v9602_v42, %v9603_v8  ;;  %v1376_v49 = vpack.c.bf16 %v9604_v43, %v9601_v28  ;;  %2175 = vmatprep.subr.bf16.mxu1 %v5036_v46  ;;  %v5037_v46 = vld [vmem:[%s9521_s5 + $0xf0] ss:$8 sps:$4 sm:$0xff]   ;;  %v1134_v43 = vmul.f32 %v5688_v59, %v1038_v0 }
 0x177   : > { %v764_v38 = vpop.permute.xlu1 %763 }
 0x178   : > { %v860_v19 = vmul.f32 %v5682_v57, %v764_v38  ;;  %v861_v47 = vmul.f32 %v5673_v54, %v764_v38  ;;  %1732 = vmatprep.mubr.bf16.mxu1 %v1377_v32  ;;  %v1135_v38 = vmul.f32 %v5679_v56, %v1038_v0 }
 0x179   : > { %1733 = vmatmul.mubr.bf16.gmra.mrb[12].mxu1 %v1376_v49  ;;  %v652_v49 = vmul.f32 %v5685_v58, %v9730_v18 }
 0x17a   : > { %2176 = vmatpush1.bf16.msra.mxu1 %v5034_v40  ;;  %v924_v28 = vadd.f32 %v860_v19, %v650_v17  ;;  %v925_v42 = vadd.f32 %v861_v47, %v651_v39  ;;  %v653_v40 = vmul.f32 %v5676_v55, %v9730_v18 }
 0x17b   : > { %v768_v8 = vpop.permute.xlu1 %767  ;;  %2177 = vmatprep.subr.bf16.mxu1 %v5039_v53 }
 0x17c   : > { %v862_v32 = vmul.f32 %v5682_v57, %v768_v8  ;;  %v863_v15 = vmul.f32 %v5673_v54, %v768_v8  ;;  %v1198_v9 = vadd.f32 %v1134_v43, %v924_v28  ;;  %v1199_v19 = vadd.f32 %v1135_v38, %v925_v42 }
 0x17e   : > { %2178 = vmatpush1.bf16.msra.mxu1 %v5037_v46  ;;  %v926_v17 = vadd.f32 %v862_v32, %v652_v49  ;;  %v927_v53 = vadd.f32 %v863_v15, %v653_v40  ;;  %v6370_v8 = vadd.f32 %v5721_v11, %v1199_v19  ;;  %v6373_v46 = vadd.f32 %v5725_v26, %v1198_v9 }
 0x180   : > { %v1042_v47 = vpop.permute.xlu1 %1041  ;;  %9731 = vst [vmem:[#allocation10_spill] sm:$0xff] %v6370_v8  ;;  %9732 = vst [vmem:[#allocation25_spill] sm:$0xff] %v6373_v46  ;;  %v9612_v15 = vmax.f32 %v6370_v8, 0.0  ;;  %v9611_v43 = vmax.f32 %v6373_v46, 0.0 }
 0x181   : > { %v1136_v39 = vmul.f32 %v5688_v59, %v1042_v47  ;;  %v1137_v0 = vmul.f32 %v5679_v56, %v1042_v47  ;;  %v1046_v47 = vpop.permute.xlu0 %1045 }
 0x183   : > { %v1200_v13 = vadd.f32 %v1136_v39, %v926_v17  ;;  %v1201_v2 = vadd.f32 %v1137_v0, %v927_v53  ;;  %v1138_v0 = vmul.f32 %v5688_v59, %v1046_v47 }
 0x185   : > { %v556_v62 = vpop.permute.xlu1 %555  ;;  %v6376_v18 = vadd.f32 %v5721_v11, %v1201_v2  ;;  %v6379_v42 = vadd.f32 %v5725_v26, %v1200_v13 }
 0x186   : > { %v654_v40 = vmul.f32 %v5685_v58, %v556_v62  ;;  %v655_v19 = vmul.f32 %v5676_v55, %v556_v62 }
 0x187   : > { %9733 = vst [vmem:[#allocation26_spill] sm:$0xff] %v6376_v18  ;;  %9734 = vst [vmem:[#allocation27_spill] sm:$0xff] %v6379_v42  ;;  %v9610_v28 = vmax.f32 %v6376_v18, 0.0  ;;  %v9613_v38 = vmax.f32 %v6379_v42, 0.0 }
 0x189   : > { %v1379_v9 = vpack.c.bf16 %v9610_v28, %v9612_v15  ;;  %v1378_v2 = vpack.c.bf16 %v9613_v38, %v9611_v43  ;;  %v1139_v28 = vmul.f32 %v5679_v56, %v1046_v47  ;;  %v9735_v38 = vld [vmem:[#allocation11_spill] sm:$0xff] }
 0x18a   : > { %v772_v13 = vpop.permute.xlu1 %771 }
 0x18b   : > { %v864_v32 = vmul.f32 %v5682_v57, %v772_v13  ;;  %v865_v49 = vmul.f32 %v5673_v54, %v772_v13  ;;  %1742 = vmatprep.mubr.bf16.mxu1 %v1379_v9  ;;  %v656_v9 = vmul.f32 %v5685_v58, %v9735_v38  ;;  %v657_v13 = vmul.f32 %v5676_v55, %v9735_v38 }
 0x18c   : > { %1743 = vmatmul.mubr.bf16.gmra.mrb[16].mxu1 %v1378_v2 }
 0x18d   : > { %v928_v17 = vadd.f32 %v864_v32, %v654_v40  ;;  %v929_v53 = vadd.f32 %v865_v49, %v655_v19 }
 0x18e   : > { %v776_v39 = vpop.permute.xlu1 %775 }
 0x18f   : > { %v866_v43 = vmul.f32 %v5682_v57, %v776_v39  ;;  %v867_v15 = vmul.f32 %v5673_v54, %v776_v39  ;;  %v1202_v62 = vadd.f32 %v1138_v0, %v928_v17  ;;  %v1203_v2 = vadd.f32 %v1139_v28, %v929_v53 }
 0x191   : > { %v930_v32 = vadd.f32 %v866_v43, %v656_v9  ;;  %v931_v49 = vadd.f32 %v867_v15, %v657_v13  ;;  %v6408_v8 = vadd.f32 %v5721_v11, %v1203_v2  ;;  %v6411_v39 = vadd.f32 %v5725_v26, %v1202_v62 }
 0x193   : > { %v1050_v46 = vpop.permute.xlu1 %1049  ;;  %9736 = vst [vmem:[#allocation11_spill] sm:$0xff] %v6408_v8  ;;  %9737 = vst [vmem:[#allocation28_spill] sm:$0xff] %v6411_v39  ;;  %v9620_v15 = vmax.f32 %v6408_v8, 0.0 }
 0x194   : > { %v1140_v40 = vmul.f32 %v5688_v59, %v1050_v46  ;;  %v1141_v19 = vmul.f32 %v5679_v56, %v1050_v46  ;;  %v9619_v46 = vmax.f32 %v6411_v39, 0.0 }
 0x196   : > { %v1204_v47 = vadd.f32 %v1140_v40, %v930_v32  ;;  %v1205_v18 = vadd.f32 %v1141_v19, %v931_v49  ;;  %v1054_v32 = vpop.permute.xlu0 %1053 }
 0x198   : > { %v566_v42 = vpop.permute.xlu1 %565  ;;  %v6414_v38 = vadd.f32 %v5721_v11, %v1205_v18  ;;  %v6417_v28 = vadd.f32 %v5725_v26, %v1204_v47  ;;  %v1142_v47 = vmul.f32 %v5688_v59, %v1054_v32 }
 0x199   : > { %v658_v62 = vmul.f32 %v5685_v58, %v566_v42  ;;  %v659_v2 = vmul.f32 %v5676_v55, %v566_v42 }
 0x19a   : > { %9738 = vst [vmem:[#allocation29_spill] sm:$0xff] %v6414_v38  ;;  %9739 = vst [vmem:[#allocation30_spill] sm:$0xff] %v6417_v28  ;;  %v9618_v43 = vmax.f32 %v6414_v38, 0.0  ;;  %v9621_v17 = vmax.f32 %v6417_v28, 0.0 }
 0x19c   : > { %v1381_v53 = vpack.c.bf16 %v9618_v43, %v9620_v15  ;;  %v1380_v18 = vpack.c.bf16 %v9621_v17, %v9619_v46  ;;  %v1143_v43 = vmul.f32 %v5679_v56, %v1054_v32  ;;  %v9740_v17 = vld [vmem:[#allocation12_spill] sm:$0xff] }
 0x19d   : > { %v780_v0 = vpop.permute.xlu1 %779 }
 0x19e   : > { %v868_v9 = vmul.f32 %v5682_v57, %v780_v0  ;;  %v869_v13 = vmul.f32 %v5673_v54, %v780_v0  ;;  %1752 = vmatprep.mubr.bf16.mxu1 %v1381_v53  ;;  %v660_v53 = vmul.f32 %v5685_v58, %v9740_v17  ;;  %v661_v0 = vmul.f32 %v5676_v55, %v9740_v17 }
 0x19f   : > { %1753 = vmatmul.mubr.bf16.gmra.mrb[20].mxu1 %v1380_v18 }
 0x1a0   : > { %v932_v49 = vadd.f32 %v868_v9, %v658_v62  ;;  %v933_v40 = vadd.f32 %v869_v13, %v659_v2 }
 0x1a1   : > { %v784_v19 = vpop.permute.xlu1 %783 }
 0x1a2   : > { %v870_v46 = vmul.f32 %v5682_v57, %v784_v19  ;;  %v871_v15 = vmul.f32 %v5673_v54, %v784_v19  ;;  %v1206_v42 = vadd.f32 %v1142_v47, %v932_v49  ;;  %v1207_v18 = vadd.f32 %v1143_v43, %v933_v40 }
 0x1a4   : > { %v934_v9 = vadd.f32 %v870_v46, %v660_v53  ;;  %v935_v13 = vadd.f32 %v871_v15, %v661_v0  ;;  %v6446_v8 = vadd.f32 %v5721_v11, %v1207_v18  ;;  %v6449_v19 = vadd.f32 %v5725_v26, %v1206_v42  ;;  %v1062_v18 = vpop.permute.xlu0 %1061 }
 0x1a6   : > { %v1058_v39 = vpop.permute.xlu1 %1057  ;;  %9741 = vst [vmem:[#allocation12_spill] sm:$0xff] %v6446_v8  ;;  %9742 = vst [vmem:[#allocation31_spill] sm:$0xff] %v6449_v19  ;;  %v9628_v15 = vmax.f32 %v6446_v8, 0.0 }
 0x1a7   : > { %v1144_v62 = vmul.f32 %v5688_v59, %v1058_v39  ;;  %v1145_v2 = vmul.f32 %v5679_v56, %v1058_v39  ;;  %v9626_v39 = vmax.f32 %v6449_v19, 0.0 }
 0x1a9   : > { %v1208_v32 = vadd.f32 %v1144_v62, %v934_v9  ;;  %v1209_v38 = vadd.f32 %v1145_v2, %v935_v13  ;;  %v1418_v62 = vld [vmem:[%s9520_s4] sm:$0x3] }
 0x1ab   : > { %v576_v28 = vpop.permute.xlu1 %575  ;;  %v6452_v17 = vadd.f32 %v5721_v11, %v1209_v38  ;;  %v6455_v43 = vadd.f32 %v5725_v26, %v1208_v32 }
 0x1ac   : > { %v663_v53 = vmul.f32 %v5676_v55, %v576_v28  ;;  %v662_v9 = vmul.f32 %v5685_v58, %v576_v28  ;;  %v9746_v28 = vld [vmem:[#allocation13_spill] sm:$0xff] }
 0x1ad   : > { %9743 = vst [vmem:[#allocation32_spill] sm:$0xff] %v6452_v17  ;;  %9744 = vst [vmem:[#allocation33_spill] sm:$0xff] %v6455_v43  ;;  %v9627_v46 = vmax.f32 %v6452_v17, 0.0  ;;  %v9629_v49 = vmax.f32 %v6455_v43, 0.0 }
 0x1af   : > { %v1383_v40 = vpack.c.bf16 %v9627_v46, %v9628_v15  ;;  %v1382_v38 = vpack.c.bf16 %v9629_v49, %v9626_v39  ;;  %v1147_v39 = vmul.f32 %v5679_v56, %v1062_v18  ;;  %v1146_v15 = vmul.f32 %v5688_v59, %v1062_v18 }
 0x1b0   : > { %v788_v47 = vpop.permute.xlu1 %787 }
 0x1b1   : > { %v872_v0 = vmul.f32 %v5682_v57, %v788_v47  ;;  %v873_v42 = vmul.f32 %v5673_v54, %v788_v47  ;;  %1762 = vmatprep.mubr.bf16.mxu1 %v1383_v40  ;;  %v9745_v40 = vld [vmem:[#allocation6_spill] sm:$0xff] }
 0x1b2   : > { %1763 = vmatmul.mubr.bf16.gmra.mrb[24].mxu1 %v1382_v38  ;;  %v6481_v49 = vrot.slane %v1418_v62, %v9745_v40  ;;  %v664_v38 = vmul.f32 %v5685_v58, %v9746_v28 }
 0x1b3   : > { %v937_v13 = vadd.f32 %v873_v42, %v663_v53  ;;  %v936_v2 = vadd.f32 %v872_v0, %v662_v9  ;;  %v665_v0 = vmul.f32 %v5676_v55, %v9746_v28 }
 0x1b4   : > { %v792_v32 = vpop.permute.xlu1 %791 }
 0x1b5   : > { %v874_v46 = vmul.f32 %v5682_v57, %v792_v32  ;;  %v875_v47 = vmul.f32 %v5673_v54, %v792_v32  ;;  %v1211_v53 = vadd.f32 %v1147_v39, %v937_v13  ;;  %v1210_v9 = vadd.f32 %v1146_v15, %v936_v2 }
 0x1b7   : > { %v938_v17 = vadd.f32 %v874_v46, %v664_v38  ;;  %v939_v43 = vadd.f32 %v875_v47, %v665_v0  ;;  %v6492_v39 = vadd.f32 %v5721_v11, %v1211_v53  ;;  %v6495_v15 = vadd.f32 %v5725_v26, %v1210_v9  ;;  %v9748_v46 = vld [vmem:[#allocation7_spill] sm:$0xff] }
 0x1b8   : > { %v1624_v42 = vpop.f32.mrb[0].mxu0  ;;  %v6498_v2 = vrot.slane %v1418_v62, %v9748_v46 }
 0x1b9   : > { %v1626_v19 = vpop.f32.mrb[1].mxu0  ;;  %v1066_v8 = vpop.permute.xlu1 %1065  ;;  %9747 = vst [vmem:[#allocation13_spill] sm:$0xff] %v6495_v15  ;;  %v9637_v0 = vmax.f32 %v6495_v15, 0.0 }
 0x1ba   : > { %v1628_v57 = vpop.f32.mrb[2].mxu0  ;;  %v1627_v18 = vadd.f32 %v1626_v19, %v6481_v49  ;;  %v1148_v54 = vmul.f32 %v5688_v59, %v1066_v8  ;;  %v1149_v32 = vmul.f32 %v5679_v56, %v1066_v8  ;;  %v1625_v9 = vadd.f32 %v1624_v42, %v6498_v2 }
 0x1bb   : > { %v1630_v40 = vpop.f32.mrb[3].mxu0  ;;  %v1629_v8 = vadd.f32 %v1628_v57, %v6498_v2 }
 0x1bc   : > { %v1631_v58 = vadd.f32 %v1630_v40, %v6481_v49  ;;  %v1212_v13 = vadd.f32 %v1148_v54, %v938_v17  ;;  %v1213_v55 = vadd.f32 %v1149_v32, %v939_v43  ;;  %v1784_v19 = vmax.f32 %v1627_v18, 0.0  ;;  %v9749_v43 = vld [vmem:[#allocation14_spill] sm:$0xff]  ;;  %v9752_v18 = vld [vmem:[#allocation16_spill] sm:$0xff] }
 0x1bd   : > { %v9635_v17 = vmax.f32 %v6492_v39, 0.0  ;;  %v9750_v28 = vmax.f32 %v9749_v43, 0.0  ;;  %v9753_v54 = vmax.f32 %v9752_v18, 0.0  ;;  %v1783_v43 = vmax.f32 %v1625_v9, 0.0  ;;  %v9754_v18 = vld [vmem:[#allocation15_spill] sm:$0xff] }
 0x1be   : > { %v1786_v47 = vmax.f32 %v1631_v58, 0.0  ;;  %v6501_v59 = vadd.f32 %v5721_v11, %v1213_v55  ;;  %v6504_v56 = vadd.f32 %v5725_v26, %v1212_v13 }
 0x1bf   : > { %v6518_v57 = vadd.f32 %v1784_v19, %v9753_v54  ;;  %v9755_v54 = vmax.f32 %v9754_v18, 0.0 }
 0x1c0   : > { %v1634_v40 = vpop.f32.mrb[4].mxu0  ;;  %v6510_v38 = vadd.f32 %v1786_v47, %v9750_v28  ;;  %v9634_v62 = vmax.f32 %v6501_v59, 0.0  ;;  %v9638_v11 = vmax.f32 %v6504_v56, 0.0  ;;  %v1785_v47 = vmax.f32 %v1629_v8, 0.0 }
 0x1c1   : > { %v1636_v53 = vpop.f32.mrb[5].mxu0  ;;  %v9756_v8 = vmax.f32 %v5799_v36, 0.0  ;;  %v1635_v9 = vadd.f32 %v1634_v40, %v6498_v2 }
 0x1c2   : > { %9751 = vst [vmem:[#allocation7_spill] sm:$0xff] %v6510_v38  ;;  %v1638_v26 = vpop.f32.mrb[6].mxu0  ;;  %v1637_v32 = vadd.f32 %v1636_v53, %v6481_v49  ;;  %v1385_v13 = vpack.c.bf16 %v9634_v62, %v9635_v17  ;;  %v1384_v55 = vpack.c.bf16 %v9638_v11, %v9637_v0  ;;  %v1912_v19 = vpack.c.bf16 %v6510_v38, %v6518_v57 }
 0x1c3   : > { %v1640_v58 = vpop.f32.mrb[7].mxu0  ;;  %v6534_v62 = vadd.f32 %v1785_v47, %v9755_v54  ;;  %v1639_v17 = vadd.f32 %v1638_v26, %v6498_v2 }
 0x1c4   : > { %v1641_v42 = vadd.f32 %v1640_v58, %v6481_v49  ;;  %1772 = vmatprep.mubr.bf16.mxu1 %v1385_v13  ;;  %v1788_v53 = vmax.f32 %v1637_v32, 0.0  ;;  %v9757_v13 = vld [vmem:[#allocation17_spill] sm:$0xff] }
 0x1c5   : > { %1773 = vmatmul.mubr.bf16.gmra.mrb[28].mxu1 %v1384_v55  ;;  %v9758_v11 = vmax.f32 %v9757_v13, 0.0  ;;  %v9759_v55 = vmax.f32 %v5829_v30, 0.0  ;;  %v9760_v30 = vmax.f32 %v5802_v5, 0.0 }
 0x1c6   : > { %v1790_v28 = vmax.f32 %v1641_v42, 0.0  ;;  %2179 = vmatprep.mubr.bf16.mxu1 %v1912_v19  ;;  %v1789_v19 = vmax.f32 %v1639_v17, 0.0 }
 0x1c7   : > { %v6543_v38 = vadd.f32 %v1783_v43, %v9758_v11  ;;  %v6548_v42 = vadd.f32 %v1788_v53, %v9759_v55  ;;  %v1787_v43 = vmax.f32 %v1635_v9, 0.0  ;;  %v9762_v55 = vmax.f32 %v5832_v41, 0.0 }
 0x1c8   : > { %v1644_v15 = vpop.f32.mrb[8].mxu0  ;;  %v6539_v0 = vadd.f32 %v1790_v28, %v9756_v8  ;;  %v6558_v53 = vadd.f32 %v1789_v19, %v9760_v30 }
 0x1c9   : > { %v1646_v58 = vpop.f32.mrb[9].mxu0  ;;  %v1911_v36 = vpack.c.bf16 %v6534_v62, %v6543_v38  ;;  %v1645_v9 = vadd.f32 %v1644_v15, %v6498_v2 }
 0x1ca   : > { %v1648_v32 = vpop.f32.mrb[10].mxu0  ;;  %v1647_v47 = vadd.f32 %v1646_v58, %v6481_v49  ;;  %v1914_v11 = vpack.c.bf16 %v6539_v0, %v6548_v42  ;;  %v9761_v58 = vmax.f32 %v5846_v1, 0.0 }
 0x1cb   : > { %v1650_v26 = vpop.f32.mrb[11].mxu0  ;;  %v1649_v54 = vadd.f32 %v1648_v32, %v6498_v2 }
 0x1cc   : > { %v1651_v28 = vadd.f32 %v1650_v26, %v6481_v49  ;;  %v1792_v40 = vmax.f32 %v1647_v47, 0.0  ;;  %v6567_v26 = vadd.f32 %v1787_v43, %v9762_v55  ;;  %v1791_v43 = vmax.f32 %v1645_v9, 0.0 }
 0x1cd   : > { %2180 = vmatmul.mubr.bf16.vlgmr.msra.gmra.mrb[32].mxu1 %v1911_v36  ;;  %v9763_v36 = vmax.f32 %v5853_v34, 0.0  ;;  %v9764_v34 = vmax.f32 %v5899_v44, 0.0 }
 0x1ce   : > { %v1794_v18 = vmax.f32 %v1651_v28, 0.0  ;;  %2189 = vmatprep.mubr.bf16.mxu1 %v1914_v11  ;;  %v1793_v28 = vmax.f32 %v1649_v54, 0.0  ;;  %v1913_v11 = vpack.c.bf16 %v6558_v53, %v6567_v26 }
 0x1cf   : > { %v6572_v5 = vadd.f32 %v1792_v40, %v9763_v36  ;;  %v9766_v36 = vmax.f32 %v5883_v51, 0.0 }
 0x1d0   : > { %v1654_v8 = vpop.f32.mrb[12].mxu0  ;;  %v6563_v17 = vadd.f32 %v1794_v18, %v9761_v58  ;;  %v6582_v40 = vadd.f32 %v1793_v28, %v9764_v34  ;;  %v9765_v58 = vmax.f32 %v5904_v61, 0.0 }
 0x1d1   : > { %v1656_v13 = vpop.f32.mrb[13].mxu0  ;;  %v1655_v9 = vadd.f32 %v1654_v8, %v6498_v2 }
 0x1d2   : > { %v1658_v47 = vpop.f32.mrb[14].mxu0  ;;  %v1657_v19 = vadd.f32 %v1656_v13, %v6481_v49  ;;  %v1916_v41 = vpack.c.bf16 %v6563_v17, %v6572_v5 }
 0x1d3   : > { %v1660_v32 = vpop.f32.mrb[15].mxu0  ;;  %v1659_v30 = vadd.f32 %v1658_v47, %v6498_v2 }
 0x1d4   : > { %v1661_v1 = vadd.f32 %v1660_v32, %v6481_v49  ;;  %v1796_v15 = vmax.f32 %v1657_v19, 0.0  ;;  %v6591_v32 = vadd.f32 %v1791_v43, %v9766_v36  ;;  %v1795_v43 = vmax.f32 %v1655_v9, 0.0 }
 0x1d5   : > { %2190 = vmatmul.mubr.bf16.gmra.mrb[36].mxu1 %v1913_v11  ;;  %v1797_v11 = vmax.f32 %v1659_v30, 0.0 }
 0x1d6   : > { %v1798_v18 = vmax.f32 %v1661_v1, 0.0  ;;  %2199 = vmatprep.mubr.bf16.mxu1 %v1916_v41  ;;  %v9767_v1 = vmax.f32 %v5892_v12, 0.0  ;;  %v1915_v41 = vpack.c.bf16 %v6582_v40, %v6591_v32  ;;  %v9768_v12 = vmax.f32 %v5943_v50, 0.0 }
 0x1d8   : > { %v1664_v54 = vpop.f32.mrb[16].mxu0  ;;  %v6587_v13 = vadd.f32 %v1798_v18, %v9765_v58  ;;  %v6596_v44 = vadd.f32 %v1796_v15, %v9767_v1  ;;  %v6606_v15 = vadd.f32 %v1797_v11, %v9768_v12  ;;  %v9769_v58 = vmax.f32 %v5939_v52, 0.0 }
 0x1d9   : > { %v1666_v55 = vpop.f32.mrb[17].mxu0  ;;  %v9770_v1 = vmax.f32 %v5927_v48, 0.0  ;;  %v1665_v9 = vadd.f32 %v1664_v54, %v6498_v2 }
 0x1da   : > { %v1668_v19 = vpop.f32.mrb[18].mxu0  ;;  %v1667_v28 = vadd.f32 %v1666_v55, %v6481_v49  ;;  %v1918_v51 = vpack.c.bf16 %v6587_v13, %v6596_v44 }
 0x1db   : > { %v1670_v47 = vpop.f32.mrb[19].mxu0  ;;  %v1669_v34 = vadd.f32 %v1668_v19, %v6498_v2 }
 0x1dc   : > { %v1671_v61 = vadd.f32 %v1670_v47, %v6481_v49  ;;  %v1800_v8 = vmax.f32 %v1667_v28, 0.0  ;;  %v6615_v47 = vadd.f32 %v1795_v43, %v9770_v1  ;;  %v1799_v43 = vmax.f32 %v1665_v9, 0.0 }
 0x1dd   : > { %2200 = vmatmul.mubr.bf16.gmra.mrb[40].mxu1 %v1915_v41  ;;  %v1801_v41 = vmax.f32 %v1669_v34, 0.0  ;;  %v9773_v34 = vmax.f32 %v5985_v14, 0.0  ;;  %v5040_v14 = vld [vmem:[%s9523_s7] ss:$8 sps:$4 sm:$0xff]  }
 0x1de   : > { %v1802_v18 = vmax.f32 %v1671_v61, 0.0  ;;  %2209 = vmatprep.mubr.bf16.mxu1 %v1918_v51  ;;  %v9771_v61 = vmax.f32 %v5936_v7, 0.0  ;;  %v1917_v51 = vpack.c.bf16 %v6606_v15, %v6615_v47  ;;  %v9772_v7 = vmax.f32 %v5968_v63, 0.0 }
 0x1e0   : > { %v1674_v30 = vpop.f32.mrb[20].mxu0  ;;  %v6611_v55 = vadd.f32 %v1802_v18, %v9769_v58  ;;  %v6620_v50 = vadd.f32 %v1800_v8, %v9771_v61  ;;  %v6630_v8 = vadd.f32 %v1801_v41, %v9772_v7  ;;  %v9775_v61 = vmax.f32 %v5981_v27, 0.0  ;;  %v5045_v27 = vld [vmem:[%s9523_s7 + $0x14] ss:$8 sps:$4 sm:$0xff]  }
 0x1e1   : > { %v1676_v36 = vpop.f32.mrb[21].mxu0  ;;  %v1675_v9 = vadd.f32 %v1674_v30, %v6498_v2 }
 0x1e2   : > { %v1678_v28 = vpop.f32.mrb[22].mxu0  ;;  %v1677_v11 = vadd.f32 %v1676_v36, %v6481_v49  ;;  %v1920_v48 = vpack.c.bf16 %v6611_v55, %v6620_v50  ;;  %v9774_v36 = vmax.f32 %v5959_v22, 0.0  ;;  %v5042_v22 = vld [vmem:[%s9523_s7 + $0x4] ss:$8 sps:$4 sm:$0xff]  }
 0x1e3   : > { %v1680_v19 = vpop.f32.mrb[23].mxu0  ;;  %v1679_v12 = vadd.f32 %v1678_v28, %v6498_v2  ;;  %v1803_v30 = vmax.f32 %v1675_v9, 0.0  ;;  %2704 = vmatprep.subr.bf16.mxu0 %v5042_v22  ;;  %v9778_v22 = vmax.f32 %v6033_v21, 0.0  ;;  %v5046_v21 = vld [vmem:[%s9523_s7 + $0x20] ss:$8 sps:$4 sm:$0xff]  }
 0x1e4   : > { %v1681_v52 = vadd.f32 %v1680_v19, %v6481_v49  ;;  %v1804_v54 = vmax.f32 %v1677_v11, 0.0  ;;  %v6639_v1 = vadd.f32 %v1799_v43, %v9774_v36  ;;  %2705 = vmatpush1.bf16.msra.mxu0 %v5040_v14 }
 0x1e5   : > { %2210 = vmatmul.mubr.bf16.gmra.mrb[44].mxu1 %v1917_v51  ;;  %v1805_v19 = vmax.f32 %v1679_v12, 0.0  ;;  %v9776_v51 = vmax.f32 %v5995_v16, 0.0  ;;  %2706 = vmatprep.subr.bf16.mxu0 %v5045_v27  ;;  %v9780_v27 = vmax.f32 %v6043_v23, 0.0  ;;  %v5049_v23 = vld [vmem:[%s9523_s7 + $0x30] ss:$8 sps:$4 sm:$0xff]  }
 0x1e6   : > { %v1806_v18 = vmax.f32 %v1681_v52, 0.0  ;;  %2219 = vmatprep.mubr.bf16.mxu1 %v1920_v48  ;;  %v6644_v11 = vadd.f32 %v1804_v54, %v9775_v61  ;;  %v1919_v63 = vpack.c.bf16 %v6630_v8, %v6639_v1  ;;  %v5043_v54 = vld [vmem:[%s9523_s7 + $0x10] ss:$8 sps:$4 sm:$0xff]  }
 0x1e7   : > { %v6661_v48 = vadd.f32 %v1805_v19, %v9776_v51 }
 0x1e8   : > { %v6635_v58 = vadd.f32 %v1806_v18, %v9773_v34  ;;  %v9777_v34 = vmax.f32 %v6002_v37, 0.0  ;;  %2707 = vmatpush1.bf16.msra.mxu0 %v5043_v54  ;;  %v9779_v37 = vmax.f32 %v6040_v31, 0.0  ;;  %v9781_v31 = vmax.f32 %v6036_v6, 0.0  ;;  %v5051_v54 = vld [vmem:[%s9523_s7 + $0x34] ss:$8 sps:$4 sm:$0xff]  }
 0x1e9   : > { %v5052_v6 = vld [vmem:[%s9523_s7 + $0x40] ss:$8 sps:$4 sm:$0xff]  }
 0x1ea   : > { %v1922_v28 = vpack.c.bf16 %v6635_v58, %v6644_v11  ;;  %v6670_v36 = vadd.f32 %v1803_v30, %v9777_v34  ;;  %v5057_v34 = vld [vmem:[%s9523_s7 + $0x54] ss:$8 sps:$4 sm:$0xff]  }
 0x1ed   : > { %v1684_v41 = vpop.f32.mrb[24].mxu0  ;;  %2220 = vmatmul.mubr.bf16.gmra.mrb[48].mxu1 %v1919_v63 }
 0x1ee   : > { %v1686_v52 = vpop.f32.mrb[25].mxu0  ;;  %2229 = vmatprep.mubr.bf16.mxu1 %v1922_v28  ;;  %v1685_v16 = vadd.f32 %v1684_v41, %v6498_v2  ;;  %v1921_v28 = vpack.c.bf16 %v6661_v48, %v6670_v36  ;;  %v5048_v41 = vld [vmem:[%s9523_s7 + $0x24] ss:$8 sps:$4 sm:$0xff]  }
 0x1ef   : > { %v1687_v43 = vadd.f32 %v1686_v52, %v6481_v49  ;;  %v1688_v18 = vpop.f32.mrb[26].mxu0  ;;  %2708 = vmatprep.subr.bf16.mxu0 %v5048_v41 }
 0x1f0   : > { %v1689_v7 = vadd.f32 %v1688_v18, %v6498_v2  ;;  %v1690_v12 = vpop.f32.mrb[27].mxu0  ;;  %v1807_v14 = vmax.f32 %v1685_v16, 0.0  ;;  %2709 = vmatpush1.bf16.msra.mxu0 %v5046_v21 }
 0x1f1   : > { %v1808_v9 = vmax.f32 %v1687_v43, 0.0  ;;  %v1691_v61 = vadd.f32 %v1690_v12, %v6481_v49  ;;  %v5054_v12 = vld [vmem:[%s9523_s7 + $0x44] ss:$8 sps:$4 sm:$0xff]   ;;  %2710 = vmatprep.subr.bf16.mxu0 %v5051_v54  ;;  %v9782_v54 = vmax.f32 %v6088_v20, 0.0  ;;  %v5063_v20 = vld [vmem:[%s9523_s7 + $0x74] ss:$8 sps:$4 sm:$0xff]  }
 0x1f2   : > { %v1809_v19 = vmax.f32 %v1689_v7, 0.0  ;;  %v6698_v18 = vadd.f32 %v1807_v14, %v9781_v31  ;;  %v5060_v14 = vld [vmem:[%s9523_s7 + $0x64] ss:$8 sps:$4 sm:$0xff]   ;;  %v5058_v31 = vld [vmem:[%s9523_s7 + $0x60] ss:$8 sps:$4 sm:$0xff]  }
 0x1f3   : > { %v1810_v63 = vmax.f32 %v1691_v61, 0.0  ;;  %v6678_v52 = vadd.f32 %v1808_v9, %v9778_v22 }
 0x1f4   : > { %v6689_v51 = vadd.f32 %v1809_v19, %v9780_v27  ;;  %2711 = vmatpush1.bf16.msra.mxu0 %v5049_v23  ;;  %v5055_v19 = vld [vmem:[%s9523_s7 + $0x50] ss:$8 sps:$4 sm:$0xff]  }
 0x1f5   : > { %v6682_v30 = vadd.f32 %v1810_v63, %v9779_v37  ;;  %2230 = vmatmul.mubr.bf16.gmra.mrb[52].mxu1 %v1921_v28  ;;  %2712 = vmatprep.subr.bf16.mxu0 %v5054_v12  ;;  %v9783_v12 = vmax.f32 %v6078_v3, 0.0 }
 0x1f6   : > { %v1923_v7 = vpack.c.bf16 %v6689_v51, %v6698_v18 }
 0x1f7   : > { %v1924_v43 = vpack.c.bf16 %v6682_v30, %v6678_v52 }
 0x1f8   : > { %2713 = vmatpush1.bf16.msra.mxu0 %v5052_v6 }
 0x1f9   : > { %2239 = vmatprep.mubr.bf16.mxu1 %v1924_v43  ;;  %2714 = vmatprep.subr.bf16.mxu0 %v5057_v34  ;;  %v9784_v34 = vmax.f32 %v6085_v35, 0.0  ;;  %v5061_v35 = vld [vmem:[%s9523_s7 + $0x70] ss:$8 sps:$4 sm:$0xff]  }
 0x1fc   : > { %2715 = vmatpush1.bf16.msra.mxu0 %v5055_v19 }
 0x1fd   : > { %2240 = vmatmul.mubr.bf16.gmra.mrb[56].mxu1 %v1923_v7  ;;  %2716 = vmatprep.subr.bf16.mxu0 %v5060_v14  ;;  %v5067_v14 = vld [vmem:[%s9523_s7 + $0x90] ss:$8 sps:$4 sm:$0xff]  }
 0x200   : > { %v1694_v16 = vpop.f32.mrb[28].mxu0  ;;  %2717 = vmatpush1.bf16.msra.mxu0 %v5058_v31  ;;  %v5070_v31 = vld [vmem:[%s9523_s7 + $0xa0] ss:$8 sps:$4 sm:$0xff]  }
 0x201   : > { %v1695_v9 = vadd.f32 %v1694_v16, %v6498_v2  ;;  %v1696_v61 = vpop.f32.mrb[29].mxu0  ;;  %2718 = vmatprep.subr.bf16.mxu0 %v5063_v20 }
 0x202   : > { %v1697_v63 = vadd.f32 %v1696_v61, %v6481_v49  ;;  %v1698_v28 = vpop.f32.mrb[30].mxu0 }
 0x203   : > { %v1699_v22 = vadd.f32 %v1698_v28, %v6498_v2  ;;  %v1700_v37 = vpop.f32.mrb[31].mxu0  ;;  %v1811_v43 = vmax.f32 %v1695_v9, 0.0  ;;  %v9785_v9 = vmax.f32 %v6081_v33, 0.0  ;;  %v5064_v33 = vld [vmem:[%s9523_s7 + $0x80] ss:$8 sps:$4 sm:$0xff]  }
 0x204   : > { %v1812_v41 = vmax.f32 %v1697_v63, 0.0  ;;  %v1701_v27 = vadd.f32 %v1700_v37, %v6481_v49  ;;  %2719 = vmatpush1.bf16.msra.mxu0 %v5061_v35  ;;  %v5066_v63 = vld [vmem:[%s9523_s7 + $0x84] ss:$8 sps:$4 sm:$0xff]   ;;  %v5069_v28 = vld [vmem:[%s9523_s7 + $0x94] ss:$8 sps:$4 sm:$0xff]  }
 0x205   : > { %v1813_v21 = vmax.f32 %v1699_v22, 0.0  ;;  %v6744_v61 = vadd.f32 %v1811_v43, %v9785_v9  ;;  %2720 = vmatprep.subr.bf16.mxu0 %v5066_v63  ;;  %v5072_v22 = vld [vmem:[%s9523_s7 + $0xa4] ss:$8 sps:$4 sm:$0xff]   ;;  %v9787_v63 = vmax.f32 %v6123_v4, 0.0 }
 0x206   : > { %v1814_v23 = vmax.f32 %v1701_v27, 0.0  ;;  %v6736_v6 = vadd.f32 %v1812_v41, %v9783_v12 }
 0x207   : > { %v6732_v7 = vadd.f32 %v1813_v21, %v9782_v54 }
 0x208   : > { %v6740_v16 = vadd.f32 %v1814_v23, %v9784_v34  ;;  %2721 = vmatpush1.bf16.msra.mxu0 %v5064_v33  ;;  %v5075_v33 = vld [vmem:[%s9523_s7 + $0xb4] ss:$8 sps:$4 sm:$0xff]  }
 0x209   : > { %v1925_v3 = vpack.c.bf16 %v6732_v7, %v6744_v61  ;;  %2722 = vmatprep.subr.bf16.mxu0 %v5069_v28 }
 0x20a   : > { %v1926_v19 = vpack.c.bf16 %v6740_v16, %v6736_v6 }
 0x20c   : > { %2249 = vmatprep.mubr.bf16.mxu1 %v1926_v19  ;;  %2723 = vmatpush1.bf16.msra.mxu0 %v5067_v14  ;;  %v9788_v14 = vmax.f32 %v6130_v29, 0.0  ;;  %v5078_v29 = vld [vmem:[%s9523_s7 + $0xc4] ss:$8 sps:$4 sm:$0xff]  }
 0x20d   : > { %2250 = vmatmul.mubr.bf16.gmra.mrb[60].mxu1 %v1925_v3  ;;  %2724 = vmatprep.subr.bf16.mxu0 %v5072_v22  ;;  %v9786_v3 = vmax.f32 %v6133_v10, 0.0  ;;  %v9789_v10 = vmax.f32 %v6126_v25, 0.0  ;;  %v5081_v25 = vld [vmem:[%s9523_s7 + $0xd4] ss:$8 sps:$4 sm:$0xff]  }
 0x210   : > { %2725 = vmatpush1.bf16.msra.mxu0 %v5070_v31 }
 0x211   : > { %2726 = vmatprep.subr.bf16.mxu0 %v5075_v33 }
 0x213   : > { %v1704_v37 = vpop.f32.mrb[0].mxu1 }
 0x214   : > { %v1705_v41 = vadd.f32 %v1704_v37, %v6498_v2  ;;  %v1706_v27 = vpop.f32.mrb[1].mxu1  ;;  %v5073_v37 = vld [vmem:[%s9523_s7 + $0xb0] ss:$8 sps:$4 sm:$0xff]  }
 0x215   : > { %v1707_v43 = vadd.f32 %v1706_v27, %v6481_v49  ;;  %v1708_v21 = vpop.f32.mrb[2].mxu1  ;;  %2727 = vmatpush1.bf16.msra.mxu0 %v5073_v37 }
 0x216   : > { %v1709_v23 = vadd.f32 %v1708_v21, %v6498_v2  ;;  %v1710_v54 = vpop.f32.mrb[3].mxu1  ;;  %v1815_v9 = vmax.f32 %v1705_v41, 0.0  ;;  %2728 = vmatprep.subr.bf16.mxu0 %v5078_v29  ;;  %v5079_v21 = vld [vmem:[%s9523_s7 + $0xd0] ss:$8 sps:$4 sm:$0xff]   ;;  %v9790_v29 = vmax.f32 %v6196_v45, 0.0 }
 0x217   : > { %v1816_v12 = vmax.f32 %v1707_v43, 0.0  ;;  %v1711_v34 = vadd.f32 %v1710_v54, %v6481_v49  ;;  %v5076_v43 = vld [vmem:[%s9523_s7 + $0xc0] ss:$8 sps:$4 sm:$0xff]  }
 0x218   : > { %v1817_v19 = vmax.f32 %v1709_v23, 0.0  ;;  %v6798_v41 = vadd.f32 %v1815_v9, %v9789_v10  ;;  %v5084_v23 = vld [vmem:[%s9523_s7 + $0xe4] ss:$8 sps:$4 sm:$0xff]  }
 0x219   : > { %v1818_v20 = vmax.f32 %v1711_v34, 0.0  ;;  %v6787_v28 = vadd.f32 %v1816_v12, %v9787_v63  ;;  %2729 = vmatpush1.bf16.msra.mxu0 %v5076_v43  ;;  %v5082_v34 = vld [vmem:[%s9523_s7 + $0xe0] ss:$8 sps:$4 sm:$0xff]  }
 0x21a   : > { %v6780_v35 = vadd.f32 %v1817_v19, %v9786_v3  ;;  %2730 = vmatprep.subr.bf16.mxu0 %v5081_v25  ;;  %v9791_v25 = vmax.f32 %v6184_v60, 0.0 }
 0x21b   : > { %v6791_v22 = vadd.f32 %v1818_v20, %v9788_v14  ;;  %v5087_v14 = vld [vmem:[%s9523_s7 + $0xf4] ss:$8 sps:$4 sm:$0xff]  }
 0x21c   : > { %v1927_v4 = vpack.c.bf16 %v6780_v35, %v6798_v41 }
 0x21d   : > { %v1928_v27 = vpack.c.bf16 %v6791_v22, %v6787_v28  ;;  %2731 = vmatpush1.bf16.msra.mxu0 %v5079_v21 }
 0x21e   : > { %2732 = vmatprep.subr.bf16.mxu0 %v5084_v23 }
 0x21f   : > { %2259 = vmatprep.mubr.bf16.mxu1 %v1928_v27  ;;  %v5085_v27 = vld [vmem:[%s9523_s7 + $0xf0] ss:$8 sps:$4 sm:$0xff]  }
 0x220   : > { %2260 = vmatmul.mubr.bf16.gmra.mrb[64].mxu1 %v1927_v4 }
 0x221   : > { %2733 = vmatpush1.bf16.msra.mxu0 %v5082_v34 }
 0x222   : > { %2734 = vmatprep.subr.bf16.mxu0 %v5087_v14 }
 0x225   : > { %2735 = vmatpush1.bf16.msra.mxu0 %v5085_v27 }
 0x226   : > { %v1714_v31 = vpop.f32.mrb[4].mxu1 }
 0x227   : > { %v1715_v54 = vadd.f32 %v1714_v31, %v6498_v2  ;;  %v1716_v12 = vpop.f32.mrb[5].mxu1  ;;  %v9792_v31 = vmax.f32 %v6193_v24, 0.0 }
 0x228   : > { %v1717_v9 = vadd.f32 %v1716_v12, %v6481_v49  ;;  %v1718_v19 = vpop.f32.mrb[6].mxu1 }
 0x229   : > { %v1719_v20 = vadd.f32 %v1718_v19, %v6498_v2  ;;  %v1720_v3 = vpop.f32.mrb[7].mxu1  ;;  %v1819_v37 = vmax.f32 %v1715_v54, 0.0  ;;  %v9793_v54 = vld [vmem:[#allocation18_spill] sm:$0xff] }
 0x22a   : > { %v1820_v33 = vmax.f32 %v1717_v9, 0.0  ;;  %v1721_v63 = vadd.f32 %v1720_v3, %v6481_v49  ;;  %v9794_v12 = vmax.f32 %v9793_v54, 0.0  ;;  %v9799_v54 = vld [vmem:[#allocation3_spill] sm:$0xff] }
 0x22b   : > { %v1821_v10 = vmax.f32 %v1719_v20, 0.0 }
 0x22c   : > { %v1822_v4 = vmax.f32 %v1721_v63, 0.0  ;;  %v6838_v21 = vadd.f32 %v1820_v33, %v9791_v25  ;;  %v6846_v34 = vadd.f32 %v1819_v37, %v9794_v12  ;;  %v9800_v12 = vmax.f32 %v9799_v54, 0.0 }
 0x22d   : > { %v6834_v43 = vadd.f32 %v1821_v10, %v9790_v29  ;;  %v9796_v29 = vld [vmem:[#allocation21_spill] sm:$0xff] }
 0x22e   : > { %v6842_v23 = vadd.f32 %v1822_v4, %v9792_v31  ;;  %9795 = vst [vmem:[#allocation14_spill] sm:$0xff] %v6846_v34  ;;  %v9797_v25 = vmax.f32 %v9796_v29, 0.0 }
 0x22f   : > { %v1929_v45 = vpack.c.bf16 %v6834_v43, %v6846_v34 }
 0x230   : > { %v1930_v9 = vpack.c.bf16 %v6842_v23, %v6838_v21 }
 0x232   : > { %2269 = vmatprep.mubr.bf16.mxu1 %v1930_v9 }
 0x233   : > { %2270 = vmatmul.mubr.bf16.gmra.mrb[68].mxu1 %v1929_v45  ;;  %v9802_v45 = vld [vmem:[#allocation20_spill] sm:$0xff] }
 0x239   : > { %v1724_v19 = vpop.f32.mrb[8].mxu1 }
 0x23a   : > { %v1725_v60 = vadd.f32 %v1724_v19, %v6498_v2  ;;  %v1726_v20 = vpop.f32.mrb[9].mxu1  ;;  %v9803_v19 = vmax.f32 %v9802_v45, 0.0 }
 0x23b   : > { %v1727_v24 = vadd.f32 %v1726_v20, %v6481_v49  ;;  %v1728_v3 = vpop.f32.mrb[10].mxu1 }
 0x23c   : > { %v1729_v33 = vadd.f32 %v1728_v3, %v6498_v2  ;;  %v1730_v63 = vpop.f32.mrb[11].mxu1  ;;  %v1823_v10 = vmax.f32 %v1725_v60, 0.0  ;;  %v9805_v3 = vld [vmem:[#allocation19_spill] sm:$0xff] }
 0x23d   : > { %v1824_v14 = vmax.f32 %v1727_v24, 0.0  ;;  %v1731_v37 = vadd.f32 %v1730_v63, %v6481_v49  ;;  %v9806_v34 = vmax.f32 %v9805_v3, 0.0 }
 0x23e   : > { %v1825_v27 = vmax.f32 %v1729_v33, 0.0 }
 0x23f   : > { %v1826_v4 = vmax.f32 %v1731_v37, 0.0  ;;  %v6862_v9 = vadd.f32 %v1824_v14, %v9800_v12  ;;  %v6870_v24 = vadd.f32 %v1823_v10, %v9806_v34 }
 0x240   : > { %v6858_v31 = vadd.f32 %v1825_v27, %v9797_v25 }
 0x241   : > { %9801 = vst [vmem:[#allocation15_spill] sm:$0xff] %v6862_v9  ;;  %v6866_v20 = vadd.f32 %v1826_v4, %v9803_v19  ;;  %9807 = vst [vmem:[#allocation18_spill] sm:$0xff] %v6870_v24  ;;  %v9808_v19 = vld [vmem:[#allocation24_spill] sm:$0xff] }
 0x242   : > { %9798 = vst [vmem:[#allocation16_spill] sm:$0xff] %v6858_v31  ;;  %v1931_v33 = vpack.c.bf16 %v6858_v31, %v6870_v24  ;;  %v9809_v3 = vmax.f32 %v9808_v19, 0.0 }
 0x243   : > { %9804 = vst [vmem:[#allocation17_spill] sm:$0xff] %v6866_v20  ;;  %v1932_v60 = vpack.c.bf16 %v6866_v20, %v6862_v9  ;;  %v9814_v20 = vld [vmem:[#allocation23_spill] sm:$0xff] }
 0x245   : > { %2279 = vmatprep.mubr.bf16.mxu1 %v1932_v60 }
 0x246   : > { %2280 = vmatmul.mubr.bf16.gmra.mrb[72].mxu1 %v1931_v33  ;;  %v9811_v33 = vld [vmem:[#allocation9_spill] sm:$0xff] }
 0x247   : > { %v9812_v24 = vmax.f32 %v9811_v33, 0.0 }
 0x24c   : > { %v1734_v63 = vpop.f32.mrb[12].mxu1 }
 0x24d   : > { %v1735_v14 = vadd.f32 %v1734_v63, %v6498_v2  ;;  %v1736_v37 = vpop.f32.mrb[13].mxu1 }
 0x24e   : > { %v1737_v27 = vadd.f32 %v1736_v37, %v6481_v49  ;;  %v1738_v4 = vpop.f32.mrb[14].mxu1  ;;  %v9815_v37 = vmax.f32 %v9814_v20, 0.0 }
 0x24f   : > { %v1739_v29 = vadd.f32 %v1738_v4, %v6498_v2  ;;  %v1740_v25 = vpop.f32.mrb[15].mxu1  ;;  %v1827_v54 = vmax.f32 %v1735_v14, 0.0  ;;  %v9817_v4 = vld [vmem:[#allocation22_spill] sm:$0xff] }
 0x250   : > { %v1828_v34 = vmax.f32 %v1737_v27, 0.0  ;;  %v1741_v10 = vadd.f32 %v1740_v25, %v6481_v49  ;;  %v9818_v31 = vmax.f32 %v9817_v4, 0.0 }
 0x251   : > { %v1829_v12 = vmax.f32 %v1739_v29, 0.0 }
 0x252   : > { %v1830_v45 = vmax.f32 %v1741_v10, 0.0  ;;  %v6886_v63 = vadd.f32 %v1828_v34, %v9812_v24  ;;  %v6894_v27 = vadd.f32 %v1827_v54, %v9818_v31 }
 0x253   : > { %v6882_v60 = vadd.f32 %v1829_v12, %v9809_v3 }
 0x254   : > { %9813 = vst [vmem:[#allocation3_spill] sm:$0xff] %v6886_v63  ;;  %v6890_v9 = vadd.f32 %v1830_v45, %v9815_v37  ;;  %9819 = vst [vmem:[#allocation19_spill] sm:$0xff] %v6894_v27  ;;  %v9820_v37 = vld [vmem:[#allocation27_spill] sm:$0xff] }
 0x255   : > { %9810 = vst [vmem:[#allocation21_spill] sm:$0xff] %v6882_v60  ;;  %v1933_v29 = vpack.c.bf16 %v6882_v60, %v6894_v27  ;;  %v9821_v4 = vmax.f32 %v9820_v37, 0.0 }
 0x256   : > { %9816 = vst [vmem:[#allocation20_spill] sm:$0xff] %v6890_v9  ;;  %v1934_v14 = vpack.c.bf16 %v6890_v9, %v6886_v63  ;;  %v9826_v9 = vld [vmem:[#allocation26_spill] sm:$0xff] }
 0x258   : > { %2289 = vmatprep.mubr.bf16.mxu1 %v1934_v14 }
 0x259   : > { %2290 = vmatmul.mubr.bf16.gmra.mrb[76].mxu1 %v1933_v29  ;;  %v9823_v29 = vld [vmem:[#allocation10_spill] sm:$0xff] }
 0x25a   : > { %v9824_v27 = vmax.f32 %v9823_v29, 0.0 }
 0x25f   : > { %v1744_v25 = vpop.f32.mrb[16].mxu1 }
 0x260   : > { %v1745_v24 = vadd.f32 %v1744_v25, %v6498_v2  ;;  %v1746_v34 = vpop.f32.mrb[17].mxu1 }
 0x261   : > { %v1747_v20 = vadd.f32 %v1746_v34, %v6481_v49  ;;  %v1748_v10 = vpop.f32.mrb[18].mxu1  ;;  %v9827_v34 = vmax.f32 %v9826_v9, 0.0 }
 0x262   : > { %v1749_v12 = vadd.f32 %v1748_v10, %v6498_v2  ;;  %v1750_v45 = vpop.f32.mrb[19].mxu1  ;;  %v1831_v19 = vmax.f32 %v1745_v24, 0.0  ;;  %v9829_v10 = vld [vmem:[#allocation25_spill] sm:$0xff] }
 0x263   : > { %v1832_v31 = vmax.f32 %v1747_v20, 0.0  ;;  %v1751_v54 = vadd.f32 %v1750_v45, %v6481_v49  ;;  %v9830_v60 = vmax.f32 %v9829_v10, 0.0 }
 0x264   : > { %v1833_v3 = vmax.f32 %v1749_v12, 0.0 }
 0x265   : > { %v1834_v33 = vmax.f32 %v1751_v54, 0.0  ;;  %v6910_v25 = vadd.f32 %v1832_v31, %v9824_v27  ;;  %v6918_v20 = vadd.f32 %v1831_v19, %v9830_v60 }
 0x266   : > { %v6906_v14 = vadd.f32 %v1833_v3, %v9821_v4 }
 0x267   : > { %9825 = vst [vmem:[#allocation9_spill] sm:$0xff] %v6910_v25  ;;  %v6914_v63 = vadd.f32 %v1834_v33, %v9827_v34  ;;  %9831 = vst [vmem:[#allocation22_spill] sm:$0xff] %v6918_v20  ;;  %v9832_v34 = vld [vmem:[#allocation30_spill] sm:$0xff] }
 0x268   : > { %9822 = vst [vmem:[#allocation24_spill] sm:$0xff] %v6906_v14  ;;  %v1935_v12 = vpack.c.bf16 %v6906_v14, %v6918_v20  ;;  %v9833_v10 = vmax.f32 %v9832_v34, 0.0 }
 0x269   : > { %9828 = vst [vmem:[#allocation23_spill] sm:$0xff] %v6914_v63  ;;  %v1936_v24 = vpack.c.bf16 %v6914_v63, %v6910_v25  ;;  %v9838_v63 = vld [vmem:[#allocation29_spill] sm:$0xff] }
 0x26b   : > { %2299 = vmatprep.mubr.bf16.mxu1 %v1936_v24 }
 0x26c   : > { %2300 = vmatmul.mubr.bf16.gmra.mrb[80].mxu1 %v1935_v12  ;;  %v9835_v12 = vld [vmem:[#allocation11_spill] sm:$0xff] }
 0x26d   : > { %v9836_v20 = vmax.f32 %v9835_v12, 0.0 }
 0x272   : > { %v1754_v45 = vpop.f32.mrb[20].mxu1 }
 0x273   : > { %v1755_v27 = vadd.f32 %v1754_v45, %v6498_v2  ;;  %v1756_v31 = vpop.f32.mrb[21].mxu1 }
 0x274   : > { %v1757_v9 = vadd.f32 %v1756_v31, %v6481_v49  ;;  %v1758_v54 = vpop.f32.mrb[22].mxu1  ;;  %v9839_v31 = vmax.f32 %v9838_v63, 0.0 }
 0x275   : > { %v1759_v3 = vadd.f32 %v1758_v54, %v6498_v2  ;;  %v1760_v33 = vpop.f32.mrb[23].mxu1  ;;  %v1835_v37 = vmax.f32 %v1755_v27, 0.0  ;;  %v9841_v54 = vld [vmem:[#allocation28_spill] sm:$0xff] }
 0x276   : > { %v1836_v60 = vmax.f32 %v1757_v9, 0.0  ;;  %v1761_v19 = vadd.f32 %v1760_v33, %v6481_v49  ;;  %v9842_v14 = vmax.f32 %v9841_v54, 0.0 }
 0x277   : > { %v1837_v4 = vmax.f32 %v1759_v3, 0.0 }
 0x278   : > { %v1838_v29 = vmax.f32 %v1761_v19, 0.0  ;;  %v6934_v45 = vadd.f32 %v1836_v60, %v9836_v20  ;;  %v6942_v9 = vadd.f32 %v1835_v37, %v9842_v14 }
 0x279   : > { %v6930_v24 = vadd.f32 %v1837_v4, %v9833_v10 }
 0x27a   : > { %9837 = vst [vmem:[#allocation10_spill] sm:$0xff] %v6934_v45  ;;  %v6938_v25 = vadd.f32 %v1838_v29, %v9839_v31  ;;  %9843 = vst [vmem:[#allocation25_spill] sm:$0xff] %v6942_v9  ;;  %v9844_v31 = vld [vmem:[#allocation33_spill] sm:$0xff] }
 0x27b   : > { %9834 = vst [vmem:[#allocation27_spill] sm:$0xff] %v6930_v24  ;;  %v1937_v3 = vpack.c.bf16 %v6930_v24, %v6942_v9  ;;  %v9845_v54 = vmax.f32 %v9844_v31, 0.0 }
 0x27c   : > { %9840 = vst [vmem:[#allocation26_spill] sm:$0xff] %v6938_v25  ;;  %v1938_v27 = vpack.c.bf16 %v6938_v25, %v6934_v45  ;;  %v9848_v25 = vld [vmem:[#allocation32_spill] sm:$0xff] }
 0x27e   : > { %2309 = vmatprep.mubr.bf16.mxu1 %v1938_v27 }
 0x27f   : > { %2310 = vmatmul.mubr.bf16.gmra.mrb[84].mxu1 %v1937_v3  ;;  %v9846_v3 = vld [vmem:[#allocation12_spill] sm:$0xff] }
 0x280   : > { %v9847_v9 = vmax.f32 %v9846_v3, 0.0 }
 0x285   : > { %v1764_v33 = vpop.f32.mrb[24].mxu1 }
 0x286   : > { %v1765_v20 = vadd.f32 %v1764_v33, %v6498_v2  ;;  %v1766_v60 = vpop.f32.mrb[25].mxu1 }
 0x287   : > { %v1767_v63 = vadd.f32 %v1766_v60, %v6481_v49  ;;  %v1768_v19 = vpop.f32.mrb[26].mxu1  ;;  %v9849_v60 = vmax.f32 %v9848_v25, 0.0 }
 0x288   : > { %v1769_v4 = vadd.f32 %v1768_v19, %v6498_v2  ;;  %v1770_v29 = vpop.f32.mrb[27].mxu1  ;;  %v1839_v34 = vmax.f32 %v1765_v20, 0.0  ;;  %v9850_v19 = vld [vmem:[#allocation31_spill] sm:$0xff] }
 0x289   : > { %v1840_v14 = vmax.f32 %v1767_v63, 0.0  ;;  %v1771_v37 = vadd.f32 %v1770_v29, %v6481_v49  ;;  %v9851_v24 = vmax.f32 %v9850_v19, 0.0 }
 0x28a   : > { %v1841_v10 = vmax.f32 %v1769_v4, 0.0 }
 0x28b   : > { %v1842_v12 = vmax.f32 %v1771_v37, 0.0  ;;  %v6958_v33 = vadd.f32 %v1840_v14, %v9847_v9  ;;  %v6966_v63 = vadd.f32 %v1839_v34, %v9851_v24  ;;  %v1975_v24 = vld [vmem:[%s9522_s6] sm:$0x3] }
 0x28c   : > { %v6954_v27 = vadd.f32 %v1841_v10, %v9845_v54 }
 0x28d   : > { %v6962_v45 = vadd.f32 %v1842_v12, %v9849_v60  ;;  %9852 = vst [vmem:[#allocation30_spill] sm:$0xff] %v6966_v63  ;;  %v6980_v60 = vrot.slane %v1975_v24, %v9748_v46 }
 0x28e   : > { %v1939_v4 = vpack.c.bf16 %v6954_v27, %v6966_v63  ;;  %v9855_v63 = vmax.f32 %v6492_v39, 0.0 }
 0x28f   : > { %v1940_v20 = vpack.c.bf16 %v6962_v45, %v6958_v33 }
 0x291   : > { %2319 = vmatprep.mubr.bf16.mxu1 %v1940_v20  ;;  %v9853_v20 = vld [vmem:[#allocation6_spill] sm:$0xff] }
 0x292   : > { %2320 = vmatmul.mubr.bf16.gmra.mrb[88].mxu1 %v1939_v4  ;;  %v6983_v4 = vrot.slane %v1975_v24, %v9853_v20 }
 0x298   : > { %v1774_v29 = vpop.f32.mrb[28].mxu1 }
 0x299   : > { %v1775_v9 = vadd.f32 %v1774_v29, %v6498_v2  ;;  %v1776_v14 = vpop.f32.mrb[29].mxu1  ;;  %v9854_v29 = vmax.f32 %v6504_v56, 0.0 }
 0x29a   : > { %v1777_v25 = vadd.f32 %v1776_v14, %v6481_v49  ;;  %v1778_v37 = vpop.f32.mrb[30].mxu1 }
 0x29b   : > { %v1779_v34 = vadd.f32 %v1778_v37, %v6498_v2  ;;  %v1780_v10 = vpop.f32.mrb[31].mxu1  ;;  %v1843_v54 = vmax.f32 %v1775_v9, 0.0  ;;  %v9858_v37 = vld [vmem:[#allocation13_spill] sm:$0xff] }
 0x29c   : > { %v1844_v12 = vmax.f32 %v1777_v25, 0.0  ;;  %v1781_v31 = vadd.f32 %v1780_v10, %v6481_v49  ;;  %v9856_v25 = vmax.f32 %v6501_v59, 0.0 }
 0x29d   : > { %v1845_v3 = vmax.f32 %v1779_v34, 0.0  ;;  %v9859_v34 = vmax.f32 %v9858_v37, 0.0 }
 0x29e   : > { %v1846_v19 = vmax.f32 %v1781_v31, 0.0  ;;  %v6991_v2 = vadd.f32 %v1844_v12, %v9855_v63 }
 0x29f   : > { %v6987_v14 = vadd.f32 %v1845_v3, %v9854_v29  ;;  %v6999_v10 = vadd.f32 %v1843_v54, %v9859_v34 }
 0x2a0   : > { %v6995_v49 = vadd.f32 %v1846_v19, %v9856_v25  ;;  %v2181_v9 = vpop.f32.mrb[32].mxu1 }
 0x2a1   : > { %9860 = vst [vmem:[#allocation29_spill] sm:$0xff] %v6999_v10  ;;  %v2182_v24 = vadd.f32 %v2181_v9, %v6980_v60  ;;  %v2183_v31 = vpop.f32.mrb[33].mxu1  ;;  %v1941_v59 = vpack.c.bf16 %v6987_v14, %v6999_v10 }
 0x2a2   : > { %9857 = vst [vmem:[#allocation11_spill] sm:$0xff] %v6995_v49  ;;  %v2184_v56 = vadd.f32 %v2183_v31, %v6983_v4  ;;  %v2185_v3 = vpop.f32.mrb[34].mxu1  ;;  %v1942_v39 = vpack.c.bf16 %v6995_v49, %v6991_v2  ;;  %v9861_v31 = vld [vmem:[#allocation7_spill] sm:$0xff] }
 0x2a3   : > { %v2186_v63 = vadd.f32 %v2185_v3, %v6980_v60  ;;  %v2187_v12 = vpop.f32.mrb[35].mxu1  ;;  %v2340_v54 = vmax.f32 %v2182_v24, 0.0 }
 0x2a4   : > { %v2341_v19 = vmax.f32 %v2184_v56, 0.0  ;;  %v2188_v29 = vadd.f32 %v2187_v12, %v6983_v4  ;;  %2329 = vmatprep.mubr.bf16.mxu1 %v1942_v39 }
 0x2a5   : > { %v2342_v25 = vmax.f32 %v2186_v63, 0.0  ;;  %2330 = vmatmul.mubr.bf16.gmra.mrb[92].mxu1 %v1941_v59  ;;  %v7019_v10 = vadd.f32 %v2340_v54, %v6543_v38 }
 0x2a6   : > { %v2343_v9 = vmax.f32 %v2188_v29, 0.0  ;;  %v7013_v34 = vadd.f32 %v2341_v19, %v6518_v57 }
 0x2a7   : > { %v7010_v37 = vadd.f32 %v2342_v25, %v6534_v62 }
 0x2a8   : > { %v7016_v3 = vadd.f32 %v2343_v9, %v9861_v31  ;;  %v2191_v49 = vpop.f32.mrb[36].mxu1 }
 0x2a9   : > { %v2192_v56 = vadd.f32 %v2191_v49, %v6980_v60  ;;  %v2193_v39 = vpop.f32.mrb[37].mxu1  ;;  %v2468_v57 = vpack.c.bf16 %v7010_v37, %v7019_v10 }
 0x2aa   : > { %v2194_v24 = vadd.f32 %v2193_v39, %v6983_v4  ;;  %v2195_v63 = vpop.f32.mrb[38].mxu1  ;;  %v2469_v62 = vpack.c.bf16 %v7016_v3, %v7013_v34 }
 0x2ab   : > { %v2196_v12 = vadd.f32 %v2195_v63, %v6980_v60  ;;  %v2197_v59 = vpop.f32.mrb[39].mxu1  ;;  %v2344_v38 = vmax.f32 %v2192_v56, 0.0 }
 0x2ac   : > { %v2345_v19 = vmax.f32 %v2194_v24, 0.0  ;;  %v2198_v29 = vadd.f32 %v2197_v59, %v6983_v4  ;;  %2736 = vmatprep.mubr.bf16.mxu0 %v2469_v62 }
 0x2ad   : > { %v2346_v54 = vmax.f32 %v2196_v12, 0.0  ;;  %2737 = vmatmul.mubr.bf16.vlgmr.msra.gmra.mrb[32].mxu0 %v2468_v57  ;;  %v7039_v63 = vadd.f32 %v2344_v38, %v6567_v26 }
 0x2ae   : > { %v2347_v49 = vmax.f32 %v2198_v29, 0.0  ;;  %v7033_v9 = vadd.f32 %v2345_v19, %v6548_v42 }
 0x2af   : > { %v7030_v25 = vadd.f32 %v2346_v54, %v6558_v53 }
 0x2b0   : > { %v7036_v31 = vadd.f32 %v2347_v49, %v6539_v0  ;;  %v2201_v39 = vpop.f32.mrb[40].mxu1 }
 0x2b1   : > { %v2202_v24 = vadd.f32 %v2201_v39, %v6980_v60  ;;  %v2203_v62 = vpop.f32.mrb[41].mxu1  ;;  %v2470_v0 = vpack.c.bf16 %v7030_v25, %v7039_v63 }
 0x2b2   : > { %v2204_v56 = vadd.f32 %v2203_v62, %v6983_v4  ;;  %v2205_v57 = vpop.f32.mrb[42].mxu1  ;;  %v2471_v53 = vpack.c.bf16 %v7036_v31, %v7033_v9 }
 0x2b3   : > { %v2206_v12 = vadd.f32 %v2205_v57, %v6980_v60  ;;  %v2207_v42 = vpop.f32.mrb[43].mxu1  ;;  %v2348_v26 = vmax.f32 %v2202_v24, 0.0 }
 0x2b4   : > { %v2349_v59 = vmax.f32 %v2204_v56, 0.0  ;;  %v2208_v19 = vadd.f32 %v2207_v42, %v6983_v4  ;;  %2746 = vmatprep.mubr.bf16.mxu0 %v2471_v53 }
 0x2b5   : > { %v2350_v29 = vmax.f32 %v2206_v12, 0.0  ;;  %2747 = vmatmul.mubr.bf16.gmra.mrb[36].mxu0 %v2470_v0  ;;  %v7059_v57 = vadd.f32 %v2348_v26, %v6591_v32 }
 0x2b6   : > { %v2351_v38 = vmax.f32 %v2208_v19, 0.0  ;;  %v7053_v49 = vadd.f32 %v2349_v59, %v6572_v5 }
 0x2b7   : > { %v7050_v54 = vadd.f32 %v2350_v29, %v6582_v40 }
 0x2b8   : > { %v7056_v39 = vadd.f32 %v2351_v38, %v6563_v17  ;;  %v2211_v62 = vpop.f32.mrb[44].mxu1 }
 0x2b9   : > { %v2212_v56 = vadd.f32 %v2211_v62, %v6980_v60  ;;  %v2213_v53 = vpop.f32.mrb[45].mxu1  ;;  %v2472_v17 = vpack.c.bf16 %v7050_v54, %v7059_v57 }
 0x2ba   : > { %v2214_v24 = vadd.f32 %v2213_v53, %v6983_v4  ;;  %v2215_v12 = vpop.f32.mrb[46].mxu1  ;;  %v2473_v40 = vpack.c.bf16 %v7056_v39, %v7053_v49 }
 0x2bb   : > { %v2216_v42 = vadd.f32 %v2215_v12, %v6980_v60  ;;  %v2217_v5 = vpop.f32.mrb[47].mxu1  ;;  %v2352_v32 = vmax.f32 %v2212_v56, 0.0 }
 0x2bc   : > { %v2353_v0 = vmax.f32 %v2214_v24, 0.0  ;;  %v2218_v59 = vadd.f32 %v2217_v5, %v6983_v4  ;;  %2756 = vmatprep.mubr.bf16.mxu0 %v2473_v40 }
 0x2bd   : > { %v2354_v19 = vmax.f32 %v2216_v42, 0.0  ;;  %2757 = vmatmul.mubr.bf16.gmra.mrb[40].mxu0 %v2472_v17  ;;  %v7079_v12 = vadd.f32 %v2352_v32, %v6615_v47 }
 0x2be   : > { %v2355_v26 = vmax.f32 %v2218_v59, 0.0  ;;  %v7073_v38 = vadd.f32 %v2353_v0, %v6596_v44 }
 0x2bf   : > { %v7070_v29 = vadd.f32 %v2354_v19, %v6606_v15 }
 0x2c0   : > { %v7076_v62 = vadd.f32 %v2355_v26, %v6587_v13  ;;  %v2221_v53 = vpop.f32.mrb[48].mxu1 }
 0x2c1   : > { %v2222_v24 = vadd.f32 %v2221_v53, %v6980_v60  ;;  %v2223_v40 = vpop.f32.mrb[49].mxu1  ;;  %v2474_v13 = vpack.c.bf16 %v7070_v29, %v7079_v12 }
 0x2c2   : > { %v2224_v56 = vadd.f32 %v2223_v40, %v6983_v4  ;;  %v2225_v42 = vpop.f32.mrb[50].mxu1  ;;  %v2475_v15 = vpack.c.bf16 %v7076_v62, %v7073_v38 }
 0x2c3   : > { %v2226_v5 = vadd.f32 %v2225_v42, %v6980_v60  ;;  %v2227_v44 = vpop.f32.mrb[51].mxu1  ;;  %v2356_v47 = vmax.f32 %v2222_v24, 0.0 }
 0x2c4   : > { %v2357_v17 = vmax.f32 %v2224_v56, 0.0  ;;  %v2228_v0 = vadd.f32 %v2227_v44, %v6983_v4  ;;  %2766 = vmatprep.mubr.bf16.mxu0 %v2475_v15 }
 0x2c5   : > { %v2358_v59 = vmax.f32 %v2226_v5, 0.0  ;;  %2767 = vmatmul.mubr.bf16.gmra.mrb[44].mxu0 %v2474_v13  ;;  %v7099_v42 = vadd.f32 %v2356_v47, %v6639_v1 }
 0x2c6   : > { %v2359_v32 = vmax.f32 %v2228_v0, 0.0  ;;  %v7093_v26 = vadd.f32 %v2357_v17, %v6620_v50 }
 0x2c7   : > { %v7090_v19 = vadd.f32 %v2358_v59, %v6630_v8 }
 0x2c8   : > { %v7096_v53 = vadd.f32 %v2359_v32, %v6611_v55  ;;  %v2231_v40 = vpop.f32.mrb[52].mxu1 }
 0x2c9   : > { %v2232_v56 = vadd.f32 %v2231_v40, %v6980_v60  ;;  %v2233_v15 = vpop.f32.mrb[53].mxu1  ;;  %v2476_v55 = vpack.c.bf16 %v7090_v19, %v7099_v42 }
 0x2ca   : > { %v2234_v24 = vadd.f32 %v2233_v15, %v6983_v4  ;;  %v2235_v5 = vpop.f32.mrb[54].mxu1  ;;  %v2477_v8 = vpack.c.bf16 %v7096_v53, %v7093_v26 }
 0x2cb   : > { %v2236_v44 = vadd.f32 %v2235_v5, %v6980_v60  ;;  %v2237_v50 = vpop.f32.mrb[55].mxu1  ;;  %v2360_v1 = vmax.f32 %v2232_v56, 0.0 }
 0x2cc   : > { %v2361_v13 = vmax.f32 %v2234_v24, 0.0  ;;  %v2238_v17 = vadd.f32 %v2237_v50, %v6983_v4  ;;  %2776 = vmatprep.mubr.bf16.mxu0 %v2477_v8 }
 0x2cd   : > { %v2362_v0 = vmax.f32 %v2236_v44, 0.0  ;;  %2777 = vmatmul.mubr.bf16.gmra.mrb[48].mxu0 %v2476_v55  ;;  %v7119_v5 = vadd.f32 %v2360_v1, %v6670_v36 }
 0x2ce   : > { %v2363_v47 = vmax.f32 %v2238_v17, 0.0  ;;  %v7113_v32 = vadd.f32 %v2361_v13, %v6644_v11 }
 0x2cf   : > { %v7110_v59 = vadd.f32 %v2362_v0, %v6661_v48 }
 0x2d0   : > { %v7116_v40 = vadd.f32 %v2363_v47, %v6635_v58  ;;  %v2241_v15 = vpop.f32.mrb[56].mxu1 }
 0x2d1   : > { %v2242_v24 = vadd.f32 %v2241_v15, %v6980_v60  ;;  %v2243_v8 = vpop.f32.mrb[57].mxu1  ;;  %v2478_v58 = vpack.c.bf16 %v7110_v59, %v7119_v5 }
 0x2d2   : > { %v2244_v56 = vadd.f32 %v2243_v8, %v6983_v4  ;;  %v2245_v44 = vpop.f32.mrb[58].mxu1  ;;  %v2479_v48 = vpack.c.bf16 %v7116_v40, %v7113_v32 }
 0x2d3   : > { %v2246_v50 = vadd.f32 %v2245_v44, %v6980_v60  ;;  %v2247_v11 = vpop.f32.mrb[59].mxu1  ;;  %v2364_v36 = vmax.f32 %v2242_v24, 0.0 }
 0x2d4   : > { %v2365_v55 = vmax.f32 %v2244_v56, 0.0  ;;  %v2248_v13 = vadd.f32 %v2247_v11, %v6983_v4  ;;  %2786 = vmatprep.mubr.bf16.mxu0 %v2479_v48 }
 0x2d5   : > { %v2366_v17 = vmax.f32 %v2246_v50, 0.0  ;;  %2787 = vmatmul.mubr.bf16.gmra.mrb[52].mxu0 %v2478_v58  ;;  %v7139_v8 = vadd.f32 %v2364_v36, %v6698_v18 }
 0x2d6   : > { %v2367_v1 = vmax.f32 %v2248_v13, 0.0  ;;  %v7133_v47 = vadd.f32 %v2365_v55, %v6678_v52 }
 0x2d7   : > { %v7130_v0 = vadd.f32 %v2366_v17, %v6689_v51 }
 0x2d8   : > { %v7136_v15 = vadd.f32 %v2367_v1, %v6682_v30 }
 0x2d9   : > { %9862 = vst [vmem:[#allocation28_spill] sm:$0xff] %v7130_v0  ;;  %v2480_v24 = vpack.c.bf16 %v7130_v0, %v7139_v8 }
 0x2da   : > { %9863 = vst [vmem:[#allocation33_spill] sm:$0xff] %v7136_v15  ;;  %v2481_v56 = vpack.c.bf16 %v7136_v15, %v7133_v47 }
 0x2dc   : > { %2796 = vmatprep.mubr.bf16.mxu0 %v2481_v56 }
 0x2dd   : > { %2797 = vmatmul.mubr.bf16.gmra.mrb[56].mxu0 %v2480_v24 }
 0x2e0   : > { %v2251_v44 = vpop.f32.mrb[60].mxu1 }
 0x2e1   : > { %v2252_v51 = vadd.f32 %v2251_v44, %v6980_v60  ;;  %v2253_v48 = vpop.f32.mrb[61].mxu1 }
 0x2e2   : > { %v2254_v52 = vadd.f32 %v2253_v48, %v6983_v4  ;;  %v2255_v50 = vpop.f32.mrb[62].mxu1 }
 0x2e3   : > { %v2256_v30 = vadd.f32 %v2255_v50, %v6980_v60  ;;  %v2257_v11 = vpop.f32.mrb[63].mxu1  ;;  %v2368_v55 = vmax.f32 %v2252_v51, 0.0 }
 0x2e4   : > { %v2369_v18 = vmax.f32 %v2254_v52, 0.0  ;;  %v2258_v58 = vadd.f32 %v2257_v11, %v6983_v4 }
 0x2e5   : > { %v2370_v13 = vmax.f32 %v2256_v30, 0.0  ;;  %v7159_v24 = vadd.f32 %v2368_v55, %v6744_v61 }
 0x2e6   : > { %v2371_v36 = vmax.f32 %v2258_v58, 0.0  ;;  %v7153_v1 = vadd.f32 %v2369_v18, %v6736_v6 }
 0x2e7   : > { %v7150_v17 = vadd.f32 %v2370_v13, %v6732_v7  ;;  %9867 = vst [vmem:[#allocation6_spill] sm:$0xff] %v7159_v24 }
 0x2e8   : > { %9865 = vst [vmem:[#allocation32_spill] sm:$0xff] %v7153_v1  ;;  %v7156_v56 = vadd.f32 %v2371_v36, %v6740_v16 }
 0x2e9   : > { %9864 = vst [vmem:[#allocation12_spill] sm:$0xff] %v7150_v17  ;;  %v2482_v51 = vpack.c.bf16 %v7150_v17, %v7159_v24 }
 0x2ea   : > { %9866 = vst [vmem:[#allocation31_spill] sm:$0xff] %v7156_v56  ;;  %v2483_v44 = vpack.c.bf16 %v7156_v56, %v7153_v1 }
 0x2ec   : > { %2806 = vmatprep.mubr.bf16.mxu0 %v2483_v44 }
 0x2ed   : > { %2807 = vmatmul.mubr.bf16.gmra.mrb[60].mxu0 %v2482_v51 }
 0x2f3   : > { %v2261_v48 = vpop.f32.mrb[64].mxu1 }
 0x2f4   : > { %v2262_v7 = vadd.f32 %v2261_v48, %v6980_v60  ;;  %v2263_v52 = vpop.f32.mrb[65].mxu1 }
 0x2f5   : > { %v2264_v6 = vadd.f32 %v2263_v52, %v6983_v4  ;;  %v2265_v50 = vpop.f32.mrb[66].mxu1 }
 0x2f6   : > { %v2266_v16 = vadd.f32 %v2265_v50, %v6980_v60  ;;  %v2267_v30 = vpop.f32.mrb[67].mxu1  ;;  %v2372_v18 = vmax.f32 %v2262_v7, 0.0 }
 0x2f7   : > { %v2373_v61 = vmax.f32 %v2264_v6, 0.0  ;;  %v2268_v11 = vadd.f32 %v2267_v30, %v6983_v4 }
 0x2f8   : > { %v2374_v58 = vmax.f32 %v2266_v16, 0.0  ;;  %v7179_v51 = vadd.f32 %v2372_v18, %v6798_v41 }
 0x2f9   : > { %v2375_v55 = vmax.f32 %v2268_v11, 0.0  ;;  %v7173_v36 = vadd.f32 %v2373_v61, %v6787_v28 }
 0x2fa   : > { %v7170_v13 = vadd.f32 %v2374_v58, %v6780_v35  ;;  %9871 = vst [vmem:[#allocation35_spill] sm:$0xff] %v7179_v51 }
 0x2fb   : > { %9869 = vst [vmem:[#allocation7_spill] sm:$0xff] %v7173_v36  ;;  %v7176_v44 = vadd.f32 %v2375_v55, %v6791_v22 }
 0x2fc   : > { %9868 = vst [vmem:[#allocation13_spill] sm:$0xff] %v7170_v13  ;;  %v2484_v7 = vpack.c.bf16 %v7170_v13, %v7179_v51 }
 0x2fd   : > { %9870 = vst [vmem:[#allocation34_spill] sm:$0xff] %v7176_v44  ;;  %v2485_v48 = vpack.c.bf16 %v7176_v44, %v7173_v36 }
 0x2ff   : > { %2816 = vmatprep.mubr.bf16.mxu0 %v2485_v48 }
 0x300   : > { %2817 = vmatmul.mubr.bf16.gmra.mrb[64].mxu0 %v2484_v7  ;;  %v9875_v7 = vld [vmem:[#allocation14_spill] sm:$0xff] }
 0x306   : > { %v2271_v52 = vpop.f32.mrb[68].mxu1 }
 0x307   : > { %v2272_v35 = vadd.f32 %v2271_v52, %v6980_v60  ;;  %v2273_v6 = vpop.f32.mrb[69].mxu1 }
 0x308   : > { %v2274_v28 = vadd.f32 %v2273_v6, %v6983_v4  ;;  %v2275_v50 = vpop.f32.mrb[70].mxu1 }
 0x309   : > { %v2276_v22 = vadd.f32 %v2275_v50, %v6980_v60  ;;  %v2277_v16 = vpop.f32.mrb[71].mxu1  ;;  %v2376_v61 = vmax.f32 %v2272_v35, 0.0 }
 0x30a   : > { %v2377_v41 = vmax.f32 %v2274_v28, 0.0  ;;  %v2278_v30 = vadd.f32 %v2277_v16, %v6983_v4 }
 0x30b   : > { %v2378_v11 = vmax.f32 %v2276_v22, 0.0  ;;  %v7199_v52 = vadd.f32 %v2376_v61, %v9875_v7  ;;  %v9877_v7 = vld [vmem:[#allocation16_spill] sm:$0xff] }
 0x30c   : > { %v2379_v18 = vmax.f32 %v2278_v30, 0.0  ;;  %v7193_v55 = vadd.f32 %v2377_v41, %v6838_v21 }
 0x30d   : > { %v7190_v58 = vadd.f32 %v2378_v11, %v6834_v43  ;;  %9876 = vst [vmem:[#allocation14_spill] sm:$0xff] %v7199_v52 }
 0x30e   : > { %9873 = vst [vmem:[#allocation37_spill] sm:$0xff] %v7193_v55  ;;  %v7196_v48 = vadd.f32 %v2379_v18, %v6842_v23 }
 0x30f   : > { %9872 = vst [vmem:[#allocation36_spill] sm:$0xff] %v7190_v58  ;;  %v2486_v35 = vpack.c.bf16 %v7190_v58, %v7199_v52 }
 0x310   : > { %9874 = vst [vmem:[#allocation38_spill] sm:$0xff] %v7196_v48  ;;  %v2487_v6 = vpack.c.bf16 %v7196_v48, %v7193_v55 }
 0x312   : > { %2826 = vmatprep.mubr.bf16.mxu0 %v2487_v6  ;;  %v9879_v6 = vld [vmem:[#allocation15_spill] sm:$0xff] }
 0x313   : > { %2827 = vmatmul.mubr.bf16.gmra.mrb[68].mxu0 %v2486_v35 }
 0x319   : > { %v2281_v28 = vpop.f32.mrb[72].mxu1 }
 0x31a   : > { %v2282_v43 = vadd.f32 %v2281_v28, %v6980_v60  ;;  %v2283_v50 = vpop.f32.mrb[73].mxu1  ;;  %v9881_v28 = vld [vmem:[#allocation17_spill] sm:$0xff] }
 0x31b   : > { %v2284_v21 = vadd.f32 %v2283_v50, %v6983_v4  ;;  %v2285_v22 = vpop.f32.mrb[74].mxu1  ;;  %v9883_v50 = vld [vmem:[#allocation18_spill] sm:$0xff] }
 0x31c   : > { %v2286_v23 = vadd.f32 %v2285_v22, %v6980_v60  ;;  %v2287_v16 = vpop.f32.mrb[75].mxu1  ;;  %v2380_v61 = vmax.f32 %v2282_v43, 0.0 }
 0x31d   : > { %v2381_v41 = vmax.f32 %v2284_v21, 0.0  ;;  %v2288_v30 = vadd.f32 %v2287_v16, %v6983_v4 }
 0x31e   : > { %v2382_v11 = vmax.f32 %v2286_v23, 0.0  ;;  %v7219_v55 = vadd.f32 %v2380_v61, %v9883_v50 }
 0x31f   : > { %v2383_v18 = vmax.f32 %v2288_v30, 0.0  ;;  %v7213_v35 = vadd.f32 %v2381_v41, %v9879_v6 }
 0x320   : > { %v7210_v48 = vadd.f32 %v2382_v11, %v9877_v7  ;;  %9884 = vst [vmem:[#allocation18_spill] sm:$0xff] %v7219_v55 }
 0x321   : > { %9880 = vst [vmem:[#allocation15_spill] sm:$0xff] %v7213_v35  ;;  %v7216_v58 = vadd.f32 %v2383_v18, %v9881_v28 }
 0x322   : > { %9878 = vst [vmem:[#allocation16_spill] sm:$0xff] %v7210_v48  ;;  %v2488_v43 = vpack.c.bf16 %v7210_v48, %v7219_v55 }
 0x323   : > { %9882 = vst [vmem:[#allocation17_spill] sm:$0xff] %v7216_v58  ;;  %v2489_v21 = vpack.c.bf16 %v7216_v58, %v7213_v35  ;;  %v9885_v58 = vld [vmem:[#allocation21_spill] sm:$0xff] }
 0x325   : > { %2836 = vmatprep.mubr.bf16.mxu0 %v2489_v21  ;;  %v9887_v21 = vld [vmem:[#allocation3_spill] sm:$0xff] }
 0x326   : > { %2837 = vmatmul.mubr.bf16.gmra.mrb[72].mxu0 %v2488_v43 }
 0x32c   : > { %v2291_v22 = vpop.f32.mrb[76].mxu1 }
 0x32d   : > { %v2292_v23 = vadd.f32 %v2291_v22, %v6980_v60  ;;  %v2293_v16 = vpop.f32.mrb[77].mxu1  ;;  %v9889_v22 = vld [vmem:[#allocation20_spill] sm:$0xff] }
 0x32e   : > { %v2294_v41 = vadd.f32 %v2293_v16, %v6983_v4  ;;  %v2295_v30 = vpop.f32.mrb[78].mxu1  ;;  %v9891_v16 = vld [vmem:[#allocation19_spill] sm:$0xff] }
 0x32f   : > { %v2296_v11 = vadd.f32 %v2295_v30, %v6980_v60  ;;  %v2297_v18 = vpop.f32.mrb[79].mxu1  ;;  %v2384_v6 = vmax.f32 %v2292_v23, 0.0 }
 0x330   : > { %v2385_v61 = vmax.f32 %v2294_v41, 0.0  ;;  %v2298_v7 = vadd.f32 %v2297_v18, %v6983_v4 }
 0x331   : > { %v2386_v28 = vmax.f32 %v2296_v11, 0.0  ;;  %v7239_v55 = vadd.f32 %v2384_v6, %v9891_v16 }
 0x332   : > { %v2387_v50 = vmax.f32 %v2298_v7, 0.0  ;;  %v7233_v43 = vadd.f32 %v2385_v61, %v9887_v21 }
 0x333   : > { %v7230_v48 = vadd.f32 %v2386_v28, %v9885_v58  ;;  %9892 = vst [vmem:[#allocation19_spill] sm:$0xff] %v7239_v55 }
 0x334   : > { %9888 = vst [vmem:[#allocation3_spill] sm:$0xff] %v7233_v43  ;;  %v7236_v35 = vadd.f32 %v2387_v50, %v9889_v22 }
 0x335   : > { %9886 = vst [vmem:[#allocation21_spill] sm:$0xff] %v7230_v48  ;;  %v2490_v23 = vpack.c.bf16 %v7230_v48, %v7239_v55 }
 0x336   : > { %9890 = vst [vmem:[#allocation20_spill] sm:$0xff] %v7236_v35  ;;  %v2491_v41 = vpack.c.bf16 %v7236_v35, %v7233_v43  ;;  %v9893_v35 = vld [vmem:[#allocation24_spill] sm:$0xff] }
 0x338   : > { %2846 = vmatprep.mubr.bf16.mxu0 %v2491_v41  ;;  %v9895_v41 = vld [vmem:[#allocation9_spill] sm:$0xff] }
 0x339   : > { %2847 = vmatmul.mubr.bf16.gmra.mrb[76].mxu0 %v2490_v23 }
 0x33f   : > { %v2301_v30 = vpop.f32.mrb[80].mxu1 }
 0x340   : > { %v2302_v58 = vadd.f32 %v2301_v30, %v6980_v60  ;;  %v2303_v11 = vpop.f32.mrb[81].mxu1  ;;  %v9897_v30 = vld [vmem:[#allocation23_spill] sm:$0xff] }
 0x341   : > { %v2304_v18 = vadd.f32 %v2303_v11, %v6983_v4  ;;  %v2305_v61 = vpop.f32.mrb[82].mxu1  ;;  %v9899_v11 = vld [vmem:[#allocation22_spill] sm:$0xff] }
 0x342   : > { %v2306_v7 = vadd.f32 %v2305_v61, %v6980_v60  ;;  %v2307_v28 = vpop.f32.mrb[83].mxu1  ;;  %v2388_v21 = vmax.f32 %v2302_v58, 0.0 }
 0x343   : > { %v2389_v6 = vmax.f32 %v2304_v18, 0.0  ;;  %v2308_v50 = vadd.f32 %v2307_v28, %v6983_v4 }
 0x344   : > { %v2390_v22 = vmax.f32 %v2306_v7, 0.0  ;;  %v7259_v55 = vadd.f32 %v2388_v21, %v9899_v11 }
 0x345   : > { %v2391_v16 = vmax.f32 %v2308_v50, 0.0  ;;  %v7253_v23 = vadd.f32 %v2389_v6, %v9895_v41 }
 0x346   : > { %v7250_v48 = vadd.f32 %v2390_v22, %v9893_v35  ;;  %9900 = vst [vmem:[#allocation22_spill] sm:$0xff] %v7259_v55 }
 0x347   : > { %9896 = vst [vmem:[#allocation9_spill] sm:$0xff] %v7253_v23  ;;  %v7256_v43 = vadd.f32 %v2391_v16, %v9897_v30 }
 0x348   : > { %9894 = vst [vmem:[#allocation24_spill] sm:$0xff] %v7250_v48  ;;  %v2492_v58 = vpack.c.bf16 %v7250_v48, %v7259_v55 }
 0x349   : > { %9898 = vst [vmem:[#allocation23_spill] sm:$0xff] %v7256_v43  ;;  %v2493_v18 = vpack.c.bf16 %v7256_v43, %v7253_v23  ;;  %v9901_v43 = vld [vmem:[#allocation27_spill] sm:$0xff] }
 0x34b   : > { %2856 = vmatprep.mubr.bf16.mxu0 %v2493_v18  ;;  %v9903_v18 = vld [vmem:[#allocation10_spill] sm:$0xff] }
 0x34c   : > { %2857 = vmatmul.mubr.bf16.gmra.mrb[80].mxu0 %v2492_v58 }
 0x352   : > { %v2311_v61 = vpop.f32.mrb[84].mxu1 }
 0x353   : > { %v2312_v35 = vadd.f32 %v2311_v61, %v6980_v60  ;;  %v2313_v7 = vpop.f32.mrb[85].mxu1  ;;  %v9905_v61 = vld [vmem:[#allocation26_spill] sm:$0xff] }
 0x354   : > { %v2314_v28 = vadd.f32 %v2313_v7, %v6983_v4  ;;  %v2315_v6 = vpop.f32.mrb[86].mxu1  ;;  %v9907_v7 = vld [vmem:[#allocation25_spill] sm:$0xff] }
 0x355   : > { %v2316_v50 = vadd.f32 %v2315_v6, %v6980_v60  ;;  %v2317_v22 = vpop.f32.mrb[87].mxu1  ;;  %v2392_v41 = vmax.f32 %v2312_v35, 0.0 }
 0x356   : > { %v2393_v21 = vmax.f32 %v2314_v28, 0.0  ;;  %v2318_v16 = vadd.f32 %v2317_v22, %v6983_v4 }
 0x357   : > { %v2394_v30 = vmax.f32 %v2316_v50, 0.0  ;;  %v7279_v55 = vadd.f32 %v2392_v41, %v9907_v7 }
 0x358   : > { %v2395_v11 = vmax.f32 %v2318_v16, 0.0  ;;  %v7273_v58 = vadd.f32 %v2393_v21, %v9903_v18 }
 0x359   : > { %v7270_v48 = vadd.f32 %v2394_v30, %v9901_v43  ;;  %9908 = vst [vmem:[#allocation25_spill] sm:$0xff] %v7279_v55 }
 0x35a   : > { %9904 = vst [vmem:[#allocation10_spill] sm:$0xff] %v7273_v58  ;;  %v7276_v23 = vadd.f32 %v2395_v11, %v9905_v61 }
 0x35b   : > { %9902 = vst [vmem:[#allocation27_spill] sm:$0xff] %v7270_v48  ;;  %v2494_v35 = vpack.c.bf16 %v7270_v48, %v7279_v55 }
 0x35c   : > { %9906 = vst [vmem:[#allocation26_spill] sm:$0xff] %v7276_v23  ;;  %v2495_v28 = vpack.c.bf16 %v7276_v23, %v7273_v58 }
 0x35e   : > { %2866 = vmatprep.mubr.bf16.mxu0 %v2495_v28 }
 0x35f   : > { %2867 = vmatmul.mubr.bf16.gmra.mrb[84].mxu0 %v2494_v35 }
 0x365   : > { %v2321_v6 = vpop.f32.mrb[88].mxu1 }
 0x366   : > { %v2322_v43 = vadd.f32 %v2321_v6, %v6980_v60  ;;  %v2323_v50 = vpop.f32.mrb[89].mxu1  ;;  %v9912_v6 = vld [vmem:[#allocation30_spill] sm:$0xff] }
 0x367   : > { %v2324_v22 = vadd.f32 %v2323_v50, %v6983_v4  ;;  %v2325_v21 = vpop.f32.mrb[90].mxu1 }
 0x368   : > { %v2326_v16 = vadd.f32 %v2325_v21, %v6980_v60  ;;  %v2327_v30 = vpop.f32.mrb[91].mxu1  ;;  %v2396_v18 = vmax.f32 %v2322_v43, 0.0 }
 0x369   : > { %v2397_v41 = vmax.f32 %v2324_v22, 0.0  ;;  %v2328_v11 = vadd.f32 %v2327_v30, %v6983_v4 }
 0x36a   : > { %v2398_v61 = vmax.f32 %v2326_v16, 0.0  ;;  %v7299_v50 = vadd.f32 %v2396_v18, %v9912_v6 }
 0x36b   : > { %v2399_v7 = vmax.f32 %v2328_v11, 0.0  ;;  %v7293_v28 = vadd.f32 %v2397_v41, %v6958_v33 }
 0x36c   : > { %v7290_v23 = vadd.f32 %v2398_v61, %v6954_v27  ;;  %9913 = vst [vmem:[#allocation30_spill] sm:$0xff] %v7299_v50 }
 0x36d   : > { %9910 = vst [vmem:[#allocation40_spill] sm:$0xff] %v7293_v28  ;;  %v7296_v35 = vadd.f32 %v2399_v7, %v6962_v45  ;;  %v2532_v45 = vld [vmem:[%s9524_s8] sm:$0x3] }
 0x36e   : > { %9909 = vst [vmem:[#allocation39_spill] sm:$0xff] %v7290_v23  ;;  %v2496_v43 = vpack.c.bf16 %v7290_v23, %v7299_v50 }
 0x36f   : > { %9911 = vst [vmem:[#allocation41_spill] sm:$0xff] %v7296_v35  ;;  %v2497_v22 = vpack.c.bf16 %v7296_v35, %v7293_v28 }
 0x371   : > { %2876 = vmatprep.mubr.bf16.mxu0 %v2497_v22  ;;  %v7313_v22 = vrot.slane %v2532_v45, %v9748_v46 }
 0x372   : > { %2877 = vmatmul.mubr.bf16.gmra.mrb[88].mxu0 %v2496_v43  ;;  %v3025_v43 = vld [vmem:[%s9525_s9] sm:$0x3f] }
 0x373   : > { %v7342_v28 = vrot.slane %v3025_v43, %v9748_v46 }
 0x378   : > { %v2331_v21 = vpop.f32.mrb[92].mxu1 }
 0x379   : > { %v2332_v27 = vadd.f32 %v2331_v21, %v6980_v60  ;;  %v2333_v16 = vpop.f32.mrb[93].mxu1 }
 0x37a   : > { %v2334_v33 = vadd.f32 %v2333_v16, %v6983_v4  ;;  %v2335_v30 = vpop.f32.mrb[94].mxu1  ;;  %v7319_v16 = vrot.slane %v2532_v45, %v9853_v20 }
 0x37b   : > { %v2336_v41 = vadd.f32 %v2335_v30, %v6980_v60  ;;  %v2337_v11 = vpop.f32.mrb[95].mxu1  ;;  %v2400_v7 = vmax.f32 %v2332_v27, 0.0  ;;  %v3026_v60 = vld [vmem:[%s9525_s9 + $0x8] sm:$0x3f] }
 0x37c   : > { %v2401_v18 = vmax.f32 %v2334_v33, 0.0  ;;  %v2338_v61 = vadd.f32 %v2337_v11, %v6983_v4  ;;  %v9916_v27 = vld [vmem:[#allocation11_spill] sm:$0xff]  ;;  %v9918_v11 = vld [vmem:[#allocation2_spill] sm:$0xff] }
 0x37d   : > { %v2402_v6 = vmax.f32 %v2336_v41, 0.0  ;;  %v7334_v41 = vrot.slane %v3025_v43, %v9853_v20  ;;  %v3533_v45 = vsub.s32 3, %v9918_v11  ;;  %v7351_v11 = vrot.slane %v3026_v60, %v9853_v20 }
 0x37e   : > { %v2403_v21 = vmax.f32 %v2338_v61, 0.0  ;;  %v7328_v4 = vadd.f32 %v2401_v18, %v6991_v2  ;;  %v9919_v61 = vld [vmem:[#allocation29_spill] sm:$0xff]  ;;  %v9921_v2 = vld [vmem:[#allocation8_spill] sm:$0xff] }
 0x37f   : > { %v7322_v35 = vadd.f32 %v2402_v6, %v6987_v14  ;;  %v7338_v23 = vadd.f32 %v2400_v7, %v9919_v61  ;;  %v7345_v18 = vrot.slane %v3025_v43, %v9921_v2  ;;  %v7354_v7 = vrot.slane %v3026_v60, %v9748_v46 }
 0x380   : > { %9915 = vst [vmem:[#allocation43_spill] sm:$0xff] %v7328_v4  ;;  %v7331_v33 = vadd.f32 %v2403_v21, %v9916_v27  ;;  %v2738_v30 = vpop.f32.mrb[32].mxu0  ;;  %v7360_v55 = vrot.slane %v3026_v60, %v9921_v2  ;;  %v7365_v20 = vrot.slane %v3026_v60, %v3533_v45 }
 0x381   : > { %9914 = vst [vmem:[#allocation42_spill] sm:$0xff] %v7322_v35  ;;  %9920 = vst [vmem:[#allocation2_spill] sm:$0xff] %v7338_v23  ;;  %v2739_v14 = vadd.f32 %v2738_v30, %v7313_v22  ;;  %v2740_v6 = vpop.f32.mrb[33].mxu0  ;;  %v2498_v58 = vpack.c.bf16 %v7322_v35, %v7338_v23  ;;  %v9923_v23 = vld [vmem:[#allocation4_spill] sm:$0xff] }
 0x382   : > { %9917 = vst [vmem:[#allocation11_spill] sm:$0xff] %v7331_v33  ;;  %v2741_v21 = vadd.f32 %v2740_v6, %v7319_v16  ;;  %v2742_v27 = vpop.f32.mrb[34].mxu0  ;;  %v2499_v50 = vpack.c.bf16 %v7331_v33, %v7328_v4  ;;  %v7363_v33 = vrot.slane %v3025_v43, %v3533_v45 }
 0x383   : > { %v2897_v30 = vmax.f32 %v2739_v14, 0.0  ;;  %v2743_v61 = vadd.f32 %v2742_v27, %v7313_v22  ;;  %v2744_v48 = vpop.f32.mrb[35].mxu0  ;;  %v9922_v27 = vld [vmem:[#allocation5_spill] sm:$0xff] }
 0x384   : > { %v2898_v6 = vmax.f32 %v2741_v21, 0.0  ;;  %v2745_v52 = vadd.f32 %v2744_v48, %v7319_v16  ;;  %2886 = vmatprep.mubr.bf16.mxu0 %v2499_v50  ;;  %v7369_v4 = vrot.slane %v3025_v43, %v9922_v27  ;;  %v7372_v35 = vrot.slane %v3026_v60, %v9922_v27 }
 0x385   : > { %v2961_v46 = vadd.f32 %v2897_v30, %v7019_v10  ;;  %v2899_v14 = vmax.f32 %v2743_v61, 0.0  ;;  %2887 = vmatmul.mubr.bf16.gmra.mrb[92].mxu0 %v2498_v58  ;;  %v7376_v48 = vrot.slane %v3025_v43, %v9923_v23  ;;  %v7379_v50 = vrot.slane %v3026_v60, %v9923_v23 }
 0x386   : > { %v2962_v2 = vadd.f32 %v2898_v6, %v7013_v34  ;;  %v2900_v21 = vmax.f32 %v2745_v52, 0.0 }
 0x387   : > { %v2963_v45 = vadd.f32 %v2899_v14, %v7010_v37  ;;  %v3203_v10 = vmul.f32 %v7334_v41, %v2961_v46  ;;  %v3035_v58 = vmul.f32 %v7342_v28, %v2961_v46  ;;  %v3371_v30 = vmul.f32 %v7345_v18, %v2961_v46 }
 0x388   : > { %v7386_v61 = vadd.f32 %v2900_v21, %v7016_v3  ;;  %v2748_v27 = vpop.f32.mrb[36].mxu0  ;;  %v3204_v34 = vmul.f32 %v7351_v11, %v2962_v2  ;;  %v3036_v52 = vmul.f32 %v7354_v7, %v2962_v2  ;;  %v3372_v43 = vmul.f32 %v7360_v55, %v2962_v2 }
 0x389   : > { %v2749_v23 = vadd.f32 %v2748_v27, %v7313_v22  ;;  %v2750_v60 = vpop.f32.mrb[37].mxu0  ;;  %v3205_v37 = vmul.f32 %v7334_v41, %v2963_v45  ;;  %v3539_v6 = vmul.f32 %v7363_v33, %v2961_v46  ;;  %v3540_v14 = vmul.f32 %v7365_v20, %v2962_v2 }
 0x38a   : > { %v2751_v44 = vadd.f32 %v2750_v60, %v7319_v16  ;;  %v2752_v3 = vpop.f32.mrb[38].mxu0  ;;  %v3267_v21 = vadd.f32 %v3204_v34, %v3203_v10  ;;  %v3099_v13 = vadd.f32 %v3036_v52, %v3035_v58  ;;  %v3435_v36 = vadd.f32 %v3372_v43, %v3371_v30 }
 0x38b   : > { %v2901_v51 = vmax.f32 %v2749_v23, 0.0  ;;  %v2753_v56 = vadd.f32 %v2752_v3, %v7313_v22  ;;  %v2754_v17 = vpop.f32.mrb[39].mxu0  ;;  %v3206_v27 = vmul.f32 %v7351_v11, %v7386_v61  ;;  %v3603_v1 = vadd.f32 %v3540_v14, %v3539_v6 }
 0x38c   : > { %v2902_v24 = vmax.f32 %v2751_v44, 0.0  ;;  %v2755_v15 = vadd.f32 %v2754_v17, %v7319_v16  ;;  %3268 = vadd.xlane.f32.xlu0 %v3267_v21  ;;  %3100 = vadd.xlane.f32.xlu1 %v3099_v13  ;;  %v3373_v0 = vmul.f32 %v7345_v18, %v2963_v45  ;;  %v3374_v10 = vmul.f32 %v7360_v55, %v7386_v61 }
 0x38d   : > { %v7404_v58 = vadd.f32 %v2901_v51, %v7039_v63  ;;  %v2903_v30 = vmax.f32 %v2753_v56, 0.0  ;;  %v3270_v34 = vadd.f32 %v3206_v27, %v3205_v37  ;;  %v3707_v52 = vmul.f32 %v7369_v4, %v2961_v46 }
 0x38e   : > { %v7408_v43 = vadd.f32 %v2902_v24, %v7033_v9  ;;  %v2904_v44 = vmax.f32 %v2755_v15, 0.0  ;;  %v3438_v23 = vadd.f32 %v3374_v10, %v3373_v0  ;;  %v3708_v17 = vmul.f32 %v7372_v35, %v2962_v2 }
 0x38f   : > { %v7412_v13 = vadd.f32 %v2903_v30, %v7030_v25  ;;  %v3541_v60 = vmul.f32 %v7363_v33, %v2963_v45  ;;  %v3542_v63 = vmul.f32 %v7365_v20, %v7386_v61  ;;  %v3875_v56 = vmul.f32 %v7376_v48, %v2961_v46 }
 0x390   : > { %v7419_v51 = vadd.f32 %v2904_v44, %v7036_v31  ;;  %v2758_v37 = vpop.f32.mrb[40].mxu0  ;;  %3436 = vadd.xlane.f32.xlu0 %v3435_v36  ;;  %3271 = vadd.xlane.f32.xlu1 %v3270_v34  ;;  %v3771_v9 = vadd.f32 %v3708_v17, %v3707_v52  ;;  %v3876_v0 = vmul.f32 %v7379_v50, %v2962_v2 }
 0x391   : > { %v2759_v15 = vadd.f32 %v2758_v37, %v7313_v22  ;;  %v2760_v25 = vpop.f32.mrb[41].mxu0  ;;  %v3606_v24 = vadd.f32 %v3542_v63, %v3541_v60  ;;  %v3709_v6 = vmul.f32 %v7369_v4, %v2963_v45  ;;  %v3710_v14 = vmul.f32 %v7372_v35, %v7386_v61 }
 0x392   : > { %v2761_v46 = vadd.f32 %v2760_v25, %v7319_v16  ;;  %v2762_v3 = vpop.f32.mrb[42].mxu0  ;;  %v3939_v31 = vadd.f32 %v3876_v0, %v3875_v56  ;;  %v3037_v21 = vmul.f32 %v7342_v28, %v2963_v45  ;;  %v3038_v36 = vmul.f32 %v7354_v7, %v7386_v61 }
 0x393   : > { %v2905_v27 = vmax.f32 %v2759_v15, 0.0  ;;  %v2763_v2 = vadd.f32 %v2762_v3, %v7313_v22  ;;  %v2764_v10 = vpop.f32.mrb[43].mxu0  ;;  %v3774_v30 = vadd.f32 %v3710_v14, %v3709_v6  ;;  %v3877_v34 = vmul.f32 %v7376_v48, %v2963_v45 }
 0x394   : > { %v2906_v52 = vmax.f32 %v2761_v46, 0.0  ;;  %v2765_v44 = vadd.f32 %v2764_v10, %v7319_v16  ;;  %3604 = vadd.xlane.f32.xlu0 %v3603_v1  ;;  %3439 = vadd.xlane.f32.xlu1 %v3438_v23  ;;  %v3102_v17 = vadd.f32 %v3038_v36, %v3037_v21  ;;  %v3878_v60 = vmul.f32 %v7379_v50, %v7386_v61 }
 0x395   : > { %v7436_v63 = vadd.f32 %v2905_v27, %v7059_v57  ;;  %v2907_v56 = vmax.f32 %v2763_v2, 0.0  ;;  %v3039_v37 = vmul.f32 %v7342_v28, %v7404_v58  ;;  %v3040_v0 = vmul.f32 %v7354_v7, %v7408_v43 }
 0x396   : > { %v7443_v45 = vadd.f32 %v2906_v52, %v7053_v49  ;;  %v2908_v15 = vmax.f32 %v2765_v44, 0.0  ;;  %v3942_v1 = vadd.f32 %v3878_v60, %v3877_v34  ;;  %v3041_v23 = vmul.f32 %v7342_v28, %v7412_v13 }
 0x397   : > { %v7448_v61 = vadd.f32 %v2907_v56, %v7050_v54  ;;  %v7450_v57 = vadd.f32 %v3040_v0, %v3039_v37  ;;  %v3042_v25 = vmul.f32 %v7354_v7, %v7419_v51  ;;  %v3207_v6 = vmul.f32 %v7334_v41, %v7404_v58 }
 0x398   : > { %v7457_v14 = vadd.f32 %v2908_v15, %v7056_v39  ;;  %v2768_v49 = vpop.f32.mrb[44].mxu0  ;;  %3772 = vadd.xlane.f32.xlu0 %v3771_v9  ;;  %3607 = vadd.xlane.f32.xlu1 %v3606_v24  ;;  %v3208_v46 = vmul.f32 %v7351_v11, %v7408_v43  ;;  %v3209_v54 = vmul.f32 %v7334_v41, %v7412_v13 }
 0x399   : > { %v2769_v3 = vadd.f32 %v2768_v49, %v7313_v22  ;;  %v2770_v21 = vpop.f32.mrb[45].mxu0  ;;  %v3108_v36 = vadd.f32 %v3042_v25, %v3041_v23  ;;  %v3210_v27 = vmul.f32 %v7351_v11, %v7419_v51  ;;  %v3375_v39 = vmul.f32 %v7345_v18, %v7404_v58 }
 0x39a   : > { %v2771_v2 = vadd.f32 %v2770_v21, %v7319_v16  ;;  %v2772_v9 = vpop.f32.mrb[46].mxu0  ;;  %v7469_v24 = vadd.f32 %v3208_v46, %v3207_v6  ;;  %v3376_v10 = vmul.f32 %v7360_v55, %v7408_v43  ;;  %v3377_v34 = vmul.f32 %v7345_v18, %v7412_v13 }
 0x39b   : > { %v2909_v52 = vmax.f32 %v2769_v3, 0.0  ;;  %v2773_v44 = vadd.f32 %v2772_v9, %v7313_v22  ;;  %v2774_v60 = vpop.f32.mrb[47].mxu0  ;;  %v3276_v56 = vadd.f32 %v3210_v27, %v3209_v54  ;;  %v3378_v37 = vmul.f32 %v7360_v55, %v7419_v51 }
 0x39c   : > { %v2910_v0 = vmax.f32 %v2771_v2, 0.0  ;;  %v2775_v15 = vadd.f32 %v2774_v60, %v7319_v16  ;;  %3940 = vadd.xlane.f32.xlu0 %v3939_v31  ;;  %3775 = vadd.xlane.f32.xlu1 %v3774_v30  ;;  %v7479_v23 = vadd.f32 %v3376_v10, %v3375_v39  ;;  %v3543_v25 = vmul.f32 %v7363_v33, %v7404_v58 }
 0x39d   : > { %v7484_v6 = vadd.f32 %v2909_v52, %v7079_v12  ;;  %v2911_v49 = vmax.f32 %v2773_v44, 0.0  ;;  %v7486_v46 = vadd.f32 %v3378_v37, %v3377_v34  ;;  %v3544_v54 = vmul.f32 %v7365_v20, %v7408_v43 }
 0x39e   : > { %v7491_v3 = vadd.f32 %v2910_v0, %v7073_v38  ;;  %v2912_v21 = vmax.f32 %v2775_v15, 0.0  ;;  %v3545_v31 = vmul.f32 %v7363_v33, %v7412_v13  ;;  %v3546_v30 = vmul.f32 %v7365_v20, %v7419_v51 }
 0x39f   : > { %v7498_v27 = vadd.f32 %v2911_v49, %v7070_v29  ;;  %v7500_v12 = vadd.f32 %v3544_v54, %v3543_v25  ;;  %v3711_v39 = vmul.f32 %v7369_v4, %v7404_v58  ;;  %v3712_v2 = vmul.f32 %v7372_v35, %v7408_v43 }
 0x3a0   : > { %v7507_v38 = vadd.f32 %v2912_v21, %v7076_v62  ;;  %v2778_v9 = vpop.f32.mrb[48].mxu0  ;;  %3103 = vadd.xlane.f32.xlu0 %v3102_v17  ;;  %3943 = vadd.xlane.f32.xlu1 %v3942_v1  ;;  %v7509_v10 = vadd.f32 %v3546_v30, %v3545_v31  ;;  %v3713_v29 = vmul.f32 %v7369_v4, %v7412_v13 }
 0x3a1   : > { %v2779_v34 = vadd.f32 %v2778_v9, %v7313_v22  ;;  %v2780_v52 = vpop.f32.mrb[49].mxu0  ;;  %v7514_v44 = vadd.f32 %v3712_v2, %v3711_v39  ;;  %v3714_v60 = vmul.f32 %v7372_v35, %v7419_v51  ;;  %v3879_v62 = vmul.f32 %v7376_v48, %v7404_v58 }
 0x3a2   : > { %v2781_v37 = vadd.f32 %v2780_v52, %v7319_v16  ;;  %v2782_v17 = vpop.f32.mrb[50].mxu0  ;;  %v3880_v1 = vmul.f32 %v7379_v50, %v7408_v43  ;;  %v3881_v0 = vmul.f32 %v7376_v48, %v7412_v13  ;;  %v3882_v15 = vmul.f32 %v7379_v50, %v7419_v51 }
 0x3a3   : > { %v2913_v25 = vmax.f32 %v2779_v34, 0.0  ;;  %v2783_v49 = vadd.f32 %v2782_v17, %v7313_v22  ;;  %v2784_v54 = vpop.f32.mrb[51].mxu0  ;;  %v7528_v21 = vadd.f32 %v3714_v60, %v3713_v29  ;;  %v3043_v58 = vmul.f32 %v7342_v28, %v7436_v63 }
 0x3a4   : > { %v2914_v31 = vmax.f32 %v2781_v37, 0.0  ;;  %v2785_v30 = vadd.f32 %v2784_v54, %v7319_v16  ;;  %3106 = vadd.xlane.f32.xlu0 %v7450_v57  ;;  %3109 = vadd.xlane.f32.xlu1 %v3108_v36  ;;  %v7534_v43 = vadd.f32 %v3880_v1, %v3879_v62  ;;  %v7536_v13 = vadd.f32 %v3882_v15, %v3881_v0 }
 0x3a5   : > { %v7539_v51 = vadd.f32 %v2913_v25, %v7099_v42  ;;  %v2915_v39 = vmax.f32 %v2783_v49, 0.0  ;;  %v3044_v2 = vmul.f32 %v7354_v7, %v7443_v45  ;;  %v3045_v9 = vmul.f32 %v7342_v28, %v7448_v61 }
 0x3a6   : > { %v7546_v29 = vadd.f32 %v2914_v31, %v7093_v26  ;;  %v2916_v34 = vmax.f32 %v2785_v30, 0.0  ;;  %v3046_v57 = vmul.f32 %v7354_v7, %v7457_v14  ;;  %v3211_v36 = vmul.f32 %v7334_v41, %v7436_v63 }
 0x3a7   : > { %v7553_v42 = vadd.f32 %v2915_v39, %v7090_v19  ;;  %v7555_v52 = vadd.f32 %v3044_v2, %v3043_v58  ;;  %v3212_v60 = vmul.f32 %v7351_v11, %v7443_v45  ;;  %v3213_v62 = vmul.f32 %v7334_v41, %v7448_v61 }
 0x3a8   : > { %v7562_v26 = vadd.f32 %v2916_v34, %v7096_v53  ;;  %v2788_v37 = vpop.f32.mrb[52].mxu0  ;;  %3274 = vadd.xlane.f32.xlu0 %v7469_v24  ;;  %3277 = vadd.xlane.f32.xlu1 %v3276_v56  ;;  %v7565_v17 = vadd.f32 %v3046_v57, %v3045_v9  ;;  %v3214_v19 = vmul.f32 %v7351_v11, %v7457_v14 }
 0x3a9   : > { %v2789_v1 = vadd.f32 %v2788_v37, %v7313_v22  ;;  %v2790_v0 = vpop.f32.mrb[53].mxu0  ;;  %v7570_v15 = vadd.f32 %v3212_v60, %v3211_v36  ;;  %v3379_v25 = vmul.f32 %v7345_v18, %v7436_v63  ;;  %v3380_v53 = vmul.f32 %v7360_v55, %v7443_v45 }
 0x3aa   : > { %v2791_v49 = vadd.f32 %v2790_v0, %v7319_v16  ;;  %v2792_v24 = vpop.f32.mrb[54].mxu0  ;;  %v7577_v56 = vadd.f32 %v3214_v19, %v3213_v62  ;;  %v3381_v54 = vmul.f32 %v7345_v18, %v7448_v61  ;;  %v3382_v58 = vmul.f32 %v7360_v55, %v7457_v14 }
 0x3ab   : > { %v2917_v31 = vmax.f32 %v2789_v1, 0.0  ;;  %v2793_v30 = vadd.f32 %v2792_v24, %v7313_v22  ;;  %v2794_v39 = vpop.f32.mrb[55].mxu0  ;;  %v7584_v2 = vadd.f32 %v3380_v53, %v3379_v25  ;;  %v3547_v9 = vmul.f32 %v7363_v33, %v7436_v63 }
 0x3ac   : > { %v2918_v34 = vmax.f32 %v2791_v49, 0.0  ;;  %v2795_v57 = vadd.f32 %v2794_v39, %v7319_v16  ;;  %3442 = vadd.xlane.f32.xlu0 %v7479_v23  ;;  %3445 = vadd.xlane.f32.xlu1 %v7486_v46  ;;  %v7591_v36 = vadd.f32 %v3382_v58, %v3381_v54  ;;  %v3548_v60 = vmul.f32 %v7365_v20, %v7443_v45 }
 0x3ad   : > { %v7596_v62 = vadd.f32 %v2917_v31, %v7119_v5  ;;  %v2919_v37 = vmax.f32 %v2793_v30, 0.0  ;;  %v3549_v19 = vmul.f32 %v7363_v33, %v7448_v61  ;;  %v3550_v1 = vmul.f32 %v7365_v20, %v7457_v14 }
 0x3ae   : > { %v7603_v0 = vadd.f32 %v2918_v34, %v7113_v32  ;;  %v2920_v23 = vmax.f32 %v2795_v57, 0.0  ;;  %v7605_v46 = vadd.f32 %v3548_v60, %v3547_v9  ;;  %v3715_v25 = vmul.f32 %v7369_v4, %v7436_v63 }
 0x3af   : > { %v7610_v53 = vadd.f32 %v2919_v37, %v7110_v59  ;;  %v7612_v5 = vadd.f32 %v3550_v1, %v3549_v19  ;;  %v3716_v49 = vmul.f32 %v7372_v35, %v7443_v45  ;;  %v3717_v24 = vmul.f32 %v7369_v4, %v7448_v61 }
 0x3b0   : > { %v7619_v32 = vadd.f32 %v2920_v23, %v7116_v40  ;;  %v2798_v54 = vpop.f32.mrb[56].mxu0  ;;  %3610 = vadd.xlane.f32.xlu0 %v7500_v12  ;;  %3613 = vadd.xlane.f32.xlu1 %v7509_v10  ;;  %v3718_v59 = vmul.f32 %v7372_v35, %v7457_v14  ;;  %v3883_v58 = vmul.f32 %v7376_v48, %v7436_v63 }
 0x3b1   : > { %v2799_v31 = vadd.f32 %v2798_v54, %v7313_v22  ;;  %v2800_v30 = vpop.f32.mrb[57].mxu0  ;;  %v7628_v39 = vadd.f32 %v3716_v49, %v3715_v25  ;;  %v3884_v40 = vmul.f32 %v7379_v50, %v7443_v45  ;;  %v3885_v9 = vmul.f32 %v7376_v48, %v7448_v61 }
 0x3b2   : > { %v2801_v12 = vadd.f32 %v2800_v30, %v7319_v16  ;;  %v2802_v10 = vpop.f32.mrb[58].mxu0  ;;  %v7635_v34 = vadd.f32 %v3718_v59, %v3717_v24  ;;  %v3886_v57 = vmul.f32 %v7379_v50, %v7457_v14  ;;  %v3047_v63 = vmul.f32 %v7342_v28, %v7484_v6  ;;  %v9924_v30 = vld [vmem:[#allocation28_spill] sm:$0xff] }
 0x3b3   : > { %v2921_v60 = vmax.f32 %v2799_v31, 0.0  ;;  %v2803_v37 = vadd.f32 %v2802_v10, %v7313_v22  ;;  %v2804_v19 = vpop.f32.mrb[59].mxu0  ;;  %v7642_v1 = vadd.f32 %v3884_v40, %v3883_v58  ;;  %v3048_v45 = vmul.f32 %v7354_v7, %v7491_v3 }
 0x3b4   : > { %v2922_v61 = vmax.f32 %v2801_v12, 0.0  ;;  %v2805_v23 = vadd.f32 %v2804_v19, %v7319_v16  ;;  %3778 = vadd.xlane.f32.xlu0 %v7514_v44  ;;  %3781 = vadd.xlane.f32.xlu1 %v7528_v21  ;;  %v7649_v14 = vadd.f32 %v3886_v57, %v3885_v9  ;;  %v3049_v25 = vmul.f32 %v7342_v28, %v7498_v27 }
 0x3b5   : > { %v7654_v49 = vadd.f32 %v2921_v60, %v7139_v8  ;;  %v2923_v24 = vmax.f32 %v2803_v37, 0.0  ;;  %v7656_v54 = vadd.f32 %v3048_v45, %v3047_v63  ;;  %v3050_v59 = vmul.f32 %v7354_v7, %v7507_v38 }
 0x3b6   : > { %v7661_v58 = vadd.f32 %v2922_v61, %v7133_v47  ;;  %v2924_v44 = vmax.f32 %v2805_v23, 0.0  ;;  %v3215_v21 = vmul.f32 %v7334_v41, %v7484_v6  ;;  %v3216_v31 = vmul.f32 %v7351_v11, %v7491_v3  ;;  %v9925_v47 = vld [vmem:[#allocation33_spill] sm:$0xff] }
 0x3b7   : > { %v7668_v40 = vadd.f32 %v2923_v24, %v9924_v30  ;;  %v7670_v8 = vadd.f32 %v3050_v59, %v3049_v25  ;;  %v3217_v9 = vmul.f32 %v7334_v41, %v7498_v27  ;;  %v3218_v12 = vmul.f32 %v7351_v11, %v7507_v38 }
 0x3b8   : > { %v7677_v10 = vadd.f32 %v2924_v44, %v9925_v47  ;;  %3946 = vadd.xlane.f32.xlu0 %v7534_v43  ;;  %3949 = vadd.xlane.f32.xlu1 %v7536_v13  ;;  %v7681_v57 = vadd.f32 %v3216_v31, %v3215_v21  ;;  %v3383_v63 = vmul.f32 %v7345_v18, %v7484_v6 }
 0x3b9   : > { %v7685_v60 = vadd.f32 %v3218_v12, %v3217_v9  ;;  %v3384_v37 = vmul.f32 %v7360_v55, %v7491_v3  ;;  %v3385_v19 = vmul.f32 %v7345_v18, %v7498_v27  ;;  %v3386_v45 = vmul.f32 %v7360_v55, %v7507_v38 }
 0x3ba   : > { %v3551_v43 = vmul.f32 %v7363_v33, %v7484_v6  ;;  %v3552_v13 = vmul.f32 %v7365_v20, %v7491_v3  ;;  %v3553_v61 = vmul.f32 %v7363_v33, %v7498_v27  ;;  %v3554_v23 = vmul.f32 %v7365_v20, %v7507_v38 }
 0x3bb   : > { %v7701_v25 = vadd.f32 %v3384_v37, %v3383_v63  ;;  %v7703_v24 = vadd.f32 %v3386_v45, %v3385_v19  ;;  %v3719_v59 = vmul.f32 %v7369_v4, %v7484_v6  ;;  %v3720_v44 = vmul.f32 %v7372_v35, %v7491_v3 }
 0x3bc   : > { %3112 = vadd.xlane.f32.xlu0 %v7555_v52  ;;  %3115 = vadd.xlane.f32.xlu1 %v7565_v17  ;;  %v7711_v21 = vadd.f32 %v3552_v13, %v3551_v43  ;;  %v7713_v31 = vadd.f32 %v3554_v23, %v3553_v61  ;;  %v3721_v30 = vmul.f32 %v7369_v4, %v7498_v27 }
 0x3bd   : > { %v7717_v9 = vadd.f32 %v3720_v44, %v3719_v59  ;;  %v3722_v12 = vmul.f32 %v7372_v35, %v7507_v38  ;;  %v3887_v47 = vmul.f32 %v7376_v48, %v7484_v6  ;;  %v3888_v52 = vmul.f32 %v7379_v50, %v7491_v3 }
 0x3be   : > { %v3889_v17 = vmul.f32 %v7376_v48, %v7498_v27  ;;  %v3890_v63 = vmul.f32 %v7379_v50, %v7507_v38  ;;  %v3051_v37 = vmul.f32 %v7342_v28, %v7539_v51  ;;  %v3052_v19 = vmul.f32 %v7354_v7, %v7546_v29 }
 0x3bf   : > { %v7733_v45 = vadd.f32 %v3722_v12, %v3721_v30  ;;  %v7735_v43 = vadd.f32 %v3888_v52, %v3887_v47  ;;  %v3053_v6 = vmul.f32 %v7342_v28, %v7553_v42  ;;  %v3054_v3 = vmul.f32 %v7354_v7, %v7562_v26 }
 0x3c0   : > { %v2808_v27 = vpop.f32.mrb[60].mxu0  ;;  %3280 = vadd.xlane.f32.xlu0 %v7570_v15  ;;  %3283 = vadd.xlane.f32.xlu1 %v7577_v56  ;;  %v7743_v38 = vadd.f32 %v3890_v63, %v3889_v17  ;;  %v7745_v13 = vadd.f32 %v3052_v19, %v3051_v37  ;;  %v3219_v61 = vmul.f32 %v7334_v41, %v7539_v51 }
 0x3c1   : > { %v2809_v23 = vadd.f32 %v2808_v27, %v7313_v22  ;;  %v2810_v59 = vpop.f32.mrb[61].mxu0  ;;  %v7750_v44 = vadd.f32 %v3054_v3, %v3053_v6  ;;  %v3220_v30 = vmul.f32 %v7351_v11, %v7546_v29  ;;  %v3221_v15 = vmul.f32 %v7334_v41, %v7553_v42 }
 0x3c2   : > { %9926 = vst [vmem:[#allocation29_spill] sm:$0xff] %v7743_v38  ;;  %9927 = vst [vmem:[#allocation8_spill] sm:$0xff] %v7745_v13  ;;  %v2811_v56 = vadd.f32 %v2810_v59, %v7319_v16  ;;  %v2812_v12 = vpop.f32.mrb[62].mxu0  ;;  %v3222_v47 = vmul.f32 %v7351_v11, %v7562_v26  ;;  %v3387_v52 = vmul.f32 %v7345_v18, %v7539_v51 }
 0x3c3   : > { %9928 = vst [vmem:[#allocation5_spill] sm:$0xff] %v7750_v44  ;;  %v3388_v17 = vmul.f32 %v7360_v55, %v7546_v29  ;;  %v2925_v63 = vmax.f32 %v2809_v23, 0.0  ;;  %v2813_v37 = vadd.f32 %v2812_v12, %v7313_v22  ;;  %v2814_v19 = vpop.f32.mrb[63].mxu0  ;;  %v7764_v6 = vadd.f32 %v3220_v30, %v3219_v61  ;;  %v9929_v23 = vld [vmem:[#allocation6_spill] sm:$0xff] }
 0x3c4   : > { %v3389_v3 = vmul.f32 %v7345_v18, %v7553_v42  ;;  %v2926_v27 = vmax.f32 %v2811_v56, 0.0  ;;  %v2815_v59 = vadd.f32 %v2814_v19, %v7319_v16  ;;  %3448 = vadd.xlane.f32.xlu0 %v7584_v2  ;;  %3451 = vadd.xlane.f32.xlu1 %v7591_v36  ;;  %v7771_v44 = vadd.f32 %v3222_v47, %v3221_v15  ;;  %v9930_v56 = vld [vmem:[#allocation32_spill] sm:$0xff] }
 0x3c5   : > { %v7773_v13 = vadd.f32 %v3388_v17, %v3387_v52  ;;  %v7776_v38 = vadd.f32 %v2925_v63, %v9929_v23  ;;  %v2927_v12 = vmax.f32 %v2813_v37, 0.0  ;;  %v3390_v61 = vmul.f32 %v7360_v55, %v7562_v26  ;;  %v9931_v47 = vld [vmem:[#allocation12_spill] sm:$0xff] }
 0x3c6   : > { %v3555_v30 = vmul.f32 %v7363_v33, %v7539_v51  ;;  %v7783_v19 = vadd.f32 %v2926_v27, %v9930_v56  ;;  %v2928_v2 = vmax.f32 %v2815_v59, 0.0  ;;  %v3556_v36 = vmul.f32 %v7365_v20, %v7546_v29  ;;  %v9932_v27 = vld [vmem:[#allocation31_spill] sm:$0xff] }
 0x3c7   : > { %v3557_v15 = vmul.f32 %v7363_v33, %v7553_v42  ;;  %v7790_v52 = vadd.f32 %v2927_v12, %v9931_v47  ;;  %v7792_v17 = vadd.f32 %v3390_v61, %v3389_v3  ;;  %v3558_v63 = vmul.f32 %v7365_v20, %v7562_v26 }
 0x3c8   : > { %v3723_v37 = vmul.f32 %v7369_v4, %v7539_v51  ;;  %v7799_v23 = vadd.f32 %v2928_v2, %v9932_v27  ;;  %3616 = vadd.xlane.f32.xlu0 %v7605_v46  ;;  %3619 = vadd.xlane.f32.xlu1 %v7612_v5  ;;  %v7803_v59 = vadd.f32 %v3556_v36, %v3555_v30 }
 0x3c9   : > { %v3724_v12 = vmul.f32 %v7372_v35, %v7546_v29  ;;  %v7807_v3 = vadd.f32 %v3558_v63, %v3557_v15  ;;  %v3725_v61 = vmul.f32 %v7369_v4, %v7553_v42  ;;  %v3726_v56 = vmul.f32 %v7372_v35, %v7562_v26 }
 0x3ca   : > { %v3891_v2 = vmul.f32 %v7376_v48, %v7539_v51  ;;  %v3892_v46 = vmul.f32 %v7379_v50, %v7546_v29  ;;  %v3893_v5 = vmul.f32 %v7376_v48, %v7553_v42  ;;  %v3894_v30 = vmul.f32 %v7379_v50, %v7562_v26 }
 0x3cb   : > { %v7815_v47 = vadd.f32 %v3724_v12, %v3723_v37  ;;  %v7823_v36 = vadd.f32 %v3726_v56, %v3725_v61  ;;  %v3055_v15 = vmul.f32 %v7342_v28, %v7596_v62  ;;  %v3056_v63 = vmul.f32 %v7354_v7, %v7603_v0 }
 0x3cc   : > { %v3057_v51 = vmul.f32 %v7342_v28, %v7610_v53  ;;  %3784 = vadd.xlane.f32.xlu0 %v7628_v39  ;;  %3787 = vadd.xlane.f32.xlu1 %v7635_v34  ;;  %v7833_v29 = vadd.f32 %v3892_v46, %v3891_v2  ;;  %v7835_v42 = vadd.f32 %v3894_v30, %v3893_v5 }
 0x3cd   : > { %v3058_v26 = vmul.f32 %v7354_v7, %v7619_v32  ;;  %v7839_v37 = vadd.f32 %v3056_v63, %v3055_v15  ;;  %v3223_v27 = vmul.f32 %v7334_v41, %v7596_v62  ;;  %v3224_v12 = vmul.f32 %v7351_v11, %v7603_v0 }
 0x3ce   : > { %v3225_v39 = vmul.f32 %v7334_v41, %v7610_v53  ;;  %v3226_v34 = vmul.f32 %v7351_v11, %v7619_v32  ;;  %v3391_v56 = vmul.f32 %v7345_v18, %v7596_v62  ;;  %v3392_v2 = vmul.f32 %v7360_v55, %v7603_v0 }
 0x3cf   : > { %v7847_v61 = vadd.f32 %v3058_v26, %v3057_v51  ;;  %v7855_v46 = vadd.f32 %v3224_v12, %v3223_v27  ;;  %v3393_v5 = vmul.f32 %v7345_v18, %v7610_v53  ;;  %v3394_v30 = vmul.f32 %v7360_v55, %v7619_v32 }
 0x3d0   : > { %v3559_v15 = vmul.f32 %v7363_v33, %v7596_v62  ;;  %3952 = vadd.xlane.f32.xlu0 %v7642_v1  ;;  %3955 = vadd.xlane.f32.xlu1 %v7649_v14  ;;  %v7865_v63 = vadd.f32 %v3226_v34, %v3225_v39  ;;  %v7867_v51 = vadd.f32 %v3392_v2, %v3391_v56 }
 0x3d1   : > { %9933 = vst [vmem:[#allocation4_spill] sm:$0xff] %v7847_v61  ;;  %9934 = vst [vmem:[#allocation28_spill] sm:$0xff] %v7855_v46  ;;  %v3560_v26 = vmul.f32 %v7365_v20, %v7603_v0  ;;  %v7871_v27 = vadd.f32 %v3394_v30, %v3393_v5  ;;  %v3561_v12 = vmul.f32 %v7363_v33, %v7610_v53 }
 0x3d2   : > { %9935 = vst [vmem:[#allocation33_spill] sm:$0xff] %v7867_v51  ;;  %v3562_v46 = vmul.f32 %v7365_v20, %v7619_v32  ;;  %v3727_v1 = vmul.f32 %v7369_v4, %v7596_v62  ;;  %v3728_v14 = vmul.f32 %v7372_v35, %v7603_v0  ;;  %v3729_v39 = vmul.f32 %v7369_v4, %v7610_v53 }
 0x3d3   : > { %9936 = vst [vmem:[#allocation6_spill] sm:$0xff] %v7871_v27  ;;  %v7879_v61 = vadd.f32 %v3560_v26, %v3559_v15  ;;  %v3730_v34 = vmul.f32 %v7372_v35, %v7619_v32  ;;  %v2818_v56 = vpop.f32.mrb[64].mxu0  ;;  %v3895_v5 = vmul.f32 %v7376_v48, %v7596_v62  ;;  %v3896_v30 = vmul.f32 %v7379_v50, %v7603_v0 }
 0x3d4   : > { %v7887_v2 = vadd.f32 %v3562_v46, %v3561_v12  ;;  %v3897_v15 = vmul.f32 %v7376_v48, %v7610_v53  ;;  %v2819_v26 = vadd.f32 %v2818_v56, %v7313_v22  ;;  %3118 = vadd.xlane.f32.xlu0 %v7656_v54  ;;  %3121 = vadd.xlane.f32.xlu1 %v7670_v8 }
 0x3d5   : > { %9937 = vst [vmem:[#allocation32_spill] sm:$0xff] %v7879_v61  ;;  %v2820_v61 = vpop.f32.mrb[65].mxu0  ;;  %v7898_v27 = vadd.f32 %v3728_v14, %v3727_v1  ;;  %v7900_v46 = vadd.f32 %v3730_v34, %v3729_v39  ;;  %v3898_v0 = vmul.f32 %v7379_v50, %v7619_v32  ;;  %v3059_v53 = vmul.f32 %v7342_v28, %v7654_v49  ;;  %v9939_v34 = vld [vmem:[#allocation35_spill] sm:$0xff] }
 0x3d6   : > { %9938 = vst [vmem:[#allocation12_spill] sm:$0xff] %v7887_v2  ;;  %v2821_v12 = vadd.f32 %v2820_v61, %v7319_v16  ;;  %v2822_v62 = vpop.f32.mrb[66].mxu0  ;;  %v7903_v2 = vadd.f32 %v3896_v30, %v3895_v5  ;;  %v2929_v56 = vmax.f32 %v2819_v26, 0.0  ;;  %v3060_v8 = vmul.f32 %v7354_v7, %v7661_v58 }
 0x3d7   : > { %v2823_v54 = vadd.f32 %v2822_v62, %v7313_v22  ;;  %v2824_v51 = vpop.f32.mrb[67].mxu0  ;;  %v3061_v1 = vmul.f32 %v7342_v28, %v7668_v40  ;;  %v7915_v39 = vadd.f32 %v3898_v0, %v3897_v15  ;;  %v3062_v32 = vmul.f32 %v7354_v7, %v7677_v10  ;;  %v9940_v62 = vld [vmem:[#allocation7_spill] sm:$0xff] }
 0x3d8   : > { %v2930_v61 = vmax.f32 %v2821_v12, 0.0  ;;  %v2825_v14 = vadd.f32 %v2824_v51, %v7319_v16  ;;  %v7920_v5 = vadd.f32 %v2929_v56, %v9939_v34  ;;  %3286 = vadd.xlane.f32.xlu0 %v7681_v57  ;;  %3289 = vadd.xlane.f32.xlu1 %v7685_v60  ;;  %v7924_v26 = vadd.f32 %v3060_v8, %v3059_v53  ;;  %v9941_v34 = vld [vmem:[#allocation13_spill] sm:$0xff]  ;;  %v9942_v8 = vld [vmem:[#allocation34_spill] sm:$0xff] }
 0x3d9   : > { %v2931_v30 = vmax.f32 %v2823_v54, 0.0  ;;  %v3227_v12 = vmul.f32 %v7334_v41, %v7654_v49  ;;  %v7931_v0 = vadd.f32 %v3062_v32, %v3061_v1  ;;  %v3228_v56 = vmul.f32 %v7351_v11, %v7661_v58 }
 0x3da   : > { %v7929_v51 = vadd.f32 %v2930_v61, %v9940_v62  ;;  %v2932_v15 = vmax.f32 %v2825_v14, 0.0  ;;  %v3229_v57 = vmul.f32 %v7334_v41, %v7668_v40  ;;  %v3230_v60 = vmul.f32 %v7351_v11, %v7677_v10 }
 0x3db   : > { %v7936_v54 = vadd.f32 %v2931_v30, %v9941_v34  ;;  %v3395_v53 = vmul.f32 %v7345_v18, %v7654_v49  ;;  %v7947_v1 = vadd.f32 %v3228_v56, %v3227_v12  ;;  %v3396_v14 = vmul.f32 %v7360_v55, %v7661_v58 }
 0x3dc   : > { %v7945_v61 = vadd.f32 %v2932_v15, %v9942_v8  ;;  %v3397_v32 = vmul.f32 %v7345_v18, %v7668_v40  ;;  %3454 = vadd.xlane.f32.xlu0 %v7701_v25  ;;  %3457 = vadd.xlane.f32.xlu1 %v7703_v24  ;;  %v7955_v30 = vadd.f32 %v3230_v60, %v3229_v57 }
 0x3dd   : > { %v3398_v62 = vmul.f32 %v7360_v55, %v7677_v10  ;;  %v3563_v15 = vmul.f32 %v7363_v33, %v7654_v49  ;;  %v7961_v12 = vadd.f32 %v3396_v14, %v3395_v53  ;;  %v3564_v56 = vmul.f32 %v7365_v20, %v7661_v58 }
 0x3de   : > { %v3565_v34 = vmul.f32 %v7363_v33, %v7668_v40  ;;  %v3566_v25 = vmul.f32 %v7365_v20, %v7677_v10  ;;  %v3731_v57 = vmul.f32 %v7369_v4, %v7654_v49  ;;  %v3732_v60 = vmul.f32 %v7372_v35, %v7661_v58 }
 0x3df   : > { %9943 = vst [vmem:[#allocation31_spill] sm:$0xff] %v7961_v12  ;;  %v7969_v24 = vadd.f32 %v3398_v62, %v3397_v32  ;;  %v3733_v53 = vmul.f32 %v7369_v4, %v7668_v40  ;;  %v7977_v8 = vadd.f32 %v3564_v56, %v3563_v15  ;;  %v3734_v12 = vmul.f32 %v7372_v35, %v7677_v10 }
 0x3e0   : > { %v7979_v14 = vadd.f32 %v3566_v25, %v3565_v34  ;;  %v3899_v32 = vmul.f32 %v7376_v48, %v7654_v49  ;;  %3622 = vadd.xlane.f32.xlu0 %v7711_v21  ;;  %3625 = vadd.xlane.f32.xlu1 %v7713_v31  ;;  %v7987_v62 = vadd.f32 %v3732_v60, %v3731_v57 }
 0x3e1   : > { %9944 = vst [vmem:[#allocation35_spill] sm:$0xff] %v7969_v24  ;;  %v3900_v24 = vmul.f32 %v7379_v50, %v7661_v58  ;;  %v3901_v15 = vmul.f32 %v7376_v48, %v7668_v40  ;;  %v7993_v56 = vadd.f32 %v3734_v12, %v3733_v53  ;;  %v3902_v34 = vmul.f32 %v7379_v50, %v7677_v10 }
 0x3e2   : > { %v3063_v49 = vmul.f32 %v7342_v28, %v7776_v38  ;;  %v3064_v21 = vmul.f32 %v7354_v7, %v7783_v19  ;;  %v3065_v25 = vmul.f32 %v7342_v28, %v7790_v52  ;;  %v3066_v58 = vmul.f32 %v7354_v7, %v7799_v23 }
 0x3e3   : > { %9945 = vst [vmem:[#allocation7_spill] sm:$0xff] %v7993_v56  ;;  %v8001_v31 = vadd.f32 %v3900_v24, %v3899_v32  ;;  %v3231_v40 = vmul.f32 %v7334_v41, %v7776_v38  ;;  %v8009_v12 = vadd.f32 %v3902_v34, %v3901_v15  ;;  %v3232_v57 = vmul.f32 %v7351_v11, %v7783_v19 }
 0x3e4   : > { %v8011_v10 = vadd.f32 %v3064_v21, %v3063_v49  ;;  %v3233_v24 = vmul.f32 %v7334_v41, %v7790_v52  ;;  %3790 = vadd.xlane.f32.xlu0 %v7717_v9  ;;  %3793 = vadd.xlane.f32.xlu1 %v7733_v45  ;;  %v8019_v60 = vadd.f32 %v3066_v58, %v3065_v25 }
 0x3e5   : > { %9946 = vst [vmem:[#allocation13_spill] sm:$0xff] %v8001_v31  ;;  %9947 = vst [vmem:[#allocation34_spill] sm:$0xff] %v8009_v12  ;;  %v3234_v53 = vmul.f32 %v7351_v11, %v7799_v23  ;;  %v3399_v32 = vmul.f32 %v7345_v18, %v7776_v38  ;;  %v8025_v15 = vadd.f32 %v3232_v57, %v3231_v40  ;;  %v9954_v12 = vld [vmem:[#allocation29_spill] sm:$0xff] }
 0x3e6   : > { %9948 = vst [vmem:[#allocation44_spill] sm:$0xff] %v8011_v10  ;;  %9949 = vst [vmem:[#allocation45_spill] sm:$0xff] %v8019_v60  ;;  %v3400_v34 = vmul.f32 %v7360_v55, %v7783_v19  ;;  %v3401_v49 = vmul.f32 %v7345_v18, %v7790_v52  ;;  %v3402_v9 = vmul.f32 %v7360_v55, %v7799_v23  ;;  %v2828_v45 = vpop.f32.mrb[68].mxu0 }
 0x3e7   : > { %9950 = vst [vmem:[#allocation46_spill] sm:$0xff] %v8025_v15  ;;  %v8033_v21 = vadd.f32 %v3234_v53, %v3233_v24  ;;  %v3567_v25 = vmul.f32 %v7363_v33, %v7776_v38  ;;  %v3568_v58 = vmul.f32 %v7365_v20, %v7783_v19  ;;  %v3569_v40 = vmul.f32 %v7363_v33, %v7790_v52  ;;  %v2830_v15 = vpop.f32.mrb[69].mxu0 }
 0x3e8   : > { %v2829_v57 = vadd.f32 %v2828_v45, %v7313_v22  ;;  %v8042_v60 = vadd.f32 %v3400_v34, %v3399_v32  ;;  %v8044_v10 = vadd.f32 %v3402_v9, %v3401_v49  ;;  %v3570_v24 = vmul.f32 %v7365_v20, %v7799_v23  ;;  %3958 = vadd.xlane.f32.xlu0 %v7735_v43 }
 0x3e9   : > { %9951 = vst [vmem:[#allocation47_spill] sm:$0xff] %v8033_v21  ;;  %v2831_v53 = vadd.f32 %v2830_v15, %v7319_v16  ;;  %v2832_v21 = vpop.f32.mrb[70].mxu0  ;;  %3961 = vadd.xlane.f32.xlu1 %v9954_v12  ;;  %v8051_v31 = vadd.f32 %v3568_v58, %v3567_v25  ;;  %v3735_v45 = vmul.f32 %v7369_v4, %v7776_v38  ;;  %v9957_v25 = vld [vmem:[#allocation14_spill] sm:$0xff] }
 0x3ea   : > { %9952 = vst [vmem:[#allocation48_spill] sm:$0xff] %v8042_v60  ;;  %9953 = vst [vmem:[#allocation49_spill] sm:$0xff] %v8044_v10  ;;  %v2933_v56 = vmax.f32 %v2829_v57, 0.0  ;;  %v2833_v32 = vadd.f32 %v2832_v21, %v7313_v22  ;;  %v2834_v34 = vpop.f32.mrb[71].mxu0  ;;  %v8056_v49 = vadd.f32 %v3570_v24, %v3569_v40  ;;  %v3736_v9 = vmul.f32 %v7372_v35, %v7783_v19  ;;  %v9958_v24 = vld [vmem:[#allocation37_spill] sm:$0xff] }
 0x3eb   : > { %9955 = vst [vmem:[#allocation29_spill] sm:$0xff] %v8051_v31  ;;  %v2934_v15 = vmax.f32 %v2831_v53, 0.0  ;;  %v2835_v10 = vadd.f32 %v2834_v34, %v7319_v16  ;;  %v3737_v43 = vmul.f32 %v7369_v4, %v7790_v52  ;;  %v3738_v12 = vmul.f32 %v7372_v35, %v7799_v23  ;;  %v9959_v34 = vld [vmem:[#allocation8_spill] sm:$0xff]  ;;  %v9960_v31 = vld [vmem:[#allocation5_spill] sm:$0xff] }
 0x3ec   : > { %9956 = vst [vmem:[#allocation50_spill] sm:$0xff] %v8056_v49  ;;  %v8066_v58 = vadd.f32 %v2933_v56, %v9957_v25  ;;  %v2935_v57 = vmax.f32 %v2833_v32, 0.0  ;;  %v8068_v21 = vadd.f32 %v3736_v9, %v3735_v45  ;;  %v3903_v40 = vmul.f32 %v7376_v48, %v7776_v38  ;;  %3124 = vadd.xlane.f32.xlu0 %v9959_v34  ;;  %v9961_v25 = vld [vmem:[#allocation36_spill] sm:$0xff]  ;;  %v9962_v9 = vld [vmem:[#allocation38_spill] sm:$0xff] }
 0x3ed   : > { %v8073_v49 = vadd.f32 %v2934_v15, %v9958_v24  ;;  %v2936_v53 = vmax.f32 %v2835_v10, 0.0  ;;  %3127 = vadd.xlane.f32.xlu1 %v9960_v31  ;;  %v8077_v60 = vadd.f32 %v3738_v12, %v3737_v43  ;;  %v3904_v56 = vmul.f32 %v7379_v50, %v7783_v19 }
 0x3ee   : > { %v8082_v32 = vadd.f32 %v2935_v57, %v9961_v25  ;;  %v3905_v45 = vmul.f32 %v7376_v48, %v7790_v52  ;;  %v3906_v38 = vmul.f32 %v7379_v50, %v7799_v23  ;;  %v3067_v10 = vmul.f32 %v7342_v28, %v7920_v5 }
 0x3ef   : > { %v8091_v15 = vadd.f32 %v2936_v53, %v9962_v9  ;;  %v8093_v31 = vadd.f32 %v3904_v56, %v3903_v40  ;;  %v3068_v19 = vmul.f32 %v7354_v7, %v7929_v51  ;;  %v3069_v43 = vmul.f32 %v7342_v28, %v7936_v54 }
 0x3f0   : > { %v8099_v12 = vadd.f32 %v3906_v38, %v3905_v45  ;;  %v3070_v52 = vmul.f32 %v7354_v7, %v7945_v61  ;;  %v3235_v23 = vmul.f32 %v7334_v41, %v7920_v5  ;;  %v3236_v57 = vmul.f32 %v7351_v11, %v7929_v51  ;;  %3292 = vadd.xlane.f32.xlu0 %v7764_v6 }
 0x3f1   : > { %3295 = vadd.xlane.f32.xlu1 %v7771_v44  ;;  %v8109_v40 = vadd.f32 %v3068_v19, %v3067_v10  ;;  %v3237_v24 = vmul.f32 %v7334_v41, %v7936_v54  ;;  %v3238_v53 = vmul.f32 %v7351_v11, %v7945_v61  ;;  %v3403_v25 = vmul.f32 %v7345_v18, %v7920_v5 }
 0x3f2   : > { %v8115_v34 = vadd.f32 %v3070_v52, %v3069_v43  ;;  %v8117_v56 = vadd.f32 %v3236_v57, %v3235_v23  ;;  %v3404_v6 = vmul.f32 %v7360_v55, %v7929_v51  ;;  %v3405_v44 = vmul.f32 %v7345_v18, %v7936_v54 }
 0x3f3   : > { %v8123_v45 = vadd.f32 %v3238_v53, %v3237_v24  ;;  %v3406_v38 = vmul.f32 %v7360_v55, %v7945_v61  ;;  %v3571_v10 = vmul.f32 %v7363_v33, %v7920_v5  ;;  %v3572_v19 = vmul.f32 %v7365_v20, %v7929_v51 }
 0x3f4   : > { %v8131_v9 = vadd.f32 %v3404_v6, %v3403_v25  ;;  %v3573_v43 = vmul.f32 %v7363_v33, %v7936_v54  ;;  %v3574_v52 = vmul.f32 %v7365_v20, %v7945_v61  ;;  %3460 = vadd.xlane.f32.xlu0 %v7773_v13  ;;  %v3739_v57 = vmul.f32 %v7369_v4, %v7920_v5 }
 0x3f5   : > { %3463 = vadd.xlane.f32.xlu1 %v7792_v17  ;;  %v8141_v23 = vadd.f32 %v3406_v38, %v3405_v44  ;;  %v3740_v24 = vmul.f32 %v7372_v35, %v7929_v51  ;;  %v8147_v53 = vadd.f32 %v3572_v19, %v3571_v10  ;;  %v3741_v6 = vmul.f32 %v7369_v4, %v7936_v54 }
 0x3f6   : > { %9963 = vst [vmem:[#allocation14_spill] sm:$0xff] %v8131_v9  ;;  %v8149_v25 = vadd.f32 %v3574_v52, %v3573_v43  ;;  %v3742_v13 = vmul.f32 %v7372_v35, %v7945_v61  ;;  %v3907_v17 = vmul.f32 %v7376_v48, %v7920_v5  ;;  %v3908_v44 = vmul.f32 %v7379_v50, %v7929_v51 }
 0x3f7   : > { %v8155_v9 = vadd.f32 %v3740_v24, %v3739_v57  ;;  %v3909_v38 = vmul.f32 %v7376_v48, %v7936_v54  ;;  %v3910_v19 = vmul.f32 %v7379_v50, %v7945_v61  ;;  %v3071_v43 = vmul.f32 %v7342_v28, %v8066_v58 }
 0x3f8   : > { %v8163_v10 = vadd.f32 %v3742_v13, %v3741_v6  ;;  %v3072_v52 = vmul.f32 %v7354_v7, %v8073_v49  ;;  %3628 = vadd.xlane.f32.xlu0 %v7803_v59  ;;  %v8173_v5 = vadd.f32 %v3908_v44, %v3907_v17  ;;  %v3073_v51 = vmul.f32 %v7342_v28, %v8082_v32 }
 0x3f9   : > { %3631 = vadd.xlane.f32.xlu1 %v7807_v3  ;;  %v3074_v54 = vmul.f32 %v7354_v7, %v8091_v15  ;;  %v2838_v57 = vpop.f32.mrb[72].mxu0  ;;  %v8179_v61 = vadd.f32 %v3910_v19, %v3909_v38  ;;  %v3239_v6 = vmul.f32 %v7334_v41, %v8066_v58  ;;  %v3240_v59 = vmul.f32 %v7351_v11, %v8073_v49 }
 0x3fa   : > { %9964 = vst [vmem:[#allocation37_spill] sm:$0xff] %v8163_v10  ;;  %9965 = vst [vmem:[#allocation8_spill] sm:$0xff] %v8173_v5  ;;  %v8181_v24 = vadd.f32 %v3072_v52, %v3071_v43  ;;  %v2839_v3 = vadd.f32 %v2838_v57, %v7313_v22  ;;  %v2840_v13 = vpop.f32.mrb[73].mxu0  ;;  %v3241_v44 = vmul.f32 %v7334_v41, %v8082_v32  ;;  %v9972_v5 = vld [vmem:[#allocation18_spill] sm:$0xff] }
 0x3fb   : > { %9966 = vst [vmem:[#allocation5_spill] sm:$0xff] %v8179_v61  ;;  %v8188_v17 = vadd.f32 %v3074_v54, %v3073_v51  ;;  %v3242_v38 = vmul.f32 %v7351_v11, %v8091_v15  ;;  %v2841_v19 = vadd.f32 %v2840_v13, %v7319_v16  ;;  %v2842_v43 = vpop.f32.mrb[74].mxu0  ;;  %v8195_v52 = vadd.f32 %v3240_v59, %v3239_v6 }
 0x3fc   : > { %9967 = vst [vmem:[#allocation36_spill] sm:$0xff] %v8181_v24  ;;  %v3407_v24 = vmul.f32 %v7345_v18, %v8066_v58  ;;  %v3408_v57 = vmul.f32 %v7360_v55, %v8073_v49  ;;  %v2937_v61 = vmax.f32 %v2839_v3, 0.0  ;;  %v2843_v51 = vadd.f32 %v2842_v43, %v7313_v22  ;;  %v2844_v54 = vpop.f32.mrb[75].mxu0  ;;  %3796 = vadd.xlane.f32.xlu0 %v7815_v47 }
 0x3fd   : > { %9968 = vst [vmem:[#allocation38_spill] sm:$0xff] %v8188_v17  ;;  %9969 = vst [vmem:[#allocation51_spill] sm:$0xff] %v8195_v52  ;;  %3799 = vadd.xlane.f32.xlu1 %v7823_v36  ;;  %v8204_v17 = vadd.f32 %v3242_v38, %v3241_v44  ;;  %v3409_v6 = vmul.f32 %v7345_v18, %v8082_v32  ;;  %v2938_v59 = vmax.f32 %v2841_v19, 0.0  ;;  %v9973_v44 = vld [vmem:[#allocation15_spill] sm:$0xff] }
 0x3fe   : > { %v2845_v13 = vadd.f32 %v2844_v54, %v7319_v16  ;;  %v8209_v52 = vadd.f32 %v3408_v57, %v3407_v24  ;;  %v3410_v3 = vmul.f32 %v7360_v55, %v8091_v15  ;;  %v3001_v43 = vadd.f32 %v2937_v61, %v9972_v5  ;;  %v9974_v57 = vld [vmem:[#allocation16_spill] sm:$0xff] }
 0x3ff   : > { %9970 = vst [vmem:[#allocation52_spill] sm:$0xff] %v8204_v17  ;;  %v2939_v10 = vmax.f32 %v2843_v51, 0.0  ;;  %v3575_v47 = vmul.f32 %v7363_v33, %v8066_v58  ;;  %v3576_v36 = vmul.f32 %v7365_v20, %v8073_v49  ;;  %v3002_v38 = vadd.f32 %v2938_v59, %v9973_v44  ;;  %v9975_v51 = vld [vmem:[#allocation17_spill] sm:$0xff] }
 0x400   : > { %9971 = vst [vmem:[#allocation53_spill] sm:$0xff] %v8209_v52  ;;  %v2940_v17 = vmax.f32 %v2845_v13, 0.0  ;;  %v8219_v19 = vadd.f32 %v3410_v3, %v3409_v6  ;;  %v3577_v24 = vmul.f32 %v7363_v33, %v8082_v32  ;;  %3964 = vadd.xlane.f32.xlu0 %v7833_v29  ;;  %v3578_v61 = vmul.f32 %v7365_v20, %v8091_v15 }
 0x401   : > { %v3003_v54 = vadd.f32 %v2939_v10, %v9974_v57  ;;  %3967 = vadd.xlane.f32.xlu1 %v7835_v42  ;;  %v8226_v5 = vadd.f32 %v3576_v36, %v3575_v47  ;;  %v3743_v6 = vmul.f32 %v7369_v4, %v8066_v58  ;;  %v3744_v59 = vmul.f32 %v7372_v35, %v8073_v49 }
 0x402   : > { %v3004_v52 = vadd.f32 %v2940_v17, %v9975_v51  ;;  %v3745_v10 = vmul.f32 %v7369_v4, %v8082_v32  ;;  %v8237_v13 = vadd.f32 %v3578_v61, %v3577_v24  ;;  %v3746_v29 = vmul.f32 %v7372_v35, %v8091_v15  ;;  %v9976_v24 = vld [vmem:[#allocation4_spill] sm:$0xff] }
 0x403   : > { %v3911_v42 = vmul.f32 %v7376_v48, %v8066_v58  ;;  %v3912_v17 = vmul.f32 %v7379_v50, %v8073_v49  ;;  %v8245_v3 = vadd.f32 %v3744_v59, %v3743_v6  ;;  %v3913_v47 = vmul.f32 %v7376_v48, %v8082_v32 }
 0x404   : > { %v3914_v36 = vmul.f32 %v7379_v50, %v8091_v15  ;;  %v3075_v44 = vmul.f32 %v7342_v28, %v3001_v43  ;;  %3130 = vadd.xlane.f32.xlu0 %v7839_v37  ;;  %v8254_v57 = vadd.f32 %v3746_v29, %v3745_v10  ;;  %v3076_v49 = vmul.f32 %v7354_v7, %v3002_v38 }
 0x405   : > { %3133 = vadd.xlane.f32.xlu1 %v9976_v24  ;;  %v8256_v58 = vadd.f32 %v3912_v17, %v3911_v42  ;;  %v3077_v51 = vmul.f32 %v7342_v28, %v3003_v54  ;;  %v3078_v32 = vmul.f32 %v7354_v7, %v3004_v52  ;;  %v3243_v15 = vmul.f32 %v7334_v41, %v3001_v43 }
 0x406   : > { %9977 = vst [vmem:[#allocation18_spill] sm:$0xff] %v8254_v57  ;;  %v8259_v61 = vadd.f32 %v3914_v36, %v3913_v47  ;;  %v8264_v6 = vadd.f32 %v3076_v49, %v3075_v44  ;;  %v3244_v37 = vmul.f32 %v7351_v11, %v3002_v38  ;;  %v3245_v59 = vmul.f32 %v7334_v41, %v3003_v54  ;;  %v9982_v36 = vld [vmem:[#allocation28_spill] sm:$0xff] }
 0x407   : > { %9978 = vst [vmem:[#allocation15_spill] sm:$0xff] %v8256_v58  ;;  %v3246_v10 = vmul.f32 %v7351_v11, %v3004_v52  ;;  %v8269_v29 = vadd.f32 %v3078_v32, %v3077_v51  ;;  %v3411_v42 = vmul.f32 %v7345_v18, %v3001_v43  ;;  %v3412_v17 = vmul.f32 %v7360_v55, %v3002_v38 }
 0x408   : > { %9979 = vst [vmem:[#allocation16_spill] sm:$0xff] %v8259_v61  ;;  %9980 = vst [vmem:[#allocation17_spill] sm:$0xff] %v8264_v6  ;;  %v3413_v47 = vmul.f32 %v7345_v18, %v3003_v54  ;;  %3298 = vadd.xlane.f32.xlu0 %v9982_v36  ;;  %v8276_v44 = vadd.f32 %v3244_v37, %v3243_v15  ;;  %v3414_v49 = vmul.f32 %v7360_v55, %v3004_v52 }
 0x409   : > { %9981 = vst [vmem:[#allocation4_spill] sm:$0xff] %v8269_v29  ;;  %3301 = vadd.xlane.f32.xlu1 %v7865_v63  ;;  %v8278_v24 = vadd.f32 %v3246_v10, %v3245_v59  ;;  %v8281_v6 = vadd.f32 %v3412_v17, %v3411_v42  ;;  %v3579_v51 = vmul.f32 %v7363_v33, %v3001_v43 }
 0x40a   : > { %9983 = vst [vmem:[#allocation28_spill] sm:$0xff] %v8276_v44  ;;  %v3580_v32 = vmul.f32 %v7365_v20, %v3002_v38  ;;  %v3581_v29 = vmul.f32 %v7363_v33, %v3003_v54  ;;  %v8286_v61 = vadd.f32 %v3414_v49, %v3413_v47  ;;  %v3582_v36 = vmul.f32 %v7365_v20, %v3004_v52 }
 0x40b   : > { %9984 = vst [vmem:[#allocation54_spill] sm:$0xff] %v8278_v24  ;;  %9985 = vst [vmem:[#allocation55_spill] sm:$0xff] %v8281_v6  ;;  %v3747_v63 = vmul.f32 %v7369_v4, %v3001_v43  ;;  %v3748_v15 = vmul.f32 %v7372_v35, %v3002_v38  ;;  %v3749_v59 = vmul.f32 %v7369_v4, %v3003_v54  ;;  %v9988_v6 = vld [vmem:[#allocation33_spill] sm:$0xff]  ;;  %v9989_v24 = vld [vmem:[#allocation6_spill] sm:$0xff] }
 0x40c   : > { %9986 = vst [vmem:[#allocation56_spill] sm:$0xff] %v8286_v61  ;;  %v8291_v37 = vadd.f32 %v3580_v32, %v3579_v51  ;;  %v3750_v10 = vmul.f32 %v7372_v35, %v3004_v52  ;;  %v3915_v42 = vmul.f32 %v7376_v48, %v3001_v43  ;;  %v2848_v17 = vpop.f32.mrb[76].mxu0  ;;  %3466 = vadd.xlane.f32.xlu0 %v9988_v6 }
 0x40d   : > { %3469 = vadd.xlane.f32.xlu1 %v9989_v24  ;;  %v8298_v47 = vadd.f32 %v3582_v36, %v3581_v29  ;;  %v8300_v49 = vadd.f32 %v3748_v15, %v3747_v63  ;;  %v3916_v61 = vmul.f32 %v7379_v50, %v3002_v38  ;;  %v2849_v51 = vadd.f32 %v2848_v17, %v7313_v22  ;;  %v2850_v32 = vpop.f32.mrb[77].mxu0 }
 0x40e   : > { %9987 = vst [vmem:[#allocation57_spill] sm:$0xff] %v8291_v37  ;;  %v8304_v37 = vadd.f32 %v3750_v10, %v3749_v59  ;;  %v3917_v44 = vmul.f32 %v7376_v48, %v3003_v54  ;;  %v3918_v43 = vmul.f32 %v7379_v50, %v3004_v52  ;;  %v2851_v58 = vadd.f32 %v2850_v32, %v7319_v16  ;;  %v2852_v6 = vpop.f32.mrb[78].mxu0  ;;  %v9991_v59 = vld [vmem:[#allocation32_spill] sm:$0xff]  ;;  %v9993_v54 = vld [vmem:[#allocation19_spill] sm:$0xff] }
 0x40f   : > { %v8309_v57 = vadd.f32 %v3916_v61, %v3915_v42  ;;  %v2941_v29 = vmax.f32 %v2849_v51, 0.0  ;;  %v2853_v24 = vadd.f32 %v2852_v6, %v7313_v22  ;;  %v2854_v36 = vpop.f32.mrb[79].mxu0  ;;  %v9992_v10 = vld [vmem:[#allocation12_spill] sm:$0xff]  ;;  %v9994_v32 = vld [vmem:[#allocation3_spill] sm:$0xff]  ;;  %v9995_v42 = vld [vmem:[#allocation21_spill] sm:$0xff] }
 0x410   : > { %9990 = vst [vmem:[#allocation33_spill] sm:$0xff] %v8304_v37  ;;  %v8312_v63 = vadd.f32 %v3918_v43, %v3917_v44  ;;  %v2942_v38 = vmax.f32 %v2851_v58, 0.0  ;;  %v2855_v15 = vadd.f32 %v2854_v36, %v7319_v16  ;;  %3634 = vadd.xlane.f32.xlu0 %v9991_v59  ;;  %v9996_v43 = vld [vmem:[#allocation20_spill] sm:$0xff] }
 0x411   : > { %3637 = vadd.xlane.f32.xlu1 %v9992_v10  ;;  %v3005_v52 = vadd.f32 %v2941_v29, %v9993_v54  ;;  %v2943_v17 = vmax.f32 %v2853_v24, 0.0 }
 0x412   : > { %v3006_v37 = vadd.f32 %v2942_v38, %v9994_v32  ;;  %v2944_v61 = vmax.f32 %v2855_v15, 0.0 }
 0x413   : > { %v3007_v51 = vadd.f32 %v2943_v17, %v9995_v42  ;;  %v3079_v6 = vmul.f32 %v7342_v28, %v3005_v52  ;;  %v3247_v44 = vmul.f32 %v7334_v41, %v3005_v52  ;;  %v3415_v58 = vmul.f32 %v7345_v18, %v3005_v52 }
 0x414   : > { %v3008_v36 = vadd.f32 %v2944_v61, %v9996_v43  ;;  %3802 = vadd.xlane.f32.xlu0 %v7898_v27  ;;  %v3080_v29 = vmul.f32 %v7354_v7, %v3006_v37  ;;  %v3248_v24 = vmul.f32 %v7351_v11, %v3006_v37  ;;  %v3416_v59 = vmul.f32 %v7360_v55, %v3006_v37 }
 0x415   : > { %3805 = vadd.xlane.f32.xlu1 %v7900_v46  ;;  %v3081_v38 = vmul.f32 %v7342_v28, %v3007_v51  ;;  %v3249_v15 = vmul.f32 %v7334_v41, %v3007_v51  ;;  %v3417_v10 = vmul.f32 %v7345_v18, %v3007_v51  ;;  %v3583_v42 = vmul.f32 %v7363_v33, %v3005_v52 }
 0x416   : > { %v8332_v54 = vadd.f32 %v3080_v29, %v3079_v6  ;;  %v3082_v17 = vmul.f32 %v7354_v7, %v3008_v36  ;;  %v8335_v27 = vadd.f32 %v3248_v24, %v3247_v44  ;;  %v3250_v46 = vmul.f32 %v7351_v11, %v3008_v36 }
 0x417   : > { %v8338_v32 = vadd.f32 %v3416_v59, %v3415_v58  ;;  %v3418_v61 = vmul.f32 %v7360_v55, %v3008_v36  ;;  %v3584_v43 = vmul.f32 %v7365_v20, %v3006_v37  ;;  %v3585_v44 = vmul.f32 %v7363_v33, %v3007_v51 }
 0x418   : > { %9997 = vst [vmem:[#allocation6_spill] sm:$0xff] %v8332_v54  ;;  %9998 = vst [vmem:[#allocation32_spill] sm:$0xff] %v8335_v27  ;;  %3970 = vadd.xlane.f32.xlu0 %v7903_v2  ;;  %v8345_v6 = vadd.f32 %v3082_v17, %v3081_v38  ;;  %v8347_v29 = vadd.f32 %v3250_v46, %v3249_v15  ;;  %v3586_v27 = vmul.f32 %v7365_v20, %v3008_v36 }
 0x419   : > { %9999 = vst [vmem:[#allocation12_spill] sm:$0xff] %v8338_v32  ;;  %3973 = vadd.xlane.f32.xlu1 %v7915_v39  ;;  %v3269_v24 = vpop.xlane.xlu0 %3268  ;;  %v3101_v58 = vpop.xlane.xlu1 %3100  ;;  %v8350_v59 = vadd.f32 %v3418_v61, %v3417_v10  ;;  %v8352_v32 = vadd.f32 %v3584_v43, %v3583_v42  ;;  %v3751_v54 = vmul.f32 %v7369_v4, %v3005_v52 }
 0x41a   : > { %v4036_v2 = vsel %vm4035_vm0, %v3101_v58, %v3269_v24  ;;  %v3752_v39 = vmul.f32 %v7372_v35, %v3006_v37  ;;  %v3753_v38 = vmul.f32 %v7369_v4, %v3007_v51  ;;  %v3754_v15 = vmul.f32 %v7372_v35, %v3008_v36 }
 0x41b   : > { %10000 = vst [vmem:[#allocation19_spill] sm:$0xff] %v8350_v59  ;;  %10001 = vst [vmem:[#allocation3_spill] sm:$0xff] %v8352_v32  ;;  %v8360_v17 = vadd.f32 %v3586_v27, %v3585_v44  ;;  %v3919_v46 = vmul.f32 %v7376_v48, %v3005_v52  ;;  %v3920_v10 = vmul.f32 %v7379_v50, %v3006_v37 }
 0x41c   : > { %v3921_v61 = vmul.f32 %v7376_v48, %v3007_v51  ;;  %3136 = vadd.xlane.f32.xlu0 %v7924_v26  ;;  %v8367_v42 = vadd.f32 %v3752_v39, %v3751_v54  ;;  %v8369_v43 = vadd.f32 %v3754_v15, %v3753_v38  ;;  %v3922_v24 = vmul.f32 %v7379_v50, %v3008_v36 }
 0x41d   : > { %10002 = vst [vmem:[#allocation21_spill] sm:$0xff] %v8360_v17  ;;  %3139 = vadd.xlane.f32.xlu1 %v7931_v0  ;;  %v3437_v58 = vpop.xlane.xlu0 %3436  ;;  %v8372_v32 = vpop.xlane.xlu1 %3271  ;;  %v8374_v27 = vadd.f32 %v3920_v10, %v3919_v46 }
 0x41e   : > { %10003 = vst [vmem:[#allocation20_spill] sm:$0xff] %v8367_v42  ;;  %10004 = vst [vmem:[#allocation58_spill] sm:$0xff] %v8369_v43  ;;  %v4069_v52 = vsel %vm4068_vm1, %v4036_v2, %v3437_v58  ;;  %v8377_v37 = vadd.f32 %v3922_v24, %v3921_v61  ;;  %v10007_v24 = vld [vmem:[#allocation22_spill] sm:$0xff] }
 0x41f   : > { %10005 = vst [vmem:[#allocation59_spill] sm:$0xff] %v8374_v27  ;;  %v2858_v51 = vpop.f32.mrb[80].mxu0 }
 0x420   : > { %10006 = vst [vmem:[#allocation60_spill] sm:$0xff] %v8377_v37  ;;  %v2859_v26 = vadd.f32 %v2858_v51, %v7313_v22  ;;  %v2860_v0 = vpop.f32.mrb[81].mxu0  ;;  %3304 = vadd.xlane.f32.xlu0 %v7947_v1  ;;  %v10008_v51 = vld [vmem:[#allocation31_spill] sm:$0xff] }
 0x421   : > { %3307 = vadd.xlane.f32.xlu1 %v7955_v30  ;;  %v2861_v36 = vadd.f32 %v2860_v0, %v7319_v16  ;;  %v2862_v54 = vpop.f32.mrb[82].mxu0  ;;  %v3605_v44 = vpop.xlane.xlu0 %3604  ;;  %v10009_v30 = vld [vmem:[#allocation35_spill] sm:$0xff]  ;;  %v10010_v0 = vld [vmem:[#allocation9_spill] sm:$0xff] }
 0x422   : > { %v2945_v39 = vmax.f32 %v2859_v26, 0.0  ;;  %v2863_v38 = vadd.f32 %v2862_v54, %v7313_v22  ;;  %v4102_v2 = vsel %vm4101_vm2, %v4069_v52, %v3605_v44  ;;  %v3440_v15 = vpop.xlane.xlu1 %3439  ;;  %v2864_v46 = vpop.f32.mrb[83].mxu0  ;;  %v10011_v54 = vld [vmem:[#allocation24_spill] sm:$0xff] }
 0x423   : > { %v2946_v10 = vmax.f32 %v2861_v36, 0.0  ;;  %v2865_v61 = vadd.f32 %v2864_v46, %v7319_v16 }
 0x424   : > { %v3009_v58 = vadd.f32 %v2945_v39, %v10007_v24  ;;  %v2947_v1 = vmax.f32 %v2863_v38, 0.0  ;;  %3472 = vadd.xlane.f32.xlu0 %v10008_v51  ;;  %v10012_v39 = vld [vmem:[#allocation23_spill] sm:$0xff] }
 0x425   : > { %3475 = vadd.xlane.f32.xlu1 %v10009_v30  ;;  %v3010_v37 = vadd.f32 %v2946_v10, %v10010_v0  ;;  %v2948_v26 = vmax.f32 %v2865_v61, 0.0  ;;  %v3773_v27 = vpop.xlane.xlu0 %3772 }
 0x426   : > { %v3011_v52 = vadd.f32 %v2947_v1, %v10011_v54  ;;  %v4135_v44 = vsel %vm4134_vm3, %v4102_v2, %v3773_v27  ;;  %v3608_v36 = vpop.xlane.xlu1 %3607  ;;  %v3083_v46 = vmul.f32 %v7342_v28, %v3009_v58  ;;  %v3251_v43 = vmul.f32 %v7334_v41, %v3009_v58 }
 0x427   : > { %v3012_v38 = vadd.f32 %v2948_v26, %v10012_v39  ;;  %v3084_v24 = vmul.f32 %v7354_v7, %v3010_v37  ;;  %v3252_v51 = vmul.f32 %v7351_v11, %v3010_v37  ;;  %v3419_v10 = vmul.f32 %v7345_v18, %v3009_v58 }
 0x428   : > { %3640 = vadd.xlane.f32.xlu0 %v7977_v8  ;;  %v3085_v61 = vmul.f32 %v7342_v28, %v3011_v52  ;;  %v3253_v27 = vmul.f32 %v7334_v41, %v3011_v52  ;;  %v3420_v2 = vmul.f32 %v7360_v55, %v3010_v37  ;;  %v3421_v42 = vmul.f32 %v7345_v18, %v3011_v52 }
 0x429   : > { %3643 = vadd.xlane.f32.xlu1 %v7979_v14  ;;  %v3941_v1 = vpop.xlane.xlu0 %3940  ;;  %v8403_v30 = vadd.f32 %v3084_v24, %v3083_v46  ;;  %v3086_v0 = vmul.f32 %v7354_v7, %v3012_v38  ;;  %v8406_v26 = vadd.f32 %v3252_v51, %v3251_v43  ;;  %v3254_v54 = vmul.f32 %v7351_v11, %v3012_v38  ;;  %v10017_v43 = vld [vmem:[#allocation7_spill] sm:$0xff] }
 0x42a   : > { %v8410_v39 = vsel %vm4167_vm4, %v4135_v44, %v3941_v1  ;;  %v3776_v8 = vpop.xlane.xlu1 %3775  ;;  %v8412_v14 = vadd.f32 %v3420_v2, %v3419_v10  ;;  %v3422_v17 = vmul.f32 %v7360_v55, %v3012_v38  ;;  %v3587_v24 = vmul.f32 %v7363_v33, %v3009_v58 }
 0x42b   : > { %10013 = vst [vmem:[#allocation22_spill] sm:$0xff] %v8406_v26  ;;  %10014 = vst [vmem:[#allocation31_spill] sm:$0xff] %v8410_v39  ;;  %v8416_v59 = vadd.f32 %v3086_v0, %v3085_v61  ;;  %v8418_v46 = vadd.f32 %v3254_v54, %v3253_v27  ;;  %v3588_v44 = vmul.f32 %v7365_v20, %v3010_v37  ;;  %v10022_v26 = vld [vmem:[#allocation13_spill] sm:$0xff] }
 0x42c   : > { %10015 = vst [vmem:[#allocation35_spill] sm:$0xff] %v8412_v14  ;;  %3808 = vadd.xlane.f32.xlu0 %v7987_v62  ;;  %v8423_v51 = vadd.f32 %v3422_v17, %v3421_v42  ;;  %v3589_v10 = vmul.f32 %v7363_v33, %v3011_v52  ;;  %v3590_v1 = vmul.f32 %v7365_v20, %v3012_v38 }
 0x42d   : > { %10016 = vst [vmem:[#allocation9_spill] sm:$0xff] %v8418_v46  ;;  %3811 = vadd.xlane.f32.xlu1 %v10017_v43  ;;  %v3104_v2 = vpop.xlane.xlu0 %3103  ;;  %v3755_v61 = vmul.f32 %v7369_v4, %v3009_v58  ;;  %v3756_v27 = vmul.f32 %v7372_v35, %v3010_v37  ;;  %v8432_v62 = vadd.f32 %v3588_v44, %v3587_v24 }
 0x42e   : > { %10018 = vst [vmem:[#allocation24_spill] sm:$0xff] %v8423_v51  ;;  %v4037_v0 = vsel %vm4035_vm0, %v3104_v2, %v8372_v32  ;;  %v3944_v54 = vpop.xlane.xlu1 %3943  ;;  %v3757_v17 = vmul.f32 %v7369_v4, %v3011_v52  ;;  %v3758_v42 = vmul.f32 %v7372_v35, %v3012_v38  ;;  %v8437_v39 = vadd.f32 %v3590_v1, %v3589_v10  ;;  %v10023_v32 = vld [vmem:[#allocation34_spill] sm:$0xff] }
 0x42f   : > { %10019 = vst [vmem:[#allocation23_spill] sm:$0xff] %v8432_v62  ;;  %v4070_v43 = vsel %vm4068_vm1, %v4037_v0, %v3440_v15  ;;  %v8439_v51 = vadd.f32 %v3756_v27, %v3755_v61  ;;  %v3923_v14 = vmul.f32 %v7376_v48, %v3009_v58  ;;  %v3924_v44 = vmul.f32 %v7379_v50, %v3010_v37 }
 0x430   : > { %10020 = vst [vmem:[#allocation7_spill] sm:$0xff] %v8437_v39  ;;  %v4103_v46 = vsel %vm4101_vm2, %v4070_v43, %v3608_v36  ;;  %3976 = vadd.xlane.f32.xlu0 %v10022_v26  ;;  %v8445_v24 = vadd.f32 %v3758_v42, %v3757_v17  ;;  %v3925_v15 = vmul.f32 %v7376_v48, %v3011_v52  ;;  %v10029_v52 = vld [vmem:[#allocation45_spill] sm:$0xff] }
 0x431   : > { %10021 = vst [vmem:[#allocation61_spill] sm:$0xff] %v8439_v51  ;;  %3979 = vadd.xlane.f32.xlu1 %v10023_v32  ;;  %v4136_v2 = vsel %vm4134_vm3, %v4103_v46, %v3776_v8  ;;  %v3107_v62 = vpop.xlane.xlu0 %3106  ;;  %v3926_v10 = vmul.f32 %v7379_v50, %v3012_v38  ;;  %v8454_v61 = vadd.f32 %v3924_v44, %v3923_v14  ;;  %v10028_v46 = vld [vmem:[#allocation44_spill] sm:$0xff] }
 0x432   : > { %10024 = vst [vmem:[#allocation13_spill] sm:$0xff] %v8445_v24  ;;  %v8452_v1 = vsel %vm4167_vm4, %v4136_v2, %v3944_v54  ;;  %v3110_v58 = vpop.xlane.xlu1 %3109  ;;  %v2868_v36 = vpop.f32.mrb[84].mxu0  ;;  %v10030_v2 = vld [vmem:[#allocation25_spill] sm:$0xff] }
 0x433   : > { %10025 = vst [vmem:[#allocation34_spill] sm:$0xff] %v8452_v1  ;;  %10026 = vst [vmem:[#allocation62_spill] sm:$0xff] %v8454_v61  ;;  %v2869_v26 = vadd.f32 %v2868_v36, %v7313_v22  ;;  %v2870_v27 = vpop.f32.mrb[85].mxu0  ;;  %v8457_v0 = vadd.f32 %v3926_v10, %v3925_v15 }
 0x434   : > { %v2871_v37 = vadd.f32 %v2870_v27, %v7319_v16  ;;  %v2872_v8 = vpop.f32.mrb[86].mxu0  ;;  %3142 = vadd.xlane.f32.xlu0 %v10028_v46  ;;  %v10031_v27 = vld [vmem:[#allocation10_spill] sm:$0xff] }
 0x435   : > { %10027 = vst [vmem:[#allocation63_spill] sm:$0xff] %v8457_v0  ;;  %3145 = vadd.xlane.f32.xlu1 %v10029_v52  ;;  %v2949_v38 = vmax.f32 %v2869_v26, 0.0  ;;  %v2873_v54 = vadd.f32 %v2872_v8, %v7313_v22  ;;  %v2874_v17 = vpop.f32.mrb[87].mxu0  ;;  %v3275_v42 = vpop.xlane.xlu0 %3274  ;;  %v10032_v52 = vld [vmem:[#allocation46_spill] sm:$0xff]  ;;  %v10033_v26 = vld [vmem:[#allocation47_spill] sm:$0xff] }
 0x436   : > { %v2950_v43 = vmax.f32 %v2871_v37, 0.0  ;;  %v2875_v14 = vadd.f32 %v2874_v17, %v7319_v16  ;;  %v4038_v32 = vsel %vm4035_vm0, %v3107_v62, %v3275_v42  ;;  %v3278_v44 = vpop.xlane.xlu1 %3277  ;;  %v10034_v8 = vld [vmem:[#allocation27_spill] sm:$0xff] }
 0x437   : > { %v3013_v15 = vadd.f32 %v2949_v38, %v10030_v2  ;;  %v2951_v10 = vmax.f32 %v2873_v54, 0.0  ;;  %v4039_v36 = vsel %vm4035_vm0, %v3110_v58, %v3278_v44  ;;  %v10035_v38 = vld [vmem:[#allocation26_spill] sm:$0xff] }
 0x438   : > { %v3014_v46 = vadd.f32 %v2950_v43, %v10031_v27  ;;  %v2952_v1 = vmax.f32 %v2875_v14, 0.0  ;;  %3310 = vadd.xlane.f32.xlu0 %v10032_v52 }
 0x439   : > { %3313 = vadd.xlane.f32.xlu1 %v10033_v26  ;;  %v3015_v0 = vadd.f32 %v2951_v10, %v10034_v8  ;;  %v3443_v37 = vpop.xlane.xlu0 %3442  ;;  %v3087_v17 = vmul.f32 %v7342_v28, %v3013_v15  ;;  %v3255_v62 = vmul.f32 %v7334_v41, %v3013_v15  ;;  %v3423_v42 = vmul.f32 %v7345_v18, %v3013_v15  ;;  %v10036_v26 = vld [vmem:[#allocation48_spill] sm:$0xff]  ;;  %v10037_v8 = vld [vmem:[#allocation49_spill] sm:$0xff] }
 0x43a   : > { %v3016_v54 = vadd.f32 %v2952_v1, %v10035_v38  ;;  %v4071_v58 = vsel %vm4068_vm1, %v4038_v32, %v3443_v37  ;;  %v3446_v44 = vpop.xlane.xlu1 %3445  ;;  %v3088_v43 = vmul.f32 %v7354_v7, %v3014_v46  ;;  %v3256_v14 = vmul.f32 %v7351_v11, %v3014_v46 }
 0x43b   : > { %v4072_v2 = vsel %vm4068_vm1, %v4039_v36, %v3446_v44  ;;  %v3089_v10 = vmul.f32 %v7342_v28, %v3015_v0  ;;  %v3257_v27 = vmul.f32 %v7334_v41, %v3015_v0  ;;  %v3424_v52 = vmul.f32 %v7360_v55, %v3014_v46 }
 0x43c   : > { %3478 = vadd.xlane.f32.xlu0 %v10036_v26  ;;  %v8484_v1 = vadd.f32 %v3088_v43, %v3087_v17  ;;  %v3090_v32 = vmul.f32 %v7354_v7, %v3016_v54  ;;  %v8487_v37 = vadd.f32 %v3256_v14, %v3255_v62  ;;  %v3258_v61 = vmul.f32 %v7351_v11, %v3016_v54 }
 0x43d   : > { %3481 = vadd.xlane.f32.xlu1 %v10037_v8  ;;  %v3611_v38 = vpop.xlane.xlu0 %3610  ;;  %v8490_v36 = vadd.f32 %v3424_v52, %v3423_v42  ;;  %v3425_v44 = vmul.f32 %v7345_v18, %v3015_v0  ;;  %v3426_v24 = vmul.f32 %v7360_v55, %v3016_v54  ;;  %v3591_v17 = vmul.f32 %v7363_v33, %v3013_v15  ;;  %v10041_v52 = vld [vmem:[#allocation29_spill] sm:$0xff] }
 0x43e   : > { %10038 = vst [vmem:[#allocation44_spill] sm:$0xff] %v8487_v37  ;;  %v4104_v51 = vsel %vm4101_vm2, %v4071_v58, %v3611_v38  ;;  %v3614_v26 = vpop.xlane.xlu1 %3613  ;;  %v8495_v39 = vadd.f32 %v3090_v32, %v3089_v10  ;;  %v3592_v43 = vmul.f32 %v7365_v20, %v3014_v46  ;;  %v8500_v14 = vadd.f32 %v3258_v61, %v3257_v27 }
 0x43f   : > { %10039 = vst [vmem:[#allocation45_spill] sm:$0xff] %v8490_v36  ;;  %v4105_v62 = vsel %vm4101_vm2, %v4072_v2, %v3614_v26  ;;  %v8502_v8 = vadd.f32 %v3426_v24, %v3425_v44  ;;  %v3593_v42 = vmul.f32 %v7363_v33, %v3015_v0  ;;  %v10042_v36 = vld [vmem:[#allocation50_spill] sm:$0xff]  ;;  %v3594_v10 = vmul.f32 %v7365_v20, %v3016_v54 }
 0x440   : > { %3646 = vadd.xlane.f32.xlu0 %v10041_v52  ;;  %v8507_v58 = vadd.f32 %v3592_v43, %v3591_v17  ;;  %v3759_v32 = vmul.f32 %v7369_v4, %v3013_v15  ;;  %v3760_v37 = vmul.f32 %v7372_v35, %v3014_v46  ;;  %v3761_v61 = vmul.f32 %v7369_v4, %v3015_v0 }
 0x441   : > { %10040 = vst [vmem:[#allocation25_spill] sm:$0xff] %v8502_v8  ;;  %3649 = vadd.xlane.f32.xlu1 %v10042_v36  ;;  %v3779_v38 = vpop.xlane.xlu0 %3778  ;;  %v3762_v24 = vmul.f32 %v7372_v35, %v3016_v54  ;;  %v3927_v2 = vmul.f32 %v7376_v48, %v3013_v15  ;;  %v8516_v26 = vadd.f32 %v3594_v10, %v3593_v42 }
 0x442   : > { %10043 = vst [vmem:[#allocation10_spill] sm:$0xff] %v8507_v58  ;;  %v4137_v27 = vsel %vm4134_vm3, %v4104_v51, %v3779_v38  ;;  %v3782_v44 = vpop.xlane.xlu1 %3781  ;;  %v3928_v36 = vmul.f32 %v7379_v50, %v3014_v46  ;;  %v3929_v17 = vmul.f32 %v7376_v48, %v3015_v0  ;;  %v8521_v52 = vadd.f32 %v3760_v37, %v3759_v32 }
 0x443   : > { %v4138_v43 = vsel %vm4134_vm3, %v4105_v62, %v3782_v44  ;;  %v8523_v58 = vadd.f32 %v3762_v24, %v3761_v61  ;;  %v3930_v8 = vmul.f32 %v7379_v50, %v3016_v54 }
 0x444   : > { %3814 = vadd.xlane.f32.xlu0 %v8068_v21  ;;  %v8528_v51 = vadd.f32 %v3928_v36, %v3927_v2 }
 0x445   : > { %3817 = vadd.xlane.f32.xlu1 %v8077_v60  ;;  %v2878_v15 = vpop.f32.mrb[88].mxu0  ;;  %v3947_v42 = vpop.xlane.xlu0 %3946  ;;  %v8530_v10 = vadd.f32 %v3930_v8, %v3929_v17 }
 0x446   : > { %v2879_v0 = vadd.f32 %v2878_v15, %v7313_v22  ;;  %v8534_v46 = vsel %vm4167_vm4, %v4137_v27, %v3947_v42  ;;  %v3950_v37 = vpop.xlane.xlu1 %3949  ;;  %v2880_v62 = vpop.f32.mrb[89].mxu0  ;;  %v10046_v27 = vld [vmem:[#allocation30_spill] sm:$0xff] }
 0x447   : > { %10044 = vst [vmem:[#allocation46_spill] sm:$0xff] %v8534_v46  ;;  %v8537_v32 = vsel %vm4167_vm4, %v4138_v43, %v3950_v37  ;;  %v2881_v21 = vadd.f32 %v2880_v62, %v7319_v16  ;;  %v2882_v54 = vpop.f32.mrb[90].mxu0  ;;  %v10047_v43 = vld [vmem:[#allocation40_spill] sm:$0xff]  ;;  %v10048_v37 = vld [vmem:[#allocation39_spill] sm:$0xff]  ;;  %v10049_v62 = vld [vmem:[#allocation41_spill] sm:$0xff] }
 0x448   : > { %10045 = vst [vmem:[#allocation47_spill] sm:$0xff] %v8537_v32  ;;  %v2953_v60 = vmax.f32 %v2879_v0, 0.0  ;;  %v2883_v38 = vadd.f32 %v2882_v54, %v7313_v22  ;;  %v2884_v61 = vpop.f32.mrb[91].mxu0  ;;  %3982 = vadd.xlane.f32.xlu0 %v8093_v31 }
 0x449   : > { %3985 = vadd.xlane.f32.xlu1 %v8099_v12  ;;  %v2954_v8 = vmax.f32 %v2881_v21, 0.0  ;;  %v2885_v24 = vadd.f32 %v2884_v61, %v7319_v16  ;;  %v3113_v2 = vpop.xlane.xlu0 %3112 }
 0x44a   : > { %v3017_v44 = vadd.f32 %v2953_v60, %v10046_v27  ;;  %v2955_v36 = vmax.f32 %v2883_v38, 0.0  ;;  %v3116_v17 = vpop.xlane.xlu1 %3115 }
 0x44b   : > { %v3018_v15 = vadd.f32 %v2954_v8, %v10047_v43  ;;  %v2956_v42 = vmax.f32 %v2885_v24, 0.0 }
 0x44c   : > { %v3019_v0 = vadd.f32 %v2955_v36, %v10048_v37  ;;  %3148 = vadd.xlane.f32.xlu0 %v8109_v40  ;;  %v3091_v31 = vmul.f32 %v7342_v28, %v3017_v44  ;;  %v3259_v12 = vmul.f32 %v7334_v41, %v3017_v44  ;;  %v3427_v61 = vmul.f32 %v7345_v18, %v3017_v44 }
 0x44d   : > { %3151 = vadd.xlane.f32.xlu1 %v8115_v34  ;;  %v3020_v21 = vadd.f32 %v2956_v42, %v10049_v62  ;;  %v3281_v54 = vpop.xlane.xlu0 %3280  ;;  %v3092_v60 = vmul.f32 %v7354_v7, %v3018_v15  ;;  %v3260_v38 = vmul.f32 %v7351_v11, %v3018_v15  ;;  %v3428_v27 = vmul.f32 %v7360_v55, %v3018_v15 }
 0x44e   : > { %v4040_v8 = vsel %vm4035_vm0, %v3113_v2, %v3281_v54  ;;  %v3284_v24 = vpop.xlane.xlu1 %3283  ;;  %v3093_v40 = vmul.f32 %v7342_v28, %v3019_v0  ;;  %v3261_v34 = vmul.f32 %v7334_v41, %v3019_v0  ;;  %v3429_v54 = vmul.f32 %v7345_v18, %v3019_v0 }
 0x44f   : > { %v4041_v36 = vsel %vm4035_vm0, %v3116_v17, %v3284_v24  ;;  %v8560_v43 = vadd.f32 %v3092_v60, %v3091_v31  ;;  %v3094_v42 = vmul.f32 %v7354_v7, %v3020_v21  ;;  %v8563_v37 = vadd.f32 %v3260_v38, %v3259_v12 }
 0x450   : > { %3316 = vadd.xlane.f32.xlu0 %v8117_v56  ;;  %v3262_v2 = vmul.f32 %v7351_v11, %v3020_v21  ;;  %v8568_v62 = vadd.f32 %v3428_v27, %v3427_v61  ;;  %v3430_v17 = vmul.f32 %v7360_v55, %v3020_v21  ;;  %v3595_v31 = vmul.f32 %v7363_v33, %v3017_v44 }
 0x451   : > { %3319 = vadd.xlane.f32.xlu1 %v8123_v45  ;;  %v3449_v32 = vpop.xlane.xlu0 %3448  ;;  %v8571_v46 = vadd.f32 %v3094_v42, %v3093_v40  ;;  %v3596_v12 = vmul.f32 %v7365_v20, %v3018_v15  ;;  %v3597_v45 = vmul.f32 %v7363_v33, %v3019_v0  ;;  %v3598_v61 = vmul.f32 %v7365_v20, %v3020_v21 }
 0x452   : > { %10050 = vst [vmem:[#allocation27_spill] sm:$0xff] %v8568_v62  ;;  %v4073_v60 = vsel %vm4068_vm1, %v4040_v8, %v3449_v32  ;;  %v3452_v56 = vpop.xlane.xlu1 %3451  ;;  %v8577_v38 = vadd.f32 %v3262_v2, %v3261_v34  ;;  %v8582_v27 = vadd.f32 %v3430_v17, %v3429_v54  ;;  %v3763_v42 = vmul.f32 %v7369_v4, %v3017_v44  ;;  %v10052_v62 = vld [vmem:[#allocation14_spill] sm:$0xff] }
 0x453   : > { %v4074_v24 = vsel %vm4068_vm1, %v4041_v36, %v3452_v56  ;;  %v8584_v40 = vadd.f32 %v3596_v12, %v3595_v31  ;;  %v8589_v32 = vadd.f32 %v3598_v61, %v3597_v45  ;;  %v3764_v8 = vmul.f32 %v7372_v35, %v3018_v15 }
 0x454   : > { %10051 = vst [vmem:[#allocation26_spill] sm:$0xff] %v8577_v38  ;;  %3484 = vadd.xlane.f32.xlu0 %v10052_v62  ;;  %v3765_v34 = vmul.f32 %v7369_v4, %v3019_v0  ;;  %v3766_v38 = vmul.f32 %v7372_v35, %v3020_v21  ;;  %v3931_v36 = vmul.f32 %v7376_v48, %v3017_v44 }
 0x455   : > { %3487 = vadd.xlane.f32.xlu1 %v8141_v23  ;;  %v3617_v2 = vpop.xlane.xlu0 %3616  ;;  %v3932_v54 = vmul.f32 %v7379_v50, %v3018_v15  ;;  %v3933_v17 = vmul.f32 %v7376_v48, %v3019_v0  ;;  %v8598_v12 = vadd.f32 %v3764_v8, %v3763_v42  ;;  %v3934_v23 = vmul.f32 %v7379_v50, %v3020_v21 }
 0x456   : > { %v4106_v31 = vsel %vm4101_vm2, %v4073_v60, %v3617_v2  ;;  %v3620_v62 = vpop.xlane.xlu1 %3619  ;;  %v8602_v45 = vadd.f32 %v3766_v38, %v3765_v34 }
 0x457   : > { %v4107_v56 = vsel %vm4101_vm2, %v4074_v24, %v3620_v62  ;;  %v8604_v61 = vadd.f32 %v3932_v54, %v3931_v36  ;;  %v8608_v15 = vadd.f32 %v3934_v23, %v3933_v17  ;;  %v10054_v17 = vld [vmem:[#allocation37_spill] sm:$0xff]  ;;  %v10055_v62 = vld [vmem:[#allocation2_spill] sm:$0xff] }
 0x458   : > { %3652 = vadd.xlane.f32.xlu0 %v8147_v53  ;;  %v2888_v44 = vpop.f32.mrb[92].mxu0 }
 0x459   : > { %3655 = vadd.xlane.f32.xlu1 %v8149_v25  ;;  %10053 = vst [vmem:[#allocation48_spill] sm:$0xff] %v8608_v15  ;;  %v2889_v0 = vadd.f32 %v2888_v44, %v7313_v22  ;;  %v3785_v60 = vpop.xlane.xlu0 %3784  ;;  %v2890_v42 = vpop.f32.mrb[93].mxu0 }
 0x45a   : > { %v4139_v8 = vsel %vm4134_vm3, %v4106_v31, %v3785_v60  ;;  %v3788_v21 = vpop.xlane.xlu1 %3787  ;;  %v2891_v24 = vadd.f32 %v2890_v42, %v7319_v16  ;;  %v2892_v38 = vpop.f32.mrb[94].mxu0  ;;  %v10056_v60 = vld [vmem:[#allocation43_spill] sm:$0xff] }
 0x45b   : > { %v2957_v34 = vmax.f32 %v2889_v0, 0.0  ;;  %v4140_v2 = vsel %vm4134_vm3, %v4107_v56, %v3788_v21  ;;  %v2893_v53 = vadd.f32 %v2892_v38, %v7313_v22  ;;  %v2894_v36 = vpop.f32.mrb[95].mxu0  ;;  %v10058_v22 = vld [vmem:[#allocation42_spill] sm:$0xff] }
 0x45c   : > { %v2958_v25 = vmax.f32 %v2891_v24, 0.0  ;;  %v2895_v54 = vadd.f32 %v2894_v36, %v7319_v16  ;;  %3820 = vadd.xlane.f32.xlu0 %v8155_v9  ;;  %v10060_v9 = vld [vmem:[#allocation11_spill] sm:$0xff]  ;;  %v10061_v36 = vld [vmem:[#allocation8_spill] sm:$0xff] }
 0x45d   : > { %3823 = vadd.xlane.f32.xlu1 %v10054_v17  ;;  %v3021_v23 = vadd.f32 %v2957_v34, %v10055_v62  ;;  %v2959_v31 = vmax.f32 %v2893_v53, 0.0  ;;  %v3953_v44 = vpop.xlane.xlu0 %3952  ;;  %v10062_v34 = vld [vmem:[#allocation5_spill] sm:$0xff] }
 0x45e   : > { %v3022_v42 = vadd.f32 %v2958_v25, %v10056_v60  ;;  %v2960_v15 = vmax.f32 %v2895_v54, 0.0  ;;  %v8621_v0 = vsel %vm4167_vm4, %v4139_v8, %v3953_v44  ;;  %v3956_v56 = vpop.xlane.xlu1 %3955 }
 0x45f   : > { %10057 = vst [vmem:[#allocation49_spill] sm:$0xff] %v8621_v0  ;;  %v3023_v21 = vadd.f32 %v2959_v31, %v10058_v22  ;;  %v8625_v24 = vsel %vm4167_vm4, %v4140_v2, %v3956_v56  ;;  %v3095_v16 = vmul.f32 %v7342_v28, %v3021_v23  ;;  %v3263_v17 = vmul.f32 %v7334_v41, %v3021_v23 }
 0x460   : > { %10059 = vst [vmem:[#allocation29_spill] sm:$0xff] %v8625_v24  ;;  %v3024_v38 = vadd.f32 %v2960_v15, %v10060_v9  ;;  %3988 = vadd.xlane.f32.xlu0 %v10061_v36  ;;  %v3096_v53 = vmul.f32 %v7354_v7, %v3022_v42  ;;  %v3264_v44 = vmul.f32 %v7351_v11, %v3022_v42  ;;  %v10064_v9 = vld [vmem:[#allocation38_spill] sm:$0xff] }
 0x461   : > { %3991 = vadd.xlane.f32.xlu1 %v10062_v34  ;;  %v3119_v25 = vpop.xlane.xlu0 %3118  ;;  %v3097_v8 = vmul.f32 %v7342_v28, %v3023_v21  ;;  %v3265_v54 = vmul.f32 %v7334_v41, %v3023_v21  ;;  %v3433_v60 = vmul.f32 %v7345_v18, %v3023_v21  ;;  %v3431_v22 = vmul.f32 %v7345_v18, %v3021_v23  ;;  %v10063_v28 = vld [vmem:[#allocation36_spill] sm:$0xff] }
 0x462   : > { %v3122_v62 = vpop.xlane.xlu1 %3121  ;;  %v3098_v2 = vmul.f32 %v7354_v7, %v3024_v38  ;;  %v8636_v31 = vadd.f32 %v3096_v53, %v3095_v16  ;;  %v3266_v15 = vmul.f32 %v7351_v11, %v3024_v38  ;;  %v3434_v56 = vmul.f32 %v7360_v55, %v3024_v38 }
 0x463   : > { %v3432_v7 = vmul.f32 %v7360_v55, %v3022_v42  ;;  %v8650_v34 = vadd.f32 %v3264_v44, %v3263_v17  ;;  %v3601_v53 = vmul.f32 %v7363_v33, %v3023_v21  ;;  %v3602_v24 = vmul.f32 %v7365_v20, %v3024_v38  ;;  %v10065_v44 = vld [vmem:[#allocation51_spill] sm:$0xff] }
 0x464   : > { %3154 = vadd.xlane.f32.xlu0 %v10063_v28  ;;  %v8645_v41 = vadd.f32 %v3098_v2, %v3097_v8  ;;  %v8647_v36 = vadd.f32 %v3266_v15, %v3265_v54  ;;  %v8652_v11 = vadd.f32 %v3434_v56, %v3433_v60  ;;  %v3599_v8 = vmul.f32 %v7363_v33, %v3021_v23  ;;  %v10066_v60 = vld [vmem:[#allocation52_spill] sm:$0xff] }
 0x465   : > { %3157 = vadd.xlane.f32.xlu1 %v10064_v9  ;;  %v3287_v16 = vpop.xlane.xlu0 %3286  ;;  %v8657_v0 = vadd.f32 %v3432_v7, %v3431_v22  ;;  %v3600_v54 = vmul.f32 %v7365_v20, %v3022_v42  ;;  %v8662_v2 = vadd.f32 %v3602_v24, %v3601_v53  ;;  %v3769_v17 = vmul.f32 %v7369_v4, %v3023_v21 }
 0x466   : > { %v4042_v18 = vsel %vm4035_vm0, %v3119_v25, %v3287_v16  ;;  %v3290_v28 = vpop.xlane.xlu1 %3289  ;;  %v3770_v15 = vmul.f32 %v7372_v35, %v3024_v38  ;;  %v3767_v56 = vmul.f32 %v7369_v4, %v3021_v23  ;;  %v3768_v33 = vmul.f32 %v7372_v35, %v3022_v42  ;;  %v10067_v35 = vld [vmem:[#allocation53_spill] sm:$0xff] }
 0x467   : > { %v4043_v55 = vsel %vm4035_vm0, %v3122_v62, %v3290_v28  ;;  %v8668_v25 = vadd.f32 %v3600_v54, %v3599_v8  ;;  %v3937_v24 = vmul.f32 %v7376_v48, %v3023_v21  ;;  %v3938_v62 = vmul.f32 %v7379_v50, %v3024_v38 }
 0x468   : > { %3322 = vadd.xlane.f32.xlu0 %v10065_v44  ;;  %v8672_v20 = vadd.f32 %v3770_v15, %v3769_v17  ;;  %v3935_v9 = vmul.f32 %v7376_v48, %v3021_v23  ;;  %v8678_v53 = vadd.f32 %v3768_v33, %v3767_v56  ;;  %v3936_v28 = vmul.f32 %v7379_v50, %v3022_v42 }
 0x469   : > { %3325 = vadd.xlane.f32.xlu1 %v10066_v60  ;;  %v3455_v22 = vpop.xlane.xlu0 %3454  ;;  %v8682_v8 = vadd.f32 %v3938_v62, %v3937_v24  ;;  %v10072_v24 = vld [vmem:[#allocation4_spill] sm:$0xff] }
 0x46a   : > { %v4075_v7 = vsel %vm4068_vm1, %v4042_v18, %v3455_v22  ;;  %v3458_v16 = vpop.xlane.xlu1 %3457  ;;  %v8686_v21 = vadd.f32 %v3936_v28, %v3935_v9  ;;  %v10071_v22 = vld [vmem:[#allocation17_spill] sm:$0xff]  ;;  %v10074_v28 = vld [vmem:[#allocation54_spill] sm:$0xff] }
 0x46b   : > { %v4076_v4 = vsel %vm4068_vm1, %v4043_v55, %v3458_v16  ;;  %v10073_v16 = vld [vmem:[#allocation28_spill] sm:$0xff] }
 0x46c   : > { %3490 = vadd.xlane.f32.xlu0 %v10067_v35 }
 0x46d   : > { %3493 = vadd.xlane.f32.xlu1 %v8219_v19  ;;  %v3623_v38 = vpop.xlane.xlu0 %3622  ;;  %v10068_v19 = vld [vmem:[#allocation18_spill] sm:$0xff] }
 0x46e   : > { %v4108_v48 = vsel %vm4101_vm2, %v4075_v7, %v3623_v38  ;;  %v3626_v23 = vpop.xlane.xlu1 %3625 }
 0x46f   : > { %v4109_v18 = vsel %vm4101_vm2, %v4076_v4, %v3626_v23  ;;  %v10075_v23 = vld [vmem:[#allocation55_spill] sm:$0xff] }
 0x470   : > { %3658 = vadd.xlane.f32.xlu0 %v8226_v5  ;;  %v10069_v5 = vld [vmem:[#allocation15_spill] sm:$0xff] }
 0x471   : > { %3661 = vadd.xlane.f32.xlu1 %v8237_v13  ;;  %v3791_v50 = vpop.xlane.xlu0 %3790  ;;  %v10070_v13 = vld [vmem:[#allocation16_spill] sm:$0xff] }
 0x472   : > { %v4141_v42 = vsel %vm4134_vm3, %v4108_v48, %v3791_v50  ;;  %v3794_v54 = vpop.xlane.xlu1 %3793 }
 0x473   : > { %v4142_v55 = vsel %vm4134_vm3, %v4109_v18, %v3794_v54  ;;  %v10076_v18 = vld [vmem:[#allocation56_spill] sm:$0xff] }
 0x474   : > { %3826 = vadd.xlane.f32.xlu0 %v8245_v3 }
 0x475   : > { %3829 = vadd.xlane.f32.xlu1 %v10068_v19  ;;  %v3959_v17 = vpop.xlane.xlu0 %3958  ;;  %v10077_v19 = vld [vmem:[#allocation57_spill] sm:$0xff] }
 0x476   : > { %v8697_v15 = vsel %vm4167_vm4, %v4141_v42, %v3959_v17  ;;  %v3962_v44 = vpop.xlane.xlu1 %3961 }
 0x477   : > { %v8700_v60 = vsel %vm4167_vm4, %v4142_v55, %v3962_v44 }
 0x478   : > { %3994 = vadd.xlane.f32.xlu0 %v10069_v5 }
 0x479   : > { %3997 = vadd.xlane.f32.xlu1 %v10070_v13  ;;  %v3125_v56 = vpop.xlane.xlu0 %3124 }
 0x47a   : > { %v3128_v33 = vpop.xlane.xlu1 %3127 }
 0x47c   : > { %3160 = vadd.xlane.f32.xlu0 %v10071_v22 }
 0x47d   : > { %3163 = vadd.xlane.f32.xlu1 %v10072_v24  ;;  %v3293_v3 = vpop.xlane.xlu0 %3292 }
 0x47e   : > { %v4044_v62 = vsel %vm4035_vm0, %v3125_v56, %v3293_v3  ;;  %v3296_v9 = vpop.xlane.xlu1 %3295  ;;  %v10078_v56 = vld [vmem:[#allocation33_spill] sm:$0xff] }
 0x47f   : > { %v4045_v7 = vsel %vm4035_vm0, %v3128_v33, %v3296_v9  ;;  %v10079_v9 = vld [vmem:[#allocation6_spill] sm:$0xff] }
 0x480   : > { %3328 = vadd.xlane.f32.xlu0 %v10073_v16 }
 0x481   : > { %3331 = vadd.xlane.f32.xlu1 %v10074_v28  ;;  %v3461_v4 = vpop.xlane.xlu0 %3460 }
 0x482   : > { %v4077_v35 = vsel %vm4068_vm1, %v4044_v62, %v3461_v4  ;;  %v3464_v38 = vpop.xlane.xlu1 %3463  ;;  %v10080_v4 = vld [vmem:[#allocation32_spill] sm:$0xff] }
 0x483   : > { %v4078_v48 = vsel %vm4068_vm1, %v4045_v7, %v3464_v38 }
 0x484   : > { %3496 = vadd.xlane.f32.xlu0 %v10075_v23  ;;  %v10082_v23 = vld [vmem:[#allocation19_spill] sm:$0xff] }
 0x485   : > { %3499 = vadd.xlane.f32.xlu1 %v10076_v18  ;;  %v3629_v50 = vpop.xlane.xlu0 %3628 }
 0x486   : > { %v4110_v42 = vsel %vm4101_vm2, %v4077_v35, %v3629_v50  ;;  %v3632_v54 = vpop.xlane.xlu1 %3631 }
 0x487   : > { %v4111_v55 = vsel %vm4101_vm2, %v4078_v48, %v3632_v54  ;;  %v10081_v48 = vld [vmem:[#allocation12_spill] sm:$0xff]  ;;  %v10083_v54 = vld [vmem:[#allocation3_spill] sm:$0xff] }
 0x488   : > { %3664 = vadd.xlane.f32.xlu0 %v10077_v19 }
 0x489   : > { %3667 = vadd.xlane.f32.xlu1 %v8298_v47  ;;  %v3797_v17 = vpop.xlane.xlu0 %3796 }
 0x48a   : > { %v4143_v44 = vsel %vm4134_vm3, %v4110_v42, %v3797_v17  ;;  %v3800_v5 = vpop.xlane.xlu1 %3799 }
 0x48b   : > { %v4144_v13 = vsel %vm4134_vm3, %v4111_v55, %v3800_v5  ;;  %v10084_v55 = vld [vmem:[#allocation21_spill] sm:$0xff]  ;;  %v10085_v5 = vld [vmem:[#allocation20_spill] sm:$0xff] }
 0x48c   : > { %3832 = vadd.xlane.f32.xlu0 %v8300_v49 }
 0x48d   : > { %3835 = vadd.xlane.f32.xlu1 %v10078_v56  ;;  %v3965_v33 = vpop.xlane.xlu0 %3964 }
 0x48e   : > { %v8723_v22 = vsel %vm4167_vm4, %v4143_v44, %v3965_v33  ;;  %v3968_v24 = vpop.xlane.xlu1 %3967 }
 0x48f   : > { %v8726_v3 = vsel %vm4167_vm4, %v4144_v13, %v3968_v24  ;;  %v10086_v13 = vld [vmem:[#allocation58_spill] sm:$0xff] }
 0x490   : > { %4000 = vadd.xlane.f32.xlu0 %v8309_v57 }
 0x491   : > { %4003 = vadd.xlane.f32.xlu1 %v8312_v63  ;;  %v3131_v47 = vpop.xlane.xlu0 %3130 }
 0x492   : > { %v3134_v62 = vpop.xlane.xlu1 %3133 }
 0x494   : > { %3166 = vadd.xlane.f32.xlu0 %v10079_v9  ;;  %v10088_v9 = vld [vmem:[#allocation60_spill] sm:$0xff] }
 0x495   : > { %3169 = vadd.xlane.f32.xlu1 %v8345_v6  ;;  %v3299_v49 = vpop.xlane.xlu0 %3298 }
 0x496   : > { %v4046_v7 = vsel %vm4035_vm0, %v3131_v47, %v3299_v49  ;;  %v3302_v16 = vpop.xlane.xlu1 %3301 }
 0x497   : > { %v4047_v28 = vsel %vm4035_vm0, %v3134_v62, %v3302_v16  ;;  %v10087_v62 = vld [vmem:[#allocation59_spill] sm:$0xff] }
 0x498   : > { %3334 = vadd.xlane.f32.xlu0 %v10080_v4 }
 0x499   : > { %3337 = vadd.xlane.f32.xlu1 %v8347_v29  ;;  %v3467_v35 = vpop.xlane.xlu0 %3466 }
 0x49a   : > { %v4079_v57 = vsel %vm4068_vm1, %v4046_v7, %v3467_v35  ;;  %v3470_v63 = vpop.xlane.xlu1 %3469 }
 0x49b   : > { %v4080_v38 = vsel %vm4068_vm1, %v4047_v28, %v3470_v63  ;;  %v10090_v63 = vld [vmem:[#allocation9_spill] sm:$0xff] }
 0x49c   : > { %3502 = vadd.xlane.f32.xlu0 %v10081_v48 }
 0x49d   : > { %3505 = vadd.xlane.f32.xlu1 %v10082_v23  ;;  %v3635_v6 = vpop.xlane.xlu0 %3634 }
 0x49e   : > { %v4112_v18 = vsel %vm4101_vm2, %v4079_v57, %v3635_v6  ;;  %v3638_v50 = vpop.xlane.xlu1 %3637  ;;  %v10089_v57 = vld [vmem:[#allocation22_spill] sm:$0xff] }
 0x49f   : > { %v4113_v42 = vsel %vm4101_vm2, %v4080_v38, %v3638_v50 }
 0x4a0   : > { %3670 = vadd.xlane.f32.xlu0 %v10083_v54 }
 0x4a1   : > { %3673 = vadd.xlane.f32.xlu1 %v10084_v55  ;;  %v3803_v29 = vpop.xlane.xlu0 %3802  ;;  %v10093_v55 = vld [vmem:[#allocation23_spill] sm:$0xff] }
 0x4a2   : > { %v4145_v19 = vsel %vm4134_vm3, %v4112_v18, %v3803_v29  ;;  %v3806_v17 = vpop.xlane.xlu1 %3805  ;;  %v10091_v18 = vld [vmem:[#allocation35_spill] sm:$0xff] }
 0x4a3   : > { %v4146_v44 = vsel %vm4134_vm3, %v4113_v42, %v3806_v17  ;;  %v10094_v29 = vld [vmem:[#allocation7_spill] sm:$0xff] }
 0x4a4   : > { %3838 = vadd.xlane.f32.xlu0 %v10085_v5 }
 0x4a5   : > { %3841 = vadd.xlane.f32.xlu1 %v10086_v13  ;;  %v3971_v56 = vpop.xlane.xlu0 %3970  ;;  %v10095_v13 = vld [vmem:[#allocation61_spill] sm:$0xff] }
 0x4a6   : > { %v8749_v33 = vsel %vm4167_vm4, %v4145_v19, %v3971_v56  ;;  %v3974_v24 = vpop.xlane.xlu1 %3973  ;;  %v10096_v56 = vld [vmem:[#allocation13_spill] sm:$0xff] }
 0x4a7   : > { %v8752_v47 = vsel %vm4167_vm4, %v4146_v44, %v3974_v24 }
 0x4a8   : > { %4006 = vadd.xlane.f32.xlu0 %v10087_v62 }
 0x4a9   : > { %4009 = vadd.xlane.f32.xlu1 %v10088_v9  ;;  %v3137_v49 = vpop.xlane.xlu0 %3136 }
 0x4aa   : > { %v3140_v7 = vpop.xlane.xlu1 %3139 }
 0x4ac   : > { %3172 = vadd.xlane.f32.xlu0 %v8403_v30  ;;  %v10092_v30 = vld [vmem:[#allocation24_spill] sm:$0xff] }
 0x4ad   : > { %3175 = vadd.xlane.f32.xlu1 %v8416_v59  ;;  %v3305_v16 = vpop.xlane.xlu0 %3304 }
 0x4ae   : > { %v4048_v28 = vsel %vm4035_vm0, %v3137_v49, %v3305_v16  ;;  %v3308_v4 = vpop.xlane.xlu1 %3307  ;;  %v10098_v16 = vld [vmem:[#allocation63_spill] sm:$0xff] }
 0x4af   : > { %v4049_v35 = vsel %vm4035_vm0, %v3140_v7, %v3308_v4  ;;  %v10097_v7 = vld [vmem:[#allocation62_spill] sm:$0xff] }
 0x4b0   : > { %3340 = vadd.xlane.f32.xlu0 %v10089_v57 }
 0x4b1   : > { %3343 = vadd.xlane.f32.xlu1 %v10090_v63  ;;  %v3473_v38 = vpop.xlane.xlu0 %3472 }
 0x4b2   : > { %v4081_v48 = vsel %vm4068_vm1, %v4048_v28, %v3473_v38  ;;  %v3476_v23 = vpop.xlane.xlu1 %3475 }
 0x4b3   : > { %v4082_v6 = vsel %vm4068_vm1, %v4049_v35, %v3476_v23 }
 0x4b4   : > { %3508 = vadd.xlane.f32.xlu0 %v10091_v18 }
 0x4b5   : > { %3511 = vadd.xlane.f32.xlu1 %v10092_v30  ;;  %v3641_v59 = vpop.xlane.xlu0 %3640 }
 0x4b6   : > { %v4114_v50 = vsel %vm4101_vm2, %v4081_v48, %v3641_v59  ;;  %v3644_v42 = vpop.xlane.xlu1 %3643  ;;  %v10099_v48 = vld [vmem:[#allocation44_spill] sm:$0xff]  ;;  %v10100_v59 = vld [vmem:[#allocation45_spill] sm:$0xff] }
 0x4b7   : > { %v4115_v54 = vsel %vm4101_vm2, %v4082_v6, %v3644_v42 }
 0x4b8   : > { %3676 = vadd.xlane.f32.xlu0 %v10093_v55  ;;  %v10102_v55 = vld [vmem:[#allocation10_spill] sm:$0xff] }
 0x4b9   : > { %3679 = vadd.xlane.f32.xlu1 %v10094_v29  ;;  %v3809_v19 = vpop.xlane.xlu0 %3808 }
 0x4ba   : > { %v4147_v17 = vsel %vm4134_vm3, %v4114_v50, %v3809_v19  ;;  %v3812_v44 = vpop.xlane.xlu1 %3811 }
 0x4bb   : > { %v4148_v5 = vsel %vm4134_vm3, %v4115_v54, %v3812_v44 }
 0x4bc   : > { %3844 = vadd.xlane.f32.xlu0 %v10095_v13 }
 0x4bd   : > { %3847 = vadd.xlane.f32.xlu1 %v10096_v56  ;;  %v3977_v24 = vpop.xlane.xlu0 %3976 }
 0x4be   : > { %v8775_v62 = vsel %vm4167_vm4, %v4147_v17, %v3977_v24  ;;  %v3980_v9 = vpop.xlane.xlu1 %3979 }
 0x4bf   : > { %v8778_v49 = vsel %vm4167_vm4, %v4148_v5, %v3980_v9 }
 0x4c0   : > { %4012 = vadd.xlane.f32.xlu0 %v10097_v7 }
 0x4c1   : > { %4015 = vadd.xlane.f32.xlu1 %v10098_v16  ;;  %v3143_v28 = vpop.xlane.xlu0 %3142 }
 0x4c2   : > { %v3146_v4 = vpop.xlane.xlu1 %3145 }
 0x4c4   : > { %3178 = vadd.xlane.f32.xlu0 %v8484_v1  ;;  %v10101_v1 = vld [vmem:[#allocation25_spill] sm:$0xff] }
 0x4c5   : > { %3181 = vadd.xlane.f32.xlu1 %v8495_v39  ;;  %v3311_v35 = vpop.xlane.xlu0 %3310 }
 0x4c6   : > { %v4050_v57 = vsel %vm4035_vm0, %v3143_v28, %v3311_v35  ;;  %v3314_v63 = vpop.xlane.xlu1 %3313 }
 0x4c7   : > { %v4051_v38 = vsel %vm4035_vm0, %v3146_v4, %v3314_v63  ;;  %v10110_v63 = vld [vmem:[#allocation34_spill] sm:$0xff] }
 0x4c8   : > { %3346 = vadd.xlane.f32.xlu0 %v10099_v48 }
 0x4c9   : > { %3349 = vadd.xlane.f32.xlu1 %v8500_v14  ;;  %v3479_v23 = vpop.xlane.xlu0 %3478 }
 0x4ca   : > { %v4083_v6 = vsel %vm4068_vm1, %v4050_v57, %v3479_v23  ;;  %v3482_v18 = vpop.xlane.xlu1 %3481 }
 0x4cb   : > { %v4084_v30 = vsel %vm4068_vm1, %v4051_v38, %v3482_v18 }
 0x4cc   : > { %3514 = vadd.xlane.f32.xlu0 %v10100_v59 }
 0x4cd   : > { %3517 = vadd.xlane.f32.xlu1 %v10101_v1  ;;  %v3647_v39 = vpop.xlane.xlu0 %3646 }
 0x4ce   : > { %v4116_v50 = vsel %vm4101_vm2, %v4083_v6, %v3647_v39  ;;  %v3650_v42 = vpop.xlane.xlu1 %3649  ;;  %v10113_v6 = vld [vmem:[#allocation46_spill] sm:$0xff] }
 0x4cf   : > { %v4117_v54 = vsel %vm4101_vm2, %v4084_v30, %v3650_v42  ;;  %v10114_v30 = vld [vmem:[#allocation31_spill] sm:$0xff] }
 0x4d0   : > { %3682 = vadd.xlane.f32.xlu0 %v10102_v55 }
 0x4d1   : > { %3685 = vadd.xlane.f32.xlu1 %v8516_v26  ;;  %v3815_v14 = vpop.xlane.xlu0 %3814 }
 0x4d2   : > { %v8797_v29 = vsel %vm4134_vm3, %v4116_v50, %v3815_v14  ;;  %v3818_v19 = vpop.xlane.xlu1 %3817  ;;  %v10117_v50 = vld [vmem:[#allocation47_spill] sm:$0xff] }
 0x4d3   : > { %v8800_v17 = vsel %vm4134_vm3, %v4117_v54, %v3818_v19 }
 0x4d4   : > { %3850 = vadd.xlane.f32.xlu0 %v8521_v52 }
 0x4d5   : > { %3853 = vadd.xlane.f32.xlu1 %v8523_v58  ;;  %v8804_v44 = vpop.xlane.xlu0 %3982  ;;  %v10103_v58 = vld [vmem:[#allocation26_spill] sm:$0xff] }
 0x4d6   : > { %v8806_v5 = vpop.xlane.xlu1 %3985 }
 0x4d8   : > { %4018 = vadd.xlane.f32.xlu0 %v8528_v51 }
 0x4d9   : > { %4021 = vadd.xlane.f32.xlu1 %v8530_v10  ;;  %v8810_v26 = vpop.xlane.xlu0 %3148  ;;  %v10104_v10 = vld [vmem:[#allocation27_spill] sm:$0xff] }
 0x4da   : > { %v8812_v13 = vpop.xlane.xlu1 %3151 }
 0x4dc   : > { %3184 = vadd.xlane.f32.xlu0 %v8560_v43 }
 0x4dd   : > { %3187 = vadd.xlane.f32.xlu1 %v8571_v46  ;;  %v8816_v56 = vpop.xlane.xlu0 %3316 }
 0x4de   : > { %v8818_v52 = vpop.xlane.xlu1 %3319 }
 0x4e0   : > { %3352 = vadd.xlane.f32.xlu0 %v8563_v37 }
 0x4e1   : > { %3355 = vadd.xlane.f32.xlu1 %v10103_v58  ;;  %v8822_v24 = vpop.xlane.xlu0 %3484 }
 0x4e2   : > { %v8824_v51 = vpop.xlane.xlu1 %3487 }
 0x4e4   : > { %3520 = vadd.xlane.f32.xlu0 %v10104_v10 }
 0x4e5   : > { %3523 = vadd.xlane.f32.xlu1 %v8582_v27  ;;  %v8828_v9 = vpop.xlane.xlu0 %3652  ;;  %v10105_v27 = vld [vmem:[#allocation48_spill] sm:$0xff] }
 0x4e6   : > { %v8830_v43 = vpop.xlane.xlu1 %3655 }
 0x4e8   : > { %3688 = vadd.xlane.f32.xlu0 %v8584_v40 }
 0x4e9   : > { %3691 = vadd.xlane.f32.xlu1 %v8589_v32  ;;  %v8834_v46 = vpop.xlane.xlu0 %3820 }
 0x4ea   : > { %v8836_v37 = vpop.xlane.xlu1 %3823 }
 0x4ec   : > { %3856 = vadd.xlane.f32.xlu0 %v8598_v12 }
 0x4ed   : > { %3859 = vadd.xlane.f32.xlu1 %v8602_v45  ;;  %v8840_v7 = vpop.xlane.xlu0 %3988 }
 0x4ee   : > { %v8842_v16 = vpop.xlane.xlu1 %3991 }
 0x4f0   : > { %4024 = vadd.xlane.f32.xlu0 %v8604_v61 }
 0x4f1   : > { %4027 = vadd.xlane.f32.xlu1 %v10105_v27  ;;  %v8846_v28 = vpop.xlane.xlu0 %3154 }
 0x4f2   : > { %v8848_v40 = vpop.xlane.xlu1 %3157 }
 0x4f4   : > { %3190 = vadd.xlane.f32.xlu0 %v8636_v31 }
 0x4f5   : > { %3193 = vadd.xlane.f32.xlu1 %v8645_v41  ;;  %v8852_v32 = vpop.xlane.xlu0 %3322 }
 0x4f6   : > { %v8854_v12 = vpop.xlane.xlu1 %3325 }
 0x4f8   : > { %3358 = vadd.xlane.f32.xlu0 %v8650_v34 }
 0x4f9   : > { %3361 = vadd.xlane.f32.xlu1 %v8647_v36  ;;  %v8858_v45 = vpop.xlane.xlu0 %3490 }
 0x4fa   : > { %v8860_v61 = vpop.xlane.xlu1 %3493 }
 0x4fc   : > { %3526 = vadd.xlane.f32.xlu0 %v8657_v0 }
 0x4fd   : > { %3529 = vadd.xlane.f32.xlu1 %v8652_v11  ;;  %v8864_v4 = vpop.xlane.xlu0 %3658 }
 0x4fe   : > { %v8866_v41 = vpop.xlane.xlu1 %3661 }
 0x500   : > { %3694 = vadd.xlane.f32.xlu0 %v8668_v25 }
 0x501   : > { %3697 = vadd.xlane.f32.xlu1 %v8662_v2  ;;  %v8870_v31 = vpop.xlane.xlu0 %3826 }
 0x502   : > { %v8872_v36 = vpop.xlane.xlu1 %3829 }
 0x504   : > { %3862 = vadd.xlane.f32.xlu0 %v8678_v53 }
 0x505   : > { %3865 = vadd.xlane.f32.xlu1 %v8672_v20  ;;  %v8876_v34 = vpop.xlane.xlu0 %3994 }
 0x506   : > { %v8878_v11 = vpop.xlane.xlu1 %3997 }
 0x508   : > { %4030 = vadd.xlane.f32.xlu0 %v8686_v21 }
 0x509   : > { %4033 = vadd.xlane.f32.xlu1 %v8682_v8  ;;  %v8882_v0 = vpop.xlane.xlu0 %3160  ;;  %v8899_v8 = vld [vmem:[%s9526_s10] ss:$0 sm:$0xff] }
 0x50a   : > { %v8884_v2 = vpop.xlane.xlu1 %3163  ;;  %v4208_v38 = vadd.f32 %v8899_v8, %v10110_v63  ;;  %v8912_v18 = vadd.f32 %v8899_v8, %v10113_v6  ;;  %v4207_v59 = vadd.f32 %v8899_v8, %v10114_v30  ;;  %v4210_v42 = vadd.f32 %v8899_v8, %v10117_v50 }
 0x50b   : > { %10106 = vst [vmem:[#allocation50_spill] sm:$0xff] %v8884_v2 }
 0x50c   : > { %5088 = vtanh.f32 %v4207_v59 }
 0x50d   : > { %v8886_v25 = vpop.xlane.xlu0 %3328  ;;  %5090 = vtanh.f32 %v4208_v38 }
 0x50e   : > { %v8888_v35 = vpop.xlane.xlu1 %3331  ;;  %5092 = vtanh.f32 %v8912_v18 }
 0x50f   : > { %10107 = vst [vmem:[#allocation30_spill] sm:$0xff] %v8888_v35  ;;  %5094 = vtanh.f32 %v4210_v42 }
 0x511   : > { %v8890_v57 = vpop.xlane.xlu0 %3496 }
 0x512   : > { %v8892_v20 = vpop.xlane.xlu1 %3499 }
 0x513   : > { %10108 = vst [vmem:[#allocation40_spill] sm:$0xff] %v8892_v20 }
 0x515   : > { %v8894_v53 = vpop.xlane.xlu0 %3664 }
 0x516   : > { %v8901_v21 = vpop.xlane.xlu1 %3667 }
 0x517   : > { %10109 = vst [vmem:[#allocation39_spill] sm:$0xff] %v8901_v21 }
 0x519   : > { %v8905_v48 = vpop.xlane.xlu0 %3832 }
 0x51a   : > { %10111 = vst [vmem:[#allocation41_spill] sm:$0xff] %v8905_v48  ;;  %4401 = vrot.lane.b32.xlu1 %v4208_v38, %s5260_s21  ;;  %v8908_v23 = vpop.xlane.xlu1 %3835 }
 0x51b   : > { %10112 = vst [vmem:[#allocation14_spill] sm:$0xff] %v8908_v23 }
 0x51d   : > { %v8916_v1 = vpop.xlane.xlu0 %4000 }
 0x51e   : > { %10115 = vst [vmem:[#allocation37_spill] sm:$0xff] %v8916_v1  ;;  %4403 = vrot.lane.b32.xlu1 %v8912_v18, %s5260_s21  ;;  %v8920_v39 = vpop.xlane.xlu1 %4003  ;;  %4399 = vrot.lane.b32.xlu0 %v4207_v59, %s5260_s21 }
 0x51f   : > { %10116 = vst [vmem:[#allocation2_spill] sm:$0xff] %v8920_v39 }
 0x521   : > { %v8925_v54 = vpop.xlane.xlu0 %3166 }
 0x522   : > { %10118 = vst [vmem:[#allocation43_spill] sm:$0xff] %v8925_v54  ;;  %v8927_v55 = vpop.xlane.xlu1 %3169  ;;  %4405 = vrot.lane.b32.xlu0 %v4210_v42, %s5260_s21 }
 0x523   : > { %10119 = vst [vmem:[#allocation42_spill] sm:$0xff] %v8927_v55 }
 0x525   : > { %v8930_v14 = vpop.xlane.xlu0 %3334 }
 0x526   : > { %10120 = vst [vmem:[#allocation11_spill] sm:$0xff] %v8930_v14  ;;  %v8932_v19 = vpop.xlane.xlu1 %3337  ;;  %v10142_v14 = vld [vmem:[#allocation49_spill] sm:$0xff] }
 0x527   : > { %10121 = vst [vmem:[#allocation8_spill] sm:$0xff] %v8932_v19  ;;  %v8984_v39 = vadd.f32 %v8899_v8, %v10142_v14 }
 0x529   : > { %v8934_v58 = vpop.xlane.xlu0 %3502  ;;  %5096 = vtanh.f32 %v8984_v39 }
 0x52a   : > { %10122 = vst [vmem:[#allocation5_spill] sm:$0xff] %v8934_v58  ;;  %v8936_v10 = vpop.xlane.xlu1 %3505  ;;  %v8954_v58 = vpop.eup %5088 }
 0x52b   : > { %10123 = vst [vmem:[#allocation36_spill] sm:$0xff] %v8936_v10  ;;  %v8956_v10 = vpop.eup %5090  ;;  %v4527_v59 = vsel %vm4101_vm2, %v8954_v58, 0.0 }
 0x52c   : > { %v4530_v38 = vsel %vm4101_vm2, %v8956_v10, 0.0 }
 0x52d   : > { %v8938_v27 = vpop.xlane.xlu0 %3670 }
 0x52e   : > { %10124 = vst [vmem:[#allocation38_spill] sm:$0xff] %v8938_v27  ;;  %v8940_v63 = vpop.xlane.xlu1 %3673 }
 0x52f   : > { %10125 = vst [vmem:[#allocation51_spill] sm:$0xff] %v8940_v63 }
 0x531   : > { %v8942_v6 = vpop.xlane.xlu0 %3838 }
 0x532   : > { %10126 = vst [vmem:[#allocation52_spill] sm:$0xff] %v8942_v6  ;;  %v8944_v30 = vpop.xlane.xlu1 %3841 }
 0x533   : > { %10127 = vst [vmem:[#allocation53_spill] sm:$0xff] %v8944_v30 }
 0x535   : > { %v8946_v50 = vpop.xlane.xlu0 %4006 }
 0x536   : > { %10128 = vst [vmem:[#allocation18_spill] sm:$0xff] %v8946_v50  ;;  %v8948_v55 = vpop.xlane.xlu1 %4009 }
 0x537   : > { %10129 = vst [vmem:[#allocation15_spill] sm:$0xff] %v8948_v55 }
 0x539   : > { %v8950_v54 = vpop.xlane.xlu0 %3172 }
 0x53a   : > { %10130 = vst [vmem:[#allocation16_spill] sm:$0xff] %v8950_v54  ;;  %v8952_v19 = vpop.xlane.xlu1 %3175 }
 0x53b   : > { %10131 = vst [vmem:[#allocation17_spill] sm:$0xff] %v8952_v19 }
 0x53d   : > { %v8958_v27 = vpop.xlane.xlu0 %3340 }
 0x53e   : > { %10132 = vst [vmem:[#allocation4_spill] sm:$0xff] %v8958_v27  ;;  %v8960_v63 = vpop.xlane.xlu1 %3343 }
 0x53f   : > { %10133 = vst [vmem:[#allocation28_spill] sm:$0xff] %v8960_v63 }
 0x541   : > { %v8966_v30 = vpop.xlane.xlu0 %3508  ;;  %4531 = vadd.xlane.f32.xlu0 %v4530_v38 }
 0x542   : > { %10134 = vst [vmem:[#allocation54_spill] sm:$0xff] %v8966_v30  ;;  %4528 = vadd.xlane.f32.xlu1 %v4527_v59  ;;  %v8968_v54 = vpop.xlane.xlu1 %3511 }
 0x543   : > { %10135 = vst [vmem:[#allocation55_spill] sm:$0xff] %v8968_v54  ;;  %v10143_v54 = vld [vmem:[#allocation29_spill] sm:$0xff] }
 0x545   : > { %v8970_v19 = vpop.xlane.xlu0 %3676 }
 0x546   : > { %10136 = vst [vmem:[#allocation56_spill] sm:$0xff] %v8970_v19  ;;  %v8972_v55 = vpop.xlane.xlu1 %3679 }
 0x547   : > { %10137 = vst [vmem:[#allocation57_spill] sm:$0xff] %v8972_v55  ;;  %v8990_v55 = vadd.f32 %v8899_v8, %v10143_v54 }
 0x549   : > { %v8974_v50 = vpop.xlane.xlu0 %3844  ;;  %5098 = vtanh.f32 %v8990_v55 }
 0x54a   : > { %10138 = vst [vmem:[#allocation33_spill] sm:$0xff] %v8974_v50  ;;  %v8976_v27 = vpop.xlane.xlu1 %3847 }
 0x54b   : > { %10139 = vst [vmem:[#allocation6_spill] sm:$0xff] %v8976_v27 }
 0x54d   : > { %v8978_v63 = vpop.xlane.xlu0 %4012 }
 0x54e   : > { %10140 = vst [vmem:[#allocation32_spill] sm:$0xff] %v8978_v63  ;;  %v8980_v6 = vpop.xlane.xlu1 %4015 }
 0x54f   : > { %10141 = vst [vmem:[#allocation12_spill] sm:$0xff] %v8980_v6 }
 0x551   : > { %v3179_v59 = vpop.xlane.xlu0 %3178 }
 0x552   : > { %v3182_v38 = vpop.xlane.xlu1 %3181 }
 0x553   : > { %4407 = vrot.lane.b32.xlu1 %v8984_v39, %s5260_s21  ;;  %v4215_v39 = vadd.f32 %v8899_v8, %v8723_v22 }
 0x555   : > { %v3347_v50 = vpop.xlane.xlu0 %3346 }
 0x556   : > { %v3350_v19 = vpop.xlane.xlu1 %3349  ;;  %v4062_v6 = vsel %vm4035_vm0, %v3179_v59, %v3347_v50 }
 0x557   : > { %4409 = vrot.lane.b32.xlu0 %v8990_v55, %s5260_s21  ;;  %v4063_v14 = vsel %vm4035_vm0, %v3182_v38, %v3350_v19  ;;  %v4273_v55 = vmul.f32 1.442695, %v8956_v10 }
 0x559   : > { %v3515_v27 = vpop.xlane.xlu0 %3514 }
 0x55a   : > { %v4095_v63 = vsel %vm4068_vm1, %v4062_v6, %v3515_v27  ;;  %v3518_v30 = vpop.xlane.xlu1 %3517 }
 0x55b   : > { %v4096_v23 = vsel %vm4068_vm1, %v4063_v14, %v3518_v30 }
 0x55d   : > { %v3683_v21 = vpop.xlane.xlu0 %3682 }
 0x55e   : > { %v4128_v20 = vsel %vm4101_vm2, %v4095_v63, %v3683_v21  ;;  %v3686_v54 = vpop.xlane.xlu1 %3685 }
 0x55f   : > { %v4129_v2 = vsel %vm4101_vm2, %v4096_v23, %v3686_v54 }
 0x561   : > { %v3851_v35 = vpop.xlane.xlu0 %3850 }
 0x562   : > { %v4161_v1 = vsel %vm4134_vm3, %v4128_v20, %v3851_v35  ;;  %v3854_v48 = vpop.xlane.xlu1 %3853 }
 0x563   : > { %v4162_v50 = vsel %vm4134_vm3, %v4129_v2, %v3854_v48  ;;  %v9011_v2 = vpop.eup %5092 }
 0x565   : > { %v4019_v59 = vpop.xlane.xlu0 %4018 }
 0x566   : > { %v9003_v19 = vsel %vm4167_vm4, %v4161_v1, %v4019_v59  ;;  %v4022_v27 = vpop.xlane.xlu1 %4021  ;;  %v9013_v1 = vpop.eup %5094 }
 0x567   : > { %v9007_v6 = vsel %vm4167_vm4, %v4162_v50, %v4022_v27  ;;  %v4536_v42 = vsel %vm4101_vm2, %v9013_v1, 0.0  ;;  %v4533_v50 = vsel %vm4101_vm2, %v9011_v2, 0.0 }
 0x568   : > { %10144 = vst [vmem:[#allocation19_spill] sm:$0xff] %v9007_v6 }
 0x569   : > { %v3185_v21 = vpop.xlane.xlu0 %3184 }
 0x56a   : > { %v3188_v63 = vpop.xlane.xlu1 %3187 }
 0x56d   : > { %v3353_v23 = vpop.xlane.xlu0 %3352 }
 0x56e   : > { %v4064_v30 = vsel %vm4035_vm0, %v3185_v21, %v3353_v23  ;;  %v3356_v35 = vpop.xlane.xlu1 %3355 }
 0x56f   : > { %v4065_v20 = vsel %vm4035_vm0, %v3188_v63, %v3356_v35 }
 0x571   : > { %v3521_v48 = vpop.xlane.xlu0 %3520 }
 0x572   : > { %v4097_v38 = vsel %vm4068_vm1, %v4064_v30, %v3521_v48  ;;  %v3524_v18 = vpop.xlane.xlu1 %3523 }
 0x573   : > { %v4098_v14 = vsel %vm4068_vm1, %v4065_v20, %v3524_v18 }
 0x575   : > { %v3689_v54 = vpop.xlane.xlu0 %3688 }
 0x576   : > { %v4130_v59 = vsel %vm4101_vm2, %v4097_v38, %v3689_v54  ;;  %v3692_v27 = vpop.xlane.xlu1 %3691  ;;  %4534 = vadd.xlane.f32.xlu0 %v4533_v50 }
 0x577   : > { %4537 = vadd.xlane.f32.xlu1 %v4536_v42  ;;  %v4131_v21 = vsel %vm4101_vm2, %v4098_v14, %v3692_v27  ;;  %v4213_v42 = vadd.f32 %v8899_v8, %v8697_v15 }
 0x579   : > { %v3857_v63 = vpop.xlane.xlu0 %3856 }
 0x57a   : > { %v4163_v23 = vsel %vm4134_vm3, %v4130_v59, %v3857_v63  ;;  %v3860_v30 = vpop.xlane.xlu1 %3859  ;;  %v4214_v63 = vadd.f32 %v8899_v8, %v8700_v60 }
 0x57b   : > { %v4164_v35 = vsel %vm4134_vm3, %v4131_v21, %v3860_v30 }
 0x57d   : > { %v4025_v20 = vpop.xlane.xlu0 %4024 }
 0x57e   : > { %v9026_v48 = vsel %vm4167_vm4, %v4163_v23, %v4025_v20  ;;  %v4028_v18 = vpop.xlane.xlu1 %4027 }
 0x57f   : > { %10145 = vst [vmem:[#allocation3_spill] sm:$0xff] %v9026_v48  ;;  %v9029_v6 = vsel %vm4167_vm4, %v4164_v35, %v4028_v18 }
 0x580   : > { %10146 = vst [vmem:[#allocation21_spill] sm:$0xff] %v9029_v6 }
 0x581   : > { %v3191_v38 = vpop.xlane.xlu0 %3190 }
 0x582   : > { %v3194_v54 = vpop.xlane.xlu1 %3193 }
 0x585   : > { %v3359_v14 = vpop.xlane.xlu0 %3358 }
 0x586   : > { %v3362_v50 = vpop.xlane.xlu1 %3361  ;;  %v4066_v59 = vsel %vm4035_vm0, %v3191_v38, %v3359_v14 }
 0x587   : > { %v4067_v27 = vsel %vm4035_vm0, %v3194_v54, %v3362_v50 }
 0x588   : > { %4411 = vrot.lane.b32.xlu1 %v4213_v42, %s5260_s21 }
 0x589   : > { %v3527_v21 = vpop.xlane.xlu0 %3526 }
 0x58a   : > { %v3530_v23 = vpop.xlane.xlu1 %3529  ;;  %v4099_v30 = vsel %vm4068_vm1, %v4066_v59, %v3527_v21  ;;  %v9053_v21 = vpop.eup %5096 }
 0x58b   : > { %v4100_v35 = vsel %vm4068_vm1, %v4067_v27, %v3530_v23  ;;  %v9055_v23 = vpop.eup %5098 }
 0x58c   : > { %4413 = vrot.lane.b32.xlu0 %v4214_v63, %s5260_s21 }
 0x58d   : > { %v3695_v15 = vpop.xlane.xlu0 %3694 }
 0x58e   : > { %v3698_v20 = vpop.xlane.xlu1 %3697  ;;  %v4132_v18 = vsel %vm4101_vm2, %v4099_v30, %v3695_v15  ;;  %v4542_v30 = vsel %vm4101_vm2, %v9055_v23, 0.0 }
 0x58f   : > { %v4133_v38 = vsel %vm4101_vm2, %v4100_v35, %v3698_v20  ;;  %v4539_v35 = vsel %vm4101_vm2, %v9053_v21, 0.0 }
 0x591   : > { %v3863_v54 = vpop.xlane.xlu0 %3862 }
 0x592   : > { %v3866_v14 = vpop.xlane.xlu1 %3865  ;;  %v4165_v50 = vsel %vm4134_vm3, %v4132_v18, %v3863_v54 }
 0x593   : > { %v4166_v6 = vsel %vm4134_vm3, %v4133_v38, %v3866_v14  ;;  %v5216_v14 = vld [vmem:[%s5339_s23 + $0x8] sm:$0xff] }
 0x595   : > { %v4031_v60 = vpop.xlane.xlu0 %4030 }
 0x596   : > { %v4034_v48 = vpop.xlane.xlu1 %4033  ;;  %v9046_v59 = vsel %vm4167_vm4, %v4165_v50, %v4031_v60  ;;  %v5217_v50 = vld [vmem:[%s5339_s23] sm:$0xff] }
 0x597   : > { %v9049_v27 = vsel %vm4167_vm4, %v4166_v6, %v4034_v48  ;;  %v4271_v6 = vmul.f32 1.442695, %v8954_v58  ;;  %v4216_v48 = vadd.f32 %v8899_v8, %v8726_v3 }
 0x599   : > { %5100 = vpow2.f32 %v4271_v6  ;;  %v4400_v20 = vpop.permute.xlu0 %4399 }
 0x59a   : > { %5102 = vpow2.f32 %v4273_v55  ;;  %v4402_v15 = vpop.permute.xlu1 %4401 }
 0x59b   : > { %5104 = vtanh.f32 %v4213_v42  ;;  %v4217_v42 = vadd.f32 %v8899_v8, %v8749_v33  ;;  %v5219_v33 = vld [vmem:[%s5339_s23 + $0x18] sm:$0xff] }
 0x59c   : > { %5106 = vtanh.f32 %v4214_v63  ;;  %v4277_v63 = vmul.f32 1.442695, %v9013_v1 }
 0x59d   : > { %v4406_v54 = vpop.permute.xlu0 %4405 }
 0x59e   : > { %v4404_v38 = vpop.permute.xlu1 %4403 }
 0x5a3   : > { %v5101_v18 = vpop.eup %5100 }
 0x5a4   : > { %v5103_v58 = vpop.eup %5102  ;;  %v4335_v10 = vmul.f32 %v5217_v50, %v5101_v18 }
 0x5a5   : > { %v4336_v22 = vmul.f32 %v5216_v14, %v5103_v58  ;;  %v4275_v14 = vmul.f32 1.442695, %v9011_v2 }
 0x5a7   : > { %v4496_v60 = vadd.f32 %v4402_v15, %v4336_v22  ;;  %v9084_v15 = vpop.eup %5104  ;;  %5108 = vpow2.f32 %v4275_v14  ;;  %v4218_v22 = vadd.f32 %v8899_v8, %v8752_v47 }
 0x5a8   : > { %v4545_v58 = vsel %vm4101_vm2, %v9084_v15, 0.0  ;;  %5110 = vpow2.f32 %v4277_v63 }
 0x5a9   : > { %5112 = vtanh.f32 %v4215_v39 }
 0x5aa   : > { %5114 = vtanh.f32 %v4216_v48 }
 0x5ab   : > { %4540 = vadd.xlane.f32.xlu0 %v4539_v35 }
 0x5ac   : > { %4543 = vadd.xlane.f32.xlu1 %v4542_v30  ;;  %v4495_v30 = vadd.f32 %v4400_v20, %v4335_v10  ;;  %v9086_v20 = vpop.eup %5106 }
 0x5ad   : > { %v4548_v18 = vsel %vm4101_vm2, %v9086_v20, 0.0 }
 0x5b1   : > { %v5109_v50 = vpop.eup %5108 }
 0x5b2   : > { %v5111_v10 = vpop.eup %5110 }
 0x5b3   : > { %v9108_v14 = vpop.eup %5112 }
 0x5b4   : > { %v9110_v63 = vpop.eup %5114 }
 0x5bd   : > { %4415 = vrot.lane.b32.xlu1 %v4215_v39, %s5260_s21  ;;  %v4219_v39 = vadd.f32 %v8899_v8, %v8775_v62  ;;  %v5221_v62 = vld [vmem:[%s5339_s23 + $0x28] sm:$0xff] }
 0x5c1   : > { %4417 = vrot.lane.b32.xlu0 %v4216_v48, %s5260_s21  ;;  %v4281_v48 = vmul.f32 1.442695, %v9055_v23 }
 0x5ce   : > { %v4532_v35 = vpop.xlane.xlu0 %4531 }
 0x5cf   : > { %v4529_v3 = vpop.xlane.xlu1 %4528  ;;  %v4624_v55 = vsel %vm4101_vm2, %v4496_v60, %v4532_v35  ;;  %v4338_v35 = vmul.f32 %v5219_v33, %v5111_v10  ;;  %v4220_v10 = vadd.f32 %v8899_v8, %v8778_v49 }
 0x5d0   : > { %v4623_v6 = vsel %vm4101_vm2, %v4495_v30, %v4529_v3  ;;  %4656 = vst.msk [vmem:[%s9076_s25 + $0x8] sm:$0xff] %vm4134_vm3, %v4624_v55  ;;  %v5218_v30 = vld [vmem:[%s5339_s23 + $0x10] sm:$0xff] }
 0x5d1   : > { %4655 = vst.msk [vmem:[%s9076_s25] sm:$0xff] %vm4134_vm3, %v4623_v6  ;;  %v4337_v3 = vmul.f32 %v5218_v30, %v5109_v50  ;;  %v4498_v6 = vadd.f32 %v4406_v54, %v4338_v35  ;;  %v4551_v54 = vsel %vm4101_vm2, %v9108_v14, 0.0  ;;  %v4279_v50 = vmul.f32 1.442695, %v9053_v21  ;;  %v5220_v35 = vld [vmem:[%s5339_s23 + $0x20] sm:$0xff] }
 0x5d2   : > { %v4410_v2 = vpop.permute.xlu0 %4409 }
 0x5d3   : > { %v4408_v60 = vpop.permute.xlu1 %4407  ;;  %v4497_v1 = vadd.f32 %v4404_v38, %v4337_v3  ;;  %v4554_v38 = vsel %vm4101_vm2, %v9110_v63, 0.0  ;;  %5116 = vpow2.f32 %v4279_v50  ;;  %v4182_v50 = vsel %vm4167_vm4, %v8797_v29, %v8804_v44 }
 0x5d4   : > { %5118 = vpow2.f32 %v4281_v48  ;;  %v4285_v48 = vmul.f32 1.442695, %v9086_v20  ;;  %v5222_v20 = vld [vmem:[%s5339_s23 + $0x30] sm:$0xff] }
 0x5d5   : > { %5120 = vtanh.f32 %v4217_v42 }
 0x5d6   : > { %5122 = vtanh.f32 %v4218_v22 }
 0x5dd   : > { %v5117_v30 = vpop.eup %5116 }
 0x5de   : > { %v5119_v3 = vpop.eup %5118 }
 0x5e0   : > { %4546 = vadd.xlane.f32.xlu0 %v4545_v58 }
 0x5e1   : > { %4549 = vadd.xlane.f32.xlu1 %v4548_v18 }
 0x5f2   : > { %4419 = vrot.lane.b32.xlu1 %v4217_v42, %s5260_s21  ;;  %v4283_v42 = vmul.f32 1.442695, %v9084_v15 }
 0x5f4   : > { %5124 = vpow2.f32 %v4283_v42  ;;  %v4053_v42 = vsel %vm4035_vm0, %v8812_v13, %v8818_v52 }
 0x5f5   : > { %5126 = vpow2.f32 %v4285_v48  ;;  %v4086_v48 = vsel %vm4068_vm1, %v4053_v42, %v8824_v51 }
 0x5f6   : > { %4421 = vrot.lane.b32.xlu0 %v4218_v22, %s5260_s21  ;;  %v9145_v22 = vadd.f32 %v8899_v8, %v4182_v50  ;;  %5128 = vtanh.f32 %v4219_v39 }
 0x5f7   : > { %5130 = vtanh.f32 %v4220_v10 }
 0x603   : > { %v4535_v18 = vpop.xlane.xlu0 %4534 }
 0x604   : > { %v4538_v55 = vpop.xlane.xlu1 %4537  ;;  %v4625_v47 = vsel %vm4101_vm2, %v4497_v1, %v4535_v18  ;;  %v4339_v1 = vmul.f32 %v5220_v35, %v5117_v30  ;;  %v4183_v30 = vsel %vm4167_vm4, %v8800_v17, %v8806_v5 }
 0x605   : > { %v4626_v58 = vsel %vm4101_vm2, %v4498_v6, %v4538_v55  ;;  %4657 = vst.msk [vmem:[%s9076_s25 + $0x10] sm:$0xff] %vm4134_vm3, %v4625_v47  ;;  %v4340_v6 = vmul.f32 %v5221_v62, %v5119_v3  ;;  %v4222_v3 = vadd.f32 %v8899_v8, %v4183_v30  ;;  %v5223_v62 = vld [vmem:[%s5339_s23 + $0x38] sm:$0xff]  ;;  %v5225_v30 = vld [vmem:[%s5339_s23 + $0x48] sm:$0xff] }
 0x606   : > { %4658 = vst.msk [vmem:[%s9076_s25 + $0x18] sm:$0xff] %vm4134_vm3, %v4626_v58  ;;  %v4499_v23 = vadd.f32 %v4408_v60, %v4339_v1 }
 0x607   : > { %v4414_v21 = vpop.permute.xlu0 %4413  ;;  %v4500_v55 = vadd.f32 %v4410_v2, %v4340_v6 }
 0x608   : > { %v4412_v33 = vpop.permute.xlu1 %4411 }
 0x615   : > { %4552 = vadd.xlane.f32.xlu0 %v4551_v54 }
 0x616   : > { %4555 = vadd.xlane.f32.xlu1 %v4554_v38  ;;  %v9132_v38 = vpop.eup %5120 }
 0x617   : > { %v9134_v54 = vpop.eup %5122  ;;  %v4557_v2 = vsel %vm4101_vm2, %v9132_v38, 0.0 }
 0x618   : > { %v4560_v60 = vsel %vm4101_vm2, %v9134_v54, 0.0  ;;  %v5125_v29 = vpop.eup %5124 }
 0x619   : > { %v5127_v44 = vpop.eup %5126  ;;  %v4341_v1 = vmul.f32 %v5222_v20, %v5125_v29 }
 0x61a   : > { %v4342_v6 = vmul.f32 %v5223_v62, %v5127_v44 }
 0x61b   : > { %v4501_v17 = vadd.f32 %v4412_v33, %v4341_v1 }
 0x61c   : > { %v4502_v5 = vadd.f32 %v4414_v21, %v4342_v6 }
 0x627   : > { %4423 = vrot.lane.b32.xlu1 %v4219_v39, %s5260_s21 }
 0x62b   : > { %4425 = vrot.lane.b32.xlu0 %v4220_v10, %s5260_s21 }
 0x638   : > { %v4541_v58 = vpop.xlane.xlu0 %4540 }
 0x639   : > { %v4544_v18 = vpop.xlane.xlu1 %4543  ;;  %v4627_v49 = vsel %vm4101_vm2, %v4499_v23, %v4541_v58 }
 0x63a   : > { %v4628_v47 = vsel %vm4101_vm2, %v4500_v55, %v4544_v18  ;;  %4659 = vst.msk [vmem:[%s9076_s25 + $0x20] sm:$0xff] %vm4134_vm3, %v4627_v49 }
 0x63b   : > { %4660 = vst.msk [vmem:[%s9076_s25 + $0x28] sm:$0xff] %vm4134_vm3, %v4628_v47  ;;  %v9163_v47 = vpop.eup %5128 }
 0x63c   : > { %v4418_v35 = vpop.permute.xlu0 %4417  ;;  %v9165_v49 = vpop.eup %5130  ;;  %v4563_v21 = vsel %vm4101_vm2, %v9163_v47, 0.0 }
 0x63d   : > { %v4416_v15 = vpop.permute.xlu1 %4415  ;;  %v4566_v33 = vsel %vm4101_vm2, %v9165_v49, 0.0 }
 0x64a   : > { %4558 = vadd.xlane.f32.xlu0 %v4557_v2 }
 0x64b   : > { %4561 = vadd.xlane.f32.xlu1 %v4560_v60  ;;  %v4052_v60 = vsel %vm4035_vm0, %v8810_v26, %v8816_v56  ;;  %v4287_v26 = vmul.f32 1.442695, %v9108_v14  ;;  %v4119_v56 = vsel %vm4101_vm2, %v4086_v48, %v8830_v43 }
 0x64c   : > { %v4085_v39 = vsel %vm4068_vm1, %v4052_v60, %v8822_v24 }
 0x64d   : > { %v4118_v10 = vsel %vm4101_vm2, %v4085_v39, %v8828_v9  ;;  %v4289_v9 = vmul.f32 1.442695, %v9110_v63  ;;  %5132 = vpow2.f32 %v4287_v26  ;;  %v5224_v63 = vld [vmem:[%s5339_s23 + $0x40] sm:$0xff] }
 0x64e   : > { %v4151_v2 = vsel %vm4134_vm3, %v4118_v10, %v8834_v46  ;;  %v4152_v46 = vsel %vm4134_vm3, %v4119_v56, %v8836_v37 }
 0x64f   : > { %v4184_v50 = vsel %vm4167_vm4, %v4151_v2, %v8840_v7  ;;  %v4185_v13 = vsel %vm4167_vm4, %v4152_v46, %v8842_v16  ;;  %5134 = vpow2.f32 %v4289_v9  ;;  %v4056_v46 = vsel %vm4035_vm0, %v8882_v0, %v8886_v25  ;;  %v10152_v25 = vld [vmem:[#allocation39_spill] sm:$0xff] }
 0x650   : > { %v9191_v24 = vadd.f32 %v8899_v8, %v4184_v50  ;;  %v4224_v52 = vadd.f32 %v8899_v8, %v4185_v13  ;;  %5136 = vtanh.f32 %v9145_v22  ;;  %v4295_v0 = vmul.f32 1.442695, %v9163_v47 }
 0x651   : > { %5138 = vtanh.f32 %v4222_v3 }
 0x657   : > { %v5133_v51 = vpop.eup %5132 }
 0x658   : > { %v4343_v37 = vmul.f32 %v5224_v63, %v5133_v51  ;;  %v10150_v63 = vld [vmem:[#allocation50_spill] sm:$0xff] }
 0x659   : > { %v5135_v43 = vpop.eup %5134 }
 0x65a   : > { %v4344_v29 = vmul.f32 %v5225_v30, %v5135_v43  ;;  %v4503_v16 = vadd.f32 %v4416_v15, %v4343_v37  ;;  %v10148_v43 = vld [vmem:[#allocation37_spill] sm:$0xff]  ;;  %v10151_v30 = vld [vmem:[#allocation40_spill] sm:$0xff] }
 0x65c   : > { %4427 = vrot.lane.b32.xlu1 %v9145_v22, %s5260_s21  ;;  %v4504_v44 = vadd.f32 %v4418_v35, %v4344_v29 }
 0x660   : > { %4429 = vrot.lane.b32.xlu0 %v4222_v3, %s5260_s21 }
 0x66d   : > { %v4547_v55 = vpop.xlane.xlu0 %4546 }
 0x66e   : > { %v4550_v23 = vpop.xlane.xlu1 %4549  ;;  %v4629_v58 = vsel %vm4101_vm2, %v4501_v17, %v4547_v55  ;;  %v9211_v17 = vpop.eup %5136 }
 0x66f   : > { %v4630_v18 = vsel %vm4101_vm2, %v4502_v5, %v4550_v23  ;;  %4661 = vst.msk [vmem:[%s9076_s25 + $0x30] sm:$0xff] %vm4134_vm3, %v4629_v58  ;;  %v9213_v5 = vpop.eup %5138  ;;  %v4569_v35 = vsel %vm4101_vm2, %v9211_v17, 0.0  ;;  %v4054_v23 = vsel %vm4035_vm0, %v8846_v28, %v8852_v32  ;;  %v4055_v58 = vsel %vm4035_vm0, %v8848_v40, %v8854_v12 }
 0x670   : > { %4662 = vst.msk [vmem:[%s9076_s25 + $0x38] sm:$0xff] %vm4134_vm3, %v4630_v18  ;;  %v4572_v15 = vsel %vm4101_vm2, %v9213_v5, 0.0  ;;  %v4087_v22 = vsel %vm4068_vm1, %v4054_v23, %v8858_v45  ;;  %v4291_v28 = vmul.f32 1.442695, %v9132_v38  ;;  %v5228_v23 = vld [vmem:[%s5339_s23 + $0x60] sm:$0xff] }
 0x671   : > { %v4422_v14 = vpop.permute.xlu0 %4421  ;;  %v4120_v3 = vsel %vm4101_vm2, %v4087_v22, %v8864_v4  ;;  %v4293_v4 = vmul.f32 1.442695, %v9134_v54  ;;  %v5226_v54 = vld [vmem:[%s5339_s23 + $0x50] sm:$0xff] }
 0x672   : > { %v4420_v7 = vpop.permute.xlu1 %4419  ;;  %v4153_v55 = vsel %vm4134_vm3, %v4120_v3, %v8870_v31  ;;  %5140 = vpow2.f32 %v4291_v28  ;;  %v5229_v3 = vld [vmem:[%s5339_s23 + $0x68] sm:$0xff] }
 0x673   : > { %v4186_v18 = vsel %vm4167_vm4, %v4153_v55, %v8876_v34  ;;  %5142 = vpow2.f32 %v4293_v4 }
 0x674   : > { %v9239_v45 = vadd.f32 %v8899_v8, %v4186_v18  ;;  %5144 = vtanh.f32 %v9191_v24 }
 0x675   : > { %5146 = vtanh.f32 %v4224_v52 }
 0x676   : > { %5148 = vpow2.f32 %v4295_v0  ;;  %v5230_v0 = vld [vmem:[%s5339_s23 + $0x70] sm:$0xff] }
 0x67f   : > { %4564 = vadd.xlane.f32.xlu0 %v4563_v21  ;;  %v5227_v21 = vld [vmem:[%s5339_s23 + $0x58] sm:$0xff] }
 0x680   : > { %4567 = vadd.xlane.f32.xlu1 %v4566_v33  ;;  %v4088_v33 = vsel %vm4068_vm1, %v4055_v58, %v8860_v61  ;;  %v5141_v61 = vpop.eup %5140 }
 0x681   : > { %v4121_v32 = vsel %vm4101_vm2, %v4088_v33, %v8866_v41  ;;  %v5143_v41 = vpop.eup %5142 }
 0x682   : > { %v4154_v31 = vsel %vm4134_vm3, %v4121_v32, %v8872_v36  ;;  %v4345_v36 = vmul.f32 %v5226_v54, %v5141_v61  ;;  %v4346_v60 = vmul.f32 %v5227_v21, %v5143_v41  ;;  %v9259_v48 = vpop.eup %5144 }
 0x683   : > { %v4187_v40 = vsel %vm4167_vm4, %v4154_v31, %v8878_v11  ;;  %v9261_v26 = vpop.eup %5146  ;;  %v4575_v9 = vsel %vm4101_vm2, %v9259_v48, 0.0 }
 0x684   : > { %v4226_v12 = vadd.f32 %v8899_v8, %v4187_v40  ;;  %v4505_v11 = vadd.f32 %v4420_v7, %v4345_v36  ;;  %v4506_v39 = vadd.f32 %v4422_v14, %v4346_v60  ;;  %v4578_v56 = vsel %vm4101_vm2, %v9261_v26, 0.0  ;;  %v10149_v14 = vld [vmem:[#allocation30_spill] sm:$0xff]  ;;  %v10157_v36 = vld [vmem:[#allocation5_spill] sm:$0xff]  ;;  %v10159_v60 = vld [vmem:[#allocation52_spill] sm:$0xff] }
 0x685   : > { %v4057_v37 = vsel %vm4035_vm0, %v10150_v63, %v10149_v14  ;;  %v10166_v14 = vld [vmem:[#allocation15_spill] sm:$0xff] }
 0x686   : > { %v4090_v29 = vsel %vm4068_vm1, %v4057_v37, %v10151_v30 }
 0x691   : > { %4431 = vrot.lane.b32.xlu1 %v9191_v24, %s5260_s21  ;;  %v4089_v24 = vsel %vm4068_vm1, %v4056_v46, %v8890_v57  ;;  %v4123_v57 = vsel %vm4101_vm2, %v4090_v29, %v10152_v25  ;;  %v4299_v46 = vmul.f32 1.442695, %v9211_v17 }
 0x692   : > { %v4122_v13 = vsel %vm4101_vm2, %v4089_v24, %v8894_v53  ;;  %v10164_v24 = vld [vmem:[#allocation51_spill] sm:$0xff] }
 0x695   : > { %4433 = vrot.lane.b32.xlu0 %v4224_v52, %s5260_s21  ;;  %v10147_v52 = vld [vmem:[#allocation41_spill] sm:$0xff] }
 0x696   : > { %v4155_v51 = vsel %vm4134_vm3, %v4122_v13, %v10147_v52 }
 0x697   : > { %v4188_v7 = vsel %vm4167_vm4, %v4155_v51, %v10148_v43  ;;  %v4301_v51 = vmul.f32 1.442695, %v9213_v5  ;;  %v10165_v43 = vld [vmem:[#allocation53_spill] sm:$0xff] }
 0x698   : > { %v9287_v53 = vadd.f32 %v8899_v8, %v4188_v7 }
 0x6a2   : > { %v4553_v1 = vpop.xlane.xlu0 %4552 }
 0x6a3   : > { %v4556_v20 = vpop.xlane.xlu1 %4555  ;;  %v4631_v6 = vsel %vm4101_vm2, %v4503_v16, %v4553_v1  ;;  %v4297_v16 = vmul.f32 1.442695, %v9165_v49  ;;  %v10154_v1 = vld [vmem:[#allocation2_spill] sm:$0xff] }
 0x6a4   : > { %v4632_v62 = vsel %vm4101_vm2, %v4504_v44, %v4556_v20  ;;  %4663 = vst.msk [vmem:[%s9076_s25 + $0x40] sm:$0xff] %vm4134_vm3, %v4631_v6  ;;  %v10153_v44 = vld [vmem:[#allocation14_spill] sm:$0xff]  ;;  %v5149_v6 = vpop.eup %5148 }
 0x6a5   : > { %4664 = vst.msk [vmem:[%s9076_s25 + $0x48] sm:$0xff] %vm4134_vm3, %v4632_v62  ;;  %v4156_v20 = vsel %vm4134_vm3, %v4123_v57, %v10153_v44  ;;  %5150 = vpow2.f32 %v4297_v16  ;;  %v4347_v22 = vmul.f32 %v5228_v23, %v5149_v6  ;;  %v5231_v57 = vld [vmem:[%s5339_s23 + $0x78] sm:$0xff] }
 0x6a6   : > { %v4426_v38 = vpop.permute.xlu0 %4425  ;;  %v4189_v62 = vsel %vm4167_vm4, %v4156_v20, %v10154_v1  ;;  %5152 = vtanh.f32 %v9239_v45 }
 0x6a7   : > { %v4424_v34 = vpop.permute.xlu1 %4423  ;;  %v4228_v47 = vadd.f32 %v8899_v8, %v4189_v62  ;;  %5154 = vtanh.f32 %v4226_v12 }
 0x6a8   : > { %v4507_v18 = vadd.f32 %v4424_v34, %v4347_v22  ;;  %v10155_v34 = vld [vmem:[#allocation11_spill] sm:$0xff]  ;;  %5156 = vpow2.f32 %v4299_v46  ;;  %v5232_v46 = vld [vmem:[%s5339_s23 + $0x80] sm:$0xff] }
 0x6a9   : > { %5158 = vpow2.f32 %v4301_v51 }
 0x6aa   : > { %5160 = vtanh.f32 %v9287_v53 }
 0x6ab   : > { %5162 = vtanh.f32 %v4228_v47 }
 0x6b4   : > { %4570 = vadd.xlane.f32.xlu0 %v4569_v35 }
 0x6b5   : > { %4573 = vadd.xlane.f32.xlu1 %v4572_v15  ;;  %v5151_v15 = vpop.eup %5150 }
 0x6b6   : > { %v4348_v55 = vmul.f32 %v5229_v3, %v5151_v15  ;;  %v9307_v31 = vpop.eup %5152  ;;  %v10167_v3 = vld [vmem:[#allocation4_spill] sm:$0xff] }
 0x6b7   : > { %v9309_v40 = vpop.eup %5154  ;;  %v4581_v41 = vsel %vm4101_vm2, %v9307_v31, 0.0 }
 0x6b8   : > { %v4508_v58 = vadd.f32 %v4426_v38, %v4348_v55  ;;  %v4584_v61 = vsel %vm4101_vm2, %v9309_v40, 0.0  ;;  %v10156_v38 = vld [vmem:[#allocation43_spill] sm:$0xff]  ;;  %v5157_v37 = vpop.eup %5156  ;;  %v10168_v55 = vld [vmem:[#allocation16_spill] sm:$0xff] }
 0x6b9   : > { %v4058_v54 = vsel %vm4035_vm0, %v10156_v38, %v10155_v34  ;;  %v5159_v30 = vpop.eup %5158  ;;  %v4349_v25 = vmul.f32 %v5230_v0, %v5157_v37  ;;  %v10174_v34 = vld [vmem:[#allocation17_spill] sm:$0xff] }
 0x6ba   : > { %v4350_v16 = vmul.f32 %v5231_v57, %v5159_v30  ;;  %v9355_v23 = vpop.eup %5160  ;;  %v4307_v57 = vmul.f32 1.442695, %v9307_v31 }
 0x6bb   : > { %v9357_v22 = vpop.eup %5162 }
 0x6c6   : > { %4435 = vrot.lane.b32.xlu1 %v9239_v45, %s5260_s21  ;;  %v4091_v45 = vsel %vm4068_vm1, %v4058_v54, %v10157_v36  ;;  %v10175_v54 = vld [vmem:[#allocation55_spill] sm:$0xff] }
 0x6ca   : > { %4437 = vrot.lane.b32.xlu0 %v4226_v12, %s5260_s21  ;;  %v10158_v12 = vld [vmem:[#allocation38_spill] sm:$0xff] }
 0x6cb   : > { %v4124_v21 = vsel %vm4101_vm2, %v4091_v45, %v10158_v12  ;;  %v4303_v45 = vmul.f32 1.442695, %v9259_v48  ;;  %v10176_v12 = vld [vmem:[#allocation57_spill] sm:$0xff] }
 0x6cd   : > { %5164 = vpow2.f32 %v4303_v45 }
 0x6d7   : > { %v4559_v2 = vpop.xlane.xlu0 %4558 }
 0x6d8   : > { %v4562_v10 = vpop.xlane.xlu1 %4561  ;;  %v4633_v42 = vsel %vm4101_vm2, %v4505_v11, %v4559_v2  ;;  %v4157_v11 = vsel %vm4134_vm3, %v4124_v21, %v10159_v60  ;;  %v10161_v2 = vld [vmem:[#allocation8_spill] sm:$0xff] }
 0x6d9   : > { %v4634_v50 = vsel %vm4101_vm2, %v4506_v39, %v4562_v10  ;;  %4665 = vst.msk [vmem:[%s9076_s25 + $0x50] sm:$0xff] %vm4134_vm3, %v4633_v42  ;;  %v10160_v39 = vld [vmem:[#allocation18_spill] sm:$0xff] }
 0x6da   : > { %4666 = vst.msk [vmem:[%s9076_s25 + $0x58] sm:$0xff] %vm4134_vm3, %v4634_v50  ;;  %v4190_v10 = vsel %vm4167_vm4, %v4157_v11, %v10160_v39  ;;  %v10162_v50 = vld [vmem:[#allocation42_spill] sm:$0xff]  ;;  %v4305_v11 = vmul.f32 1.442695, %v9261_v26 }
 0x6db   : > { %v4430_v35 = vpop.permute.xlu0 %4429  ;;  %v4059_v42 = vsel %vm4035_vm0, %v10162_v50, %v10161_v2  ;;  %v9335_v52 = vadd.f32 %v8899_v8, %v4190_v10  ;;  %v10177_v39 = vld [vmem:[#allocation6_spill] sm:$0xff]  ;;  %v10178_v2 = vld [vmem:[#allocation12_spill] sm:$0xff] }
 0x6dc   : > { %v4428_v49 = vpop.permute.xlu1 %4427  ;;  %v4510_v20 = vadd.f32 %v4430_v35, %v4350_v16  ;;  %v4587_v35 = vsel %vm4101_vm2, %v9355_v23, 0.0  ;;  %5166 = vpow2.f32 %v4305_v11  ;;  %v10179_v16 = vld [vmem:[#allocation19_spill] sm:$0xff] }
 0x6dd   : > { %v4509_v44 = vadd.f32 %v4428_v49, %v4349_v25  ;;  %v4590_v49 = vsel %vm4101_vm2, %v9357_v22, 0.0  ;;  %5168 = vtanh.f32 %v9335_v52 }
 0x6e9   : > { %4576 = vadd.xlane.f32.xlu0 %v4575_v9 }
 0x6ea   : > { %4579 = vadd.xlane.f32.xlu1 %v4578_v56  ;;  %v10163_v56 = vld [vmem:[#allocation36_spill] sm:$0xff] }
 0x6eb   : > { %v4092_v9 = vsel %vm4068_vm1, %v4059_v42, %v10163_v56  ;;  %v5165_v42 = vpop.eup %5164 }
 0x6ec   : > { %v4125_v13 = vsel %vm4101_vm2, %v4092_v9, %v10164_v24  ;;  %v5167_v56 = vpop.eup %5166  ;;  %v4351_v24 = vmul.f32 %v5232_v46, %v5165_v42  ;;  %v5238_v46 = vld [vmem:[%s9526_s10] ss:$0 sm:$0xff] }
 0x6ed   : > { %v4158_v7 = vsel %vm4134_vm3, %v4125_v13, %v10165_v43  ;;  %v5233_v13 = vld [vmem:[%s5339_s23 + $0x88] sm:$0xff]  ;;  %v9400_v0 = vpop.eup %5168 }
 0x6ee   : > { %v4191_v63 = vsel %vm4167_vm4, %v4158_v7, %v10166_v14  ;;  %v4352_v51 = vmul.f32 %v5233_v13, %v5167_v56 }
 0x6ef   : > { %v4230_v17 = vadd.f32 %v8899_v8, %v4191_v63 }
 0x6f1   : > { %5170 = vtanh.f32 %v4230_v17 }
 0x6f2   : > { %5172 = vpow2.f32 %v4307_v57 }
 0x6fb   : > { %4439 = vrot.lane.b32.xlu1 %v9287_v53, %s5260_s21  ;;  %v9402_v25 = vpop.eup %5170 }
 0x6fc   : > { %v4317_v13 = vmul.f32 1.442695, %v9402_v25 }
 0x6ff   : > { %4441 = vrot.lane.b32.xlu0 %v4228_v47, %s5260_s21  ;;  %v10170_v47 = vld [vmem:[#allocation56_spill] sm:$0xff] }
 0x70c   : > { %v4565_v28 = vpop.xlane.xlu0 %4564 }
 0x70d   : > { %v4568_v33 = vpop.xlane.xlu1 %4567  ;;  %v4635_v4 = vsel %vm4101_vm2, %v4507_v18, %v4565_v28  ;;  %v4060_v18 = vsel %vm4035_vm0, %v10168_v55, %v10167_v3  ;;  %v10171_v28 = vld [vmem:[#allocation33_spill] sm:$0xff] }
 0x70e   : > { %v4636_v32 = vsel %vm4101_vm2, %v4508_v58, %v4568_v33  ;;  %4667 = vst.msk [vmem:[%s9076_s25 + $0x60] sm:$0xff] %vm4134_vm3, %v4635_v4  ;;  %v10169_v58 = vld [vmem:[#allocation54_spill] sm:$0xff]  ;;  %v10172_v4 = vld [vmem:[#allocation32_spill] sm:$0xff] }
 0x70f   : > { %4668 = vst.msk [vmem:[%s9076_s25 + $0x68] sm:$0xff] %vm4134_vm3, %v4636_v32  ;;  %v4093_v53 = vsel %vm4068_vm1, %v4060_v18, %v10169_v58 }
 0x710   : > { %v4434_v29 = vpop.permute.xlu0 %4433  ;;  %v4126_v33 = vsel %vm4101_vm2, %v4093_v53, %v10170_v47 }
 0x711   : > { %v4432_v5 = vpop.permute.xlu1 %4431  ;;  %v4159_v32 = vsel %vm4134_vm3, %v4126_v33, %v10171_v28  ;;  %v4512_v7 = vadd.f32 %v4434_v29, %v4352_v51  ;;  %v4593_v29 = vsel %vm4101_vm2, %v9400_v0, 0.0  ;;  %v4238_v51 = vadd.f32 %v5238_v46, %v9049_v27 }
 0x712   : > { %v4511_v43 = vadd.f32 %v4432_v5, %v4351_v24  ;;  %v4596_v5 = vsel %vm4101_vm2, %v9402_v25, 0.0  ;;  %v4237_v24 = vadd.f32 %v5238_v46, %v9046_v59 }
 0x71e   : > { %4582 = vadd.xlane.f32.xlu0 %v4581_v41  ;;  %v10173_v41 = vld [vmem:[#allocation28_spill] sm:$0xff] }
 0x71f   : > { %4585 = vadd.xlane.f32.xlu1 %v4584_v61  ;;  %v4192_v61 = vsel %vm4167_vm4, %v4159_v32, %v10172_v4  ;;  %v4061_v38 = vsel %vm4035_vm0, %v10174_v34, %v10173_v41  ;;  %v4311_v32 = vmul.f32 1.442695, %v9355_v23  ;;  %v10180_v4 = vld [vmem:[#allocation3_spill] sm:$0xff]  ;;  %v4313_v41 = vmul.f32 1.442695, %v9357_v22  ;;  %v10181_v34 = vld [vmem:[#allocation21_spill] sm:$0xff] }
 0x720   : > { %v4094_v36 = vsel %vm4068_vm1, %v4061_v38, %v10175_v54  ;;  %v4231_v60 = vadd.f32 %v8899_v8, %v4192_v61  ;;  %v4235_v61 = vadd.f32 %v8899_v8, %v10180_v4  ;;  %v4236_v38 = vadd.f32 %v8899_v8, %v10181_v34 }
 0x721   : > { %v4127_v21 = vsel %vm4101_vm2, %v4094_v36, %v10176_v12  ;;  %v5236_v12 = vld [vmem:[%s5339_s23 + $0xa0] sm:$0xff] }
 0x722   : > { %v4160_v10 = vsel %vm4134_vm3, %v4127_v21, %v10177_v39 }
 0x723   : > { %v4193_v50 = vsel %vm4167_vm4, %v4160_v10, %v10178_v2 }
 0x724   : > { %v4232_v48 = vadd.f32 %v8899_v8, %v4193_v50 }
 0x730   : > { %4443 = vrot.lane.b32.xlu1 %v9335_v52, %s5260_s21  ;;  %v4233_v52 = vadd.f32 %v8899_v8, %v9003_v19  ;;  %v5235_v19 = vld [vmem:[%s5339_s23 + $0x98] sm:$0xff] }
 0x734   : > { %4445 = vrot.lane.b32.xlu0 %v4230_v17, %s5260_s21  ;;  %v4309_v17 = vmul.f32 1.442695, %v9309_v40 }
 0x736   : > { %5174 = vpow2.f32 %v4309_v17 }
 0x737   : > { %5176 = vtanh.f32 %v4231_v60 }
 0x738   : > { %5178 = vtanh.f32 %v4232_v48 }
 0x739   : > { %5180 = vpow2.f32 %v4311_v32 }
 0x73a   : > { %5182 = vpow2.f32 %v4313_v41 }
 0x73b   : > { %5184 = vtanh.f32 %v4233_v52 }
 0x741   : > { %v4571_v62 = vpop.xlane.xlu0 %4570 }
 0x742   : > { %v4574_v1 = vpop.xlane.xlu1 %4573  ;;  %v4637_v15 = vsel %vm4101_vm2, %v4509_v44, %v4571_v62  ;;  %v4234_v44 = vadd.f32 %v8899_v8, %v10179_v16 }
 0x743   : > { %v4638_v6 = vsel %vm4101_vm2, %v4510_v20, %v4574_v1  ;;  %4669 = vst.msk [vmem:[%s9076_s25 + $0x70] sm:$0xff] %vm4134_vm3, %v4637_v15  ;;  %v5173_v20 = vpop.eup %5172 }
 0x744   : > { %4670 = vst.msk [vmem:[%s9076_s25 + $0x78] sm:$0xff] %vm4134_vm3, %v4638_v6  ;;  %v5175_v1 = vpop.eup %5174  ;;  %v5234_v6 = vld [vmem:[%s5339_s23 + $0x90] sm:$0xff]  ;;  %5186 = vtanh.f32 %v4234_v44 }
 0x745   : > { %v4438_v26 = vpop.permute.xlu0 %4437  ;;  %v4353_v15 = vmul.f32 %v5234_v6, %v5173_v20  ;;  %v9424_v53 = vpop.eup %5176 }
 0x746   : > { %v4436_v9 = vpop.permute.xlu1 %4435  ;;  %v9426_v47 = vpop.eup %5178  ;;  %v4599_v28 = vsel %vm4101_vm2, %v9424_v53, 0.0 }
 0x747   : > { %v4513_v40 = vadd.f32 %v4436_v9, %v4353_v15  ;;  %v4602_v33 = vsel %vm4101_vm2, %v9426_v47, 0.0  ;;  %v5181_v54 = vpop.eup %5180  ;;  %v4319_v15 = vmul.f32 1.442695, %v9424_v53 }
 0x748   : > { %v5183_v36 = vpop.eup %5182  ;;  %v4355_v21 = vmul.f32 %v5236_v12, %v5181_v54 }
 0x753   : > { %4588 = vadd.xlane.f32.xlu0 %v4587_v35 }
 0x754   : > { %4591 = vadd.xlane.f32.xlu1 %v4590_v49  ;;  %v4354_v49 = vmul.f32 %v5235_v19, %v5175_v1  ;;  %v4321_v19 = vmul.f32 1.442695, %v9426_v47 }
 0x756   : > { %v4514_v35 = vadd.f32 %v4438_v26, %v4354_v49  ;;  %v4315_v26 = vmul.f32 1.442695, %v9400_v0  ;;  %v5240_v0 = vld [vmem:[%s5339_s23 + $0xb8] sm:$0xff] }
 0x758   : > { %5188 = vpow2.f32 %v4315_v26 }
 0x759   : > { %5190 = vpow2.f32 %v4317_v13 }
 0x75a   : > { %5192 = vtanh.f32 %v4235_v61 }
 0x75b   : > { %5194 = vtanh.f32 %v4236_v38 }
 0x75c   : > { %5196 = vtanh.f32 %v4237_v24 }
 0x75d   : > { %5198 = vtanh.f32 %v4238_v51 }
 0x75e   : > { %5200 = vpow2.f32 %v4319_v15 }
 0x75f   : > { %5202 = vpow2.f32 %v4321_v19 }
 0x765   : > { %4447 = vrot.lane.b32.xlu1 %v4231_v60, %s5260_s21  ;;  %v5237_v60 = vld [vmem:[%s5339_s23 + $0xa8] sm:$0xff] }
 0x766   : > { %v4356_v11 = vmul.f32 %v5237_v60, %v5183_v36 }
 0x769   : > { %4449 = vrot.lane.b32.xlu0 %v4232_v48, %s5260_s21  ;;  %v9448_v48 = vpop.eup %5184 }
 0x76a   : > { %v9450_v42 = vpop.eup %5186  ;;  %v4605_v9 = vsel %vm4101_vm2, %v9448_v48, 0.0  ;;  %v4323_v41 = vmul.f32 1.442695, %v9448_v48 }
 0x76b   : > { %v4608_v56 = vsel %vm4101_vm2, %v9450_v42, 0.0  ;;  %v4325_v34 = vmul.f32 1.442695, %v9450_v42 }
 0x76c   : > { %5204 = vpow2.f32 %v4323_v41 }
 0x76d   : > { %5206 = vpow2.f32 %v4325_v34 }
 0x776   : > { %v4577_v63 = vpop.xlane.xlu0 %4576 }
 0x777   : > { %v4580_v14 = vpop.xlane.xlu1 %4579  ;;  %v4639_v30 = vsel %vm4101_vm2, %v4511_v43, %v4577_v63  ;;  %v5189_v43 = vpop.eup %5188 }
 0x778   : > { %v4640_v37 = vsel %vm4101_vm2, %v4512_v7, %v4580_v14  ;;  %4671 = vst.msk [vmem:[%s9076_s25 + $0x80] sm:$0xff] %vm4134_vm3, %v4639_v30  ;;  %v5191_v7 = vpop.eup %5190 }
 0x779   : > { %4672 = vst.msk [vmem:[%s9076_s25 + $0x88] sm:$0xff] %vm4134_vm3, %v4640_v37  ;;  %v5239_v37 = vld [vmem:[%s5339_s23 + $0xb0] sm:$0xff]  ;;  %v4358_v59 = vmul.f32 %v5240_v0, %v5191_v7  ;;  %v5193_v17 = vpop.eup %5192  ;;  %v5246_v7 = vld [vmem:[%s5339_s23 + $0xe8] sm:$0xff] }
 0x77a   : > { %v4442_v31 = vpop.permute.xlu0 %4441  ;;  %v4357_v30 = vmul.f32 %v5239_v37, %v5189_v43  ;;  %v5195_v16 = vpop.eup %5194  ;;  %v4611_v20 = vsel %vm4101_vm2, %v5193_v17, 0.0 }
 0x77b   : > { %v4440_v62 = vpop.permute.xlu1 %4439  ;;  %v4516_v39 = vadd.f32 %v4442_v31, %v4356_v11  ;;  %v4614_v1 = vsel %vm4101_vm2, %v5195_v16, 0.0  ;;  %v4329_v48 = vmul.f32 1.442695, %v5195_v16 }
 0x77c   : > { %v4515_v22 = vadd.f32 %v4440_v62, %v4355_v21  ;;  %v5244_v21 = vld [vmem:[%s5339_s23 + $0xd8] sm:$0xff] }
 0x788   : > { %4594 = vadd.xlane.f32.xlu0 %v4593_v29 }
 0x789   : > { %4597 = vadd.xlane.f32.xlu1 %v4596_v5 }
 0x79a   : > { %4451 = vrot.lane.b32.xlu1 %v4233_v52, %s5260_s21 }
 0x79e   : > { %4453 = vrot.lane.b32.xlu0 %v4234_v44, %s5260_s21  ;;  %v5197_v44 = vpop.eup %5196 }
 0x79f   : > { %v5199_v62 = vpop.eup %5198  ;;  %v4617_v6 = vsel %vm4101_vm2, %v5197_v44, 0.0  ;;  %v4331_v42 = vmul.f32 1.442695, %v5197_v44 }
 0x7a0   : > { %v4620_v31 = vsel %vm4101_vm2, %v5199_v62, 0.0  ;;  %v5201_v49 = vpop.eup %5200 }
 0x7ab   : > { %v4583_v55 = vpop.xlane.xlu0 %4582 }
 0x7ac   : > { %v4586_v3 = vpop.xlane.xlu1 %4585  ;;  %v4641_v58 = vsel %vm4101_vm2, %v4513_v40, %v4583_v55  ;;  %v5203_v40 = vpop.eup %5202  ;;  %v5241_v55 = vld [vmem:[%s5339_s23 + $0xc0] sm:$0xff] }
 0x7ad   : > { %v4642_v18 = vsel %vm4101_vm2, %v4514_v35, %v4586_v3  ;;  %4673 = vst.msk [vmem:[%s9076_s25 + $0x90] sm:$0xff] %vm4134_vm3, %v4641_v58  ;;  %v5242_v58 = vld [vmem:[%s5339_s23 + $0xc8] sm:$0xff] }
 0x7ae   : > { %4674 = vst.msk [vmem:[%s9076_s25 + $0x98] sm:$0xff] %vm4134_vm3, %v4642_v18  ;;  %v4359_v18 = vmul.f32 %v5241_v55, %v5201_v49 }
 0x7af   : > { %v4446_v23 = vpop.permute.xlu0 %4445 }
 0x7b0   : > { %v4444_v45 = vpop.permute.xlu1 %4443  ;;  %v4518_v25 = vadd.f32 %v4446_v23, %v4358_v59  ;;  %v5243_v23 = vld [vmem:[%s5339_s23 + $0xd0] sm:$0xff] }
 0x7b1   : > { %v4517_v5 = vadd.f32 %v4444_v45, %v4357_v30 }
 0x7bd   : > { %4600 = vadd.xlane.f32.xlu0 %v4599_v28 }
 0x7be   : > { %4603 = vadd.xlane.f32.xlu1 %v4602_v33  ;;  %v4360_v33 = vmul.f32 %v5242_v58, %v5203_v40 }
 0x7cf   : > { %4455 = vrot.lane.b32.xlu1 %v4235_v61, %s5260_s21 }
 0x7d3   : > { %4457 = vrot.lane.b32.xlu0 %v4236_v38, %s5260_s21  ;;  %v5205_v38 = vpop.eup %5204 }
 0x7d4   : > { %v5207_v54 = vpop.eup %5206  ;;  %v4361_v12 = vmul.f32 %v5243_v23, %v5205_v38 }
 0x7d5   : > { %v4362_v60 = vmul.f32 %v5244_v21, %v5207_v54 }
 0x7e0   : > { %v4589_v2 = vpop.xlane.xlu0 %4588 }
 0x7e1   : > { %v4592_v10 = vpop.xlane.xlu1 %4591  ;;  %v4643_v8 = vsel %vm4101_vm2, %v4515_v22, %v4589_v2 }
 0x7e2   : > { %v4644_v50 = vsel %vm4101_vm2, %v4516_v39, %v4592_v10  ;;  %4675 = vst.msk [vmem:[%s9076_s25 + $0xa0] sm:$0xff] %vm4134_vm3, %v4643_v8  ;;  %v4327_v8 = vmul.f32 1.442695, %v5193_v17 }
 0x7e3   : > { %4676 = vst.msk [vmem:[%s9076_s25 + $0xa8] sm:$0xff] %vm4134_vm3, %v4644_v50 }
 0x7e4   : > { %v4450_v63 = vpop.permute.xlu0 %4449  ;;  %5208 = vpow2.f32 %v4327_v8 }
 0x7e5   : > { %v4448_v14 = vpop.permute.xlu1 %4447  ;;  %v4520_v32 = vadd.f32 %v4450_v63, %v4360_v33  ;;  %5210 = vpow2.f32 %v4329_v48 }
 0x7e6   : > { %v4519_v28 = vadd.f32 %v4448_v14, %v4359_v18  ;;  %5212 = vpow2.f32 %v4331_v42 }
 0x7f2   : > { %4606 = vadd.xlane.f32.xlu0 %v4605_v9  ;;  %v5209_v9 = vpop.eup %5208 }
 0x7f3   : > { %4609 = vadd.xlane.f32.xlu1 %v4608_v56  ;;  %v4333_v56 = vmul.f32 1.442695, %v5199_v62  ;;  %v5211_v26 = vpop.eup %5210 }
 0x7f4   : > { %v5213_v13 = vpop.eup %5212  ;;  %v4364_v14 = vmul.f32 %v5246_v7, %v5211_v26 }
 0x7f5   : > { %5214 = vpow2.f32 %v4333_v56 }
 0x7ff   : > { %v5215_v63 = vpop.eup %5214 }
 0x804   : > { %4459 = vrot.lane.b32.xlu1 %v4237_v24, %s5260_s21 }
 0x808   : > { %4461 = vrot.lane.b32.xlu0 %v4238_v51, %s5260_s21  ;;  %v5245_v51 = vld [vmem:[%s5339_s23 + $0xe0] sm:$0xff] }
 0x809   : > { %v4363_v43 = vmul.f32 %v5245_v51, %v5209_v9 }
 0x815   : > { %v4595_v57 = vpop.xlane.xlu0 %4594 }
 0x816   : > { %v4598_v29 = vpop.xlane.xlu1 %4597  ;;  %v4645_v27 = vsel %vm4101_vm2, %v4517_v5, %v4595_v57  ;;  %v5247_v5 = vld [vmem:[%s5339_s23 + $0xf0] sm:$0xff] }
 0x817   : > { %v4646_v52 = vsel %vm4101_vm2, %v4518_v25, %v4598_v29  ;;  %4677 = vst.msk [vmem:[%s9076_s25 + $0xb0] sm:$0xff] %vm4134_vm3, %v4645_v27  ;;  %v4365_v25 = vmul.f32 %v5247_v5, %v5213_v13  ;;  %v5248_v29 = vld [vmem:[%s5339_s23 + $0xf8] sm:$0xff] }
 0x818   : > { %4678 = vst.msk [vmem:[%s9076_s25 + $0xb8] sm:$0xff] %vm4134_vm3, %v4646_v52  ;;  %v4366_v57 = vmul.f32 %v5248_v29, %v5215_v63 }
 0x819   : > { %v4454_v3 = vpop.permute.xlu0 %4453 }
 0x81a   : > { %v4452_v35 = vpop.permute.xlu1 %4451  ;;  %v4522_v22 = vadd.f32 %v4454_v3, %v4362_v60 }
 0x81b   : > { %v4521_v11 = vadd.f32 %v4452_v35, %v4361_v12 }
 0x827   : > { %4612 = vadd.xlane.f32.xlu0 %v4611_v20 }
 0x828   : > { %4615 = vadd.xlane.f32.xlu1 %v4614_v1 }
 0x82b   : > { %4618 = vadd.xlane.f32.xlu0 %v4617_v6 }
 0x82c   : > { %4621 = vadd.xlane.f32.xlu1 %v4620_v31 }
 0x84a   : > { %v4601_v53 = vpop.xlane.xlu0 %4600 }
 0x84b   : > { %v4604_v4 = vpop.xlane.xlu1 %4603  ;;  %v4647_v61 = vsel %vm4101_vm2, %v4519_v28, %v4601_v53 }
 0x84c   : > { %v4648_v47 = vsel %vm4101_vm2, %v4520_v32, %v4604_v4  ;;  %4679 = vst.msk [vmem:[%s9076_s25 + $0xc0] sm:$0xff] %vm4134_vm3, %v4647_v61 }
 0x84d   : > { %4680 = vst.msk [vmem:[%s9076_s25 + $0xc8] sm:$0xff] %vm4134_vm3, %v4648_v47 }
 0x84e   : > { %v4458_v45 = vpop.permute.xlu0 %4457 }
 0x84f   : > { %v4456_v36 = vpop.permute.xlu1 %4455  ;;  %v4524_v30 = vadd.f32 %v4458_v45, %v4364_v14 }
 0x850   : > { %v4523_v37 = vadd.f32 %v4456_v36, %v4363_v43 }
 0x87f   : > { %v4607_v10 = vpop.xlane.xlu0 %4606 }
 0x880   : > { %v4610_v39 = vpop.xlane.xlu1 %4609  ;;  %v4649_v50 = vsel %vm4101_vm2, %v4521_v11, %v4607_v10 }
 0x881   : > { %v4650_v2 = vsel %vm4101_vm2, %v4522_v22, %v4610_v39  ;;  %4681 = vst.msk [vmem:[%s9076_s25 + $0xd0] sm:$0xff] %vm4134_vm3, %v4649_v50 }
 0x882   : > { %4682 = vst.msk [vmem:[%s9076_s25 + $0xd8] sm:$0xff] %vm4134_vm3, %v4650_v2 }
 0x883   : > { %v4462_v24 = vpop.permute.xlu0 %4461 }
 0x884   : > { %v4460_v46 = vpop.permute.xlu1 %4459  ;;  %v4526_v16 = vadd.f32 %v4462_v24, %v4366_v57 }
 0x885   : > { %v4525_v17 = vadd.f32 %v4460_v46, %v4365_v25 }
 0x8b4   : > { %v4613_v59 = vpop.xlane.xlu0 %4612 }
 0x8b5   : > { %v4616_v0 = vpop.xlane.xlu1 %4615  ;;  %v4651_v27 = vsel %vm4101_vm2, %v4523_v37, %v4613_v59 }
 0x8b6   : > { %v4652_v52 = vsel %vm4101_vm2, %v4524_v30, %v4616_v0  ;;  %4683 = vst.msk [vmem:[%s9076_s25 + $0xe0] sm:$0xff] %vm4134_vm3, %v4651_v27 }
 0x8b7   : > { %4684 = vst.msk [vmem:[%s9076_s25 + $0xe8] sm:$0xff] %vm4134_vm3, %v4652_v52 }
 0x8b8   : > { %v4619_v20 = vpop.xlane.xlu0 %4618 }
 0x8b9   : > { %v4622_v44 = vpop.xlane.xlu1 %4621  ;;  %v4653_v62 = vsel %vm4101_vm2, %v4525_v17, %v4619_v20 }
 0x8ba   : > { %v4654_v1 = vsel %vm4101_vm2, %v4526_v16, %v4622_v44  ;;  %4685 = vst.msk [vmem:[%s9076_s25 + $0xf0] sm:$0xff] %vm4134_vm3, %v4653_v62 }
 0x8bb   : > { %4686 = vst.msk [vmem:[%s9076_s25 + $0xf8] sm:$0xff] %vm4134_vm3, %v4654_v1 }
 0x8bc PF: > { %s21_s17 = sadd.s32 1, %s5255_s17  }
 0x8bd   : > { %p18_p4 = scmp.ge.s32.totalorder %s21_s17, 4  }
 0x8bf   :  { %20 = sbr.rel (!%p18_p4) target bundleno = 1 (0x1), region = 94 }

</bundles_post_ra>
